<compile_context>
chip_gen: v7x
topology: tpu7x:2x2x1
jax: 0.10.0
libtpu: 0.0.40
codegen_flags: <defaults>
</compile_context>

<pallas_src>
import functools

import jax
import jax.numpy as jnp
from jax import lax
from jax.experimental import pallas as pl
from jax.experimental.pallas import tpu as pltpu


def _round_up(x, m):
    return ((x + m - 1) // m) * m


def _conv3x3_bn_kernel(x_ref, w_ref, b_ref, o_ref, xcat_ref, *, taps):
    """One image: 3x3 conv as a single K=9*Cin MXU matmul + folded-BN bias epilogue.

    x_ref:    (P, Cin, L)      phase-split, flattened padded input (bf16), raster on lanes.
    w_ref:    (Cout, 9*Cin)    per-tap weights (BN scale folded), taps concatenated on K (bf16).
    b_ref:    (Cout, 1)        folded BN bias (f32).
    o_ref:    (Cout, L)        flattened output raster (tail columns discarded by wrapper).
    xcat_ref: (9*Cin, L)       VMEM scratch holding the 9 rolled phase views stacked on K.
    """
    cin = x_ref.shape[1]
    L = x_ref.shape[2]
    for t, (phase, shift) in enumerate(taps):
        x_t = x_ref[phase]                       # lazy per-tap load, (Cin, L)
        if shift:
            # Left-shift the raster by `shift` positions (XLU lane rotation, off the
            # MXU/VPU critical slots).  Rolled in f32 (the well-trodden Mosaic path),
            # then stored back as bf16.
            x_t = pltpu.roll(x_t.astype(jnp.float32), L - shift, 1).astype(x_t.dtype)
        xcat_ref[pl.ds(t * cin, cin), :] = x_t
    acc = jnp.dot(w_ref[...], xcat_ref[...], preferred_element_type=jnp.float32)
    o_ref[...] = (acc + b_ref[...]).astype(o_ref.dtype)


def conv3x3_bn(x, weight, gamma, beta, rmean, rvar, *, stride, padding, dilation,
               eps=1e-5, out_dtype=jnp.bfloat16):
    """3x3 Conv2d (bias=False) + eval-mode BatchNorm2d on an NCHW tensor."""
    n, cin, h, w = x.shape
    cout = weight.shape[0]
    s, p, d = stride, padding, dilation

    ho = (h + 2 * p - 2 * d - 1) // s + 1
    wo = (w + 2 * p - 2 * d - 1) // s + 1
    assert ho > 0 and wo > 0

    # ---- fold BN (eval) into the conv: scale into weights, bias as epilogue ----
    scale = gamma / jnp.sqrt(rvar + eps)                                  # (Cout,)
    bias = (beta - rmean * scale).reshape(cout, 1).astype(jnp.float32)    # (Cout,1)
    w_scaled = weight * scale[:, None, None, None]                        # (Cout,Cin,3,3)
    # (Cout, 9*Cin): tap-major (dy,dx), Cin-minor — matches the in-kernel scratch stacking.
    w_cat = jnp.transpose(w_scaled, (0, 2, 3, 1)).reshape(cout, 9 * cin)
    w_cat = w_cat.astype(jnp.bfloat16)

    # ---- stays NCHW: one spatial zero-pad to the phase-aligned extent, phase-split ----
    hp, wp = h + 2 * p, w + 2 * p
    hph = max(-(-hp // s), ho + (2 * d) // s)   # rows per phase
    wph = max(-(-wp // s), wo + (2 * d) // s)   # raster width per phase
    nph = s * s

    # Static correctness invariants (roll "garbage" must land outside the kept region,
    # and valid outputs must never read past the genuinely padded input).
    assert ho + (2 * d) // s <= hph and wo + (2 * d) // s <= wph, (s, p, d, h, w)
    assert (ho - 1) * s + 2 * d < hp and (wo - 1) * s + 2 * d < wp, (s, p, d, h, w)

    x = x.astype(jnp.bfloat16)                   # bf16 glue/DMA bytes
    xp = jnp.pad(x, ((0, 0), (0, 0),
                     (p, s * hph - h - p), (p, s * wph - w - p)))
    if s == 1:
        x_flat = xp.reshape(n, 1, cin, hph * wph)            # no phase transpose needed
    else:
        xp = xp.reshape(n, cin, hph, s, wph, s).transpose(0, 3, 5, 1, 2, 4)
        x_flat = xp.reshape(n, nph, cin, hph * wph)
    L = _round_up(hph * wph, 128)                # lane-dense, 128-aligned flat length
    if L != hph * wph:
        x_flat = jnp.pad(x_flat, ((0, 0), (0, 0), (0, 0), (0, L - hph * wph)))

    # static tap table: tap (dy, dx) -> (phase index, left shift in the phase raster)
    taps = tuple(
        (((dy * d) % s) * s + (dx * d) % s,
         ((dy * d) // s) * wph + (dx * d) // s)
        for dy in range(3) for dx in range(3))

    kernel = functools.partial(_conv3x3_bn_kernel, taps=taps)
    out_flat = pl.pallas_call(
        kernel,
        out_shape=jax.ShapeDtypeStruct((n, cout, L), out_dtype),
        grid=(n,),                               # one image per step; batch split across TCs
        in_specs=[
            pl.BlockSpec((None, nph, cin, L), lambda i: (i, 0, 0, 0)),
            pl.BlockSpec((cout, 9 * cin), lambda i: (0, 0)),   # resident fused weights
            pl.BlockSpec((cout, 1), lambda i: (0, 0)),         # resident bias
        ],
        out_specs=pl.BlockSpec((None, cout, L), lambda i: (i, 0, 0)),
        scratch_shapes=[pltpu.VMEM((9 * cin, L), jnp.bfloat16)],
        compiler_params=pltpu.CompilerParams(
            dimension_semantics=("parallel",),
            vmem_limit_bytes=32 * 1024 * 1024,   # tiles are O(100KB); safe on v5e/v6e/v7x
        ),
    )(x_flat, w_cat, bias)

    # un-flatten: raster width is wph; keep the first ho rows / wo columns.
    return out_flat[:, :, : ho * wph].reshape(n, cout, ho, wph)[:, :, :, :wo]


# ---------------- bilinear align_corners=True resize (plain JAX glue) ----------------
def _interp_matrix(out_size, in_size):
    if in_size == 1:
        return jnp.ones((out_size, 1), jnp.float32)
    if out_size == 1:
        return jnp.zeros((1, in_size), jnp.float32).at[0, 0].set(1.0)
    pos = jnp.arange(out_size, dtype=jnp.float32) * ((in_size - 1) / (out_size - 1))
    lo = jnp.clip(jnp.floor(pos).astype(jnp.int32), 0, in_size - 2)
    frac = pos - lo.astype(jnp.float32)
    rows = jnp.arange(out_size)
    m = jnp.zeros((out_size, in_size), jnp.float32)
    m = m.at[rows, lo].add(1.0 - frac)
    m = m.at[rows, lo + 1].add(frac)
    return m


def resize_bilinear_align_corners(x, out_h, out_w):
    # TODO(synk): kept in plain JAX (separable interpolation matrices), not Pallas.
    n, c, h, w = x.shape
    if (h, w) == (out_h, out_w):
        return x   # exact identity for align_corners=True same-size resize
    mh = _interp_matrix(out_h, h)
    mw = _interp_matrix(out_w, w)
    return jnp.einsum("oh,nchw,pw->ncop", mh, x, mw,
                      precision=lax.Precision.HIGHEST)


# -------------------------------- USRM4 module --------------------------------
_USRM4_CFG = (
    ("conv1", 2, 1, 1),
    ("conv2", 2, 1, 1),
    ("conv3", 2, 1, 1),
    ("conv4", 1, 2, 2),
    ("conv_rev1", 1, 1, 1),
    ("conv_rev2", 1, 1, 1),
    ("conv_rev3", 1, 1, 1),
    ("conv_sum", 1, 1, 1),
)


class USRM4Pallas:
    """USRM4: each BasicConv = 3x3 conv (bias=False) + BatchNorm2d (eval mode)."""

    def __init__(self, channel, key):
        self.channel = channel
        self.cfg = {name: (s, p, d) for name, s, p, d in _USRM4_CFG}
        self.params = {}
        for name, _, _, _ in _USRM4_CFG:
            key, kw, kg, kb, km, kv = jax.random.split(key, 6)
            wgt = 0.1 * jax.random.normal(kw, (channel, channel, 3, 3), jnp.float32)
            gamma = 1.0 + 0.05 * jax.random.normal(kg, (channel,), jnp.float32)
            beta = 0.05 * jax.random.normal(kb, (channel,), jnp.float32)
            rmean = 0.1 * jax.random.normal(km, (channel,), jnp.float32)
            rvar = jnp.abs(1.0 + 0.1 * jax.random.normal(kv, (channel,), jnp.float32))
            self.params[name] = (wgt, gamma, beta, rmean, rvar)

    def _conv(self, name, x):
        s, p, d = self.cfg[name]
        return conv3x3_bn(x, *self.params[name], stride=s, padding=p, dilation=d)

    def __call__(self, x, gi):
        y1 = self._conv("conv1", x)
        y1 = y1 + resize_bilinear_align_corners(gi, y1.shape[2], y1.shape[3])
        y2 = self._conv("conv2", y1)
        y3 = self._conv("conv3", y2)
        y4 = self._conv("conv4", y3)
        y3 = self._conv("conv_rev1",
                        y3 + resize_bilinear_align_corners(y4, y3.shape[2], y3.shape[3]))
        y2 = self._conv("conv_rev2",
                        y2 + resize_bilinear_align_corners(y3, y2.shape[2], y2.shape[3]))
        y1 = self._conv("conv_rev3",
                        y1 + resize_bilinear_align_corners(y2, y1.shape[2], y1.shape[3]))
        y = resize_bilinear_align_corners(y1, x.shape[2], x.shape[3])
        out = self._conv("conv_sum", jnp.maximum(x + y, 0.0))
        return out.astype(jnp.float32)

    # ---------------- plain-JAX f32 reference of the same forward ----------------
    def _conv_ref(self, name, x, eps=1e-5):
        wgt, gamma, beta, rmean, rvar = self.params[name]
        s, p, d = self.cfg[name]
        y = lax.conv_general_dilated(
            x, wgt, window_strides=(s, s), padding=[(p, p), (p, p)],
            rhs_dilation=(d, d), dimension_numbers=("NCHW", "OIHW", "NCHW"),
            precision=lax.Precision.HIGHEST)
        scale = (gamma / jnp.sqrt(rvar + eps)).reshape(1, -1, 1, 1)
        bias = (beta - rmean * gamma / jnp.sqrt(rvar + eps)).reshape(1, -1, 1, 1)
        return y * scale + bias

    def reference(self, x, gi):
        y1 = self._conv_ref("conv1", x)
        y1 = y1 + resize_bilinear_align_corners(gi, y1.shape[2], y1.shape[3])
        y2 = self._conv_ref("conv2", y1)
        y3 = self._conv_ref("conv3", y2)
        y4 = self._conv_ref("conv4", y3)
        y3 = self._conv_ref("conv_rev1",
                            y3 + resize_bilinear_align_corners(y4, y3.shape[2], y3.shape[3]))
        y2 = self._conv_ref("conv_rev2",
                            y2 + resize_bilinear_align_corners(y3, y2.shape[2], y2.shape[3]))
        y1 = self._conv_ref("conv_rev3",
                            y1 + resize_bilinear_align_corners(y2, y1.shape[2], y1.shape[3]))
        y = resize_bilinear_align_corners(y1, x.shape[2], x.shape[3])
        return self._conv_ref("conv_sum", jnp.maximum(x + y, 0.0))


if __name__ == "__main__":
    key = jax.random.PRNGKey(0)
    N, C, H, W = 2, 16, 32, 32
    key, kx, kg, kp = jax.random.split(key, 4)
    x = jax.random.normal(kx, (N, C, H, W), jnp.float32)     # NCHW
    gi = jax.random.normal(kg, (N, C, H // 4, W // 4), jnp.float32)

    model = USRM4Pallas(C, kp)
    fwd = jax.jit(lambda a, b: model(a, b))
    out = jax.block_until_ready(fwd(x, gi))

    ref = model.reference(x, gi)
    assert out.shape == ref.shape == (N, C, H, W), (out.shape, ref.shape)
    # Kernel runs the MXU in bf16 (f32 accumulation) with bf16 inter-layer activations;
    # compared against an f32 HIGHEST-precision reference over 8 conv layers.
    rel_err = float(jnp.max(jnp.abs(out - ref)) / (jnp.max(jnp.abs(ref)) + 1e-6))
    assert rel_err < 5e-2, rel_err
    print("KERNEL_OK")
</pallas_src>

<mosaic_0001>
module attributes {stable_mosaic.version = 11 : i64} {
  func.func private @main(%arg0: i32) attributes {dimension_semantics = [#tpu.dimension_semantics<core_parallel>], iteration_bounds = array<i64: 2>, tpu.core_type = #tpu.core_type<sc_scalar_subcore>, window_params = []} {
    return
  }
}

module attributes {stable_mosaic.version = 11 : i64} {
  func.func private @main(%arg0: i32) attributes {dimension_semantics = [#tpu.dimension_semantics<core_parallel>], iteration_bounds = array<i64: 2>, tpu.core_type = #tpu.core_type<sc_scalar_subcore>, window_params = []} {
    return
  }
}

module attributes {stable_mosaic.version = 11 : i64} {
  func.func @_conv3x3_bn_kernel(%arg0: i32, %arg1: memref<1x4x16x384xbf16, #tpu.memory_space<vmem>>, %arg2: memref<16x144xbf16, #tpu.memory_space<vmem>>, %arg3: memref<16x1xf32, #tpu.memory_space<vmem>>, %arg4: memref<1x16x384xbf16, #tpu.memory_space<vmem>>, %arg5: memref<144x384xbf16, #tpu.memory_space<vmem>>) attributes {dimension_semantics = [#tpu.dimension_semantics<parallel>], iteration_bounds = array<i64: 2>, scalar_prefetch = 0 : i64, scratch_operands = 1 : i64, tpu.core_type = #tpu.core_type<tc>, window_params = [{transform_indices = @transform_0, window_bounds = array<i64: 1, 4, 16, 384>}, {pipeline_mode = #tpu.pipeline_mode<synchronous>, transform_indices = @transform_1, window_bounds = array<i64: 16, 144>}, {pipeline_mode = #tpu.pipeline_mode<synchronous>, transform_indices = @transform_2, window_bounds = array<i64: 16, 1>}, {transform_indices = @transform_3, window_bounds = array<i64: 1, 16, 384>}]} {
    %c0 = arith.constant 0 : index
    %c0_0 = arith.constant 0 : index
    %c0_1 = arith.constant 0 : index
    %c0_2 = arith.constant 0 : index
    %0 = vector.load %arg1[%c0, %c0_0, %c0_1, %c0_2] : memref<1x4x16x384xbf16, #tpu.memory_space<vmem>>, vector<1x1x16x384xbf16>
    %1 = vector.shape_cast %0 : vector<1x1x16x384xbf16> to vector<16x384xbf16>
    %c0_3 = arith.constant 0 : index
    %c0_4 = arith.constant 0 : index
    %2 = vector.load %arg5[%c0_3, %c0_4] : memref<144x384xbf16, #tpu.memory_space<vmem>>, vector<16x384xbf16>
    tpu.vector_store %arg5[%c0_3, %c0_4], %1 {strides = array<i32>} : memref<144x384xbf16, #tpu.memory_space<vmem>>, vector<16x384xbf16>,
    %c0_5 = arith.constant 0 : index
    %c1 = arith.constant 1 : index
    %c0_6 = arith.constant 0 : index
    %c0_7 = arith.constant 0 : index
    %3 = vector.load %arg1[%c0_5, %c1, %c0_6, %c0_7] : memref<1x4x16x384xbf16, #tpu.memory_space<vmem>>, vector<1x1x16x384xbf16>
    %4 = vector.shape_cast %3 : vector<1x1x16x384xbf16> to vector<16x384xbf16>
    %c16 = arith.constant 16 : index
    %c0_8 = arith.constant 0 : index
    %5 = vector.load %arg5[%c16, %c0_8] : memref<144x384xbf16, #tpu.memory_space<vmem>>, vector<16x384xbf16>
    tpu.vector_store %arg5[%c16, %c0_8], %4 {strides = array<i32>} : memref<144x384xbf16, #tpu.memory_space<vmem>>, vector<16x384xbf16>,
    %c0_9 = arith.constant 0 : index
    %c0_10 = arith.constant 0 : index
    %c0_11 = arith.constant 0 : index
    %c0_12 = arith.constant 0 : index
    %6 = vector.load %arg1[%c0_9, %c0_10, %c0_11, %c0_12] : memref<1x4x16x384xbf16, #tpu.memory_space<vmem>>, vector<1x1x16x384xbf16>
    %7 = vector.shape_cast %6 : vector<1x1x16x384xbf16> to vector<16x384xbf16>
    %8 = arith.extf %7 : vector<16x384xbf16> to vector<16x384xf32>
    %c383_i32 = arith.constant 383 : i32
    %9 = tpu.dynamic_rotate %8 by %c383_i32 dim 1 : vector<16x384xf32>, i32 -> vector<16x384xf32>
    %10 = arith.truncf %9 : vector<16x384xf32> to vector<16x384xbf16>
    %c32 = arith.constant 32 : index
    %c0_13 = arith.constant 0 : index
    %11 = vector.load %arg5[%c32, %c0_13] : memref<144x384xbf16, #tpu.memory_space<vmem>>, vector<16x384xbf16>
    tpu.vector_store %arg5[%c32, %c0_13], %10 {strides = array<i32>} : memref<144x384xbf16, #tpu.memory_space<vmem>>, vector<16x384xbf16>,
    %c0_14 = arith.constant 0 : index
    %c2 = arith.constant 2 : index
    %c0_15 = arith.constant 0 : index
    %c0_16 = arith.constant 0 : index
    %12 = vector.load %arg1[%c0_14, %c2, %c0_15, %c0_16] : memref<1x4x16x384xbf16, #tpu.memory_space<vmem>>, vector<1x1x16x384xbf16>
    %13 = vector.shape_cast %12 : vector<1x1x16x384xbf16> to vector<16x384xbf16>
    %c48 = arith.constant 48 : index
    %c0_17 = arith.constant 0 : index
    %14 = vector.load %arg5[%c48, %c0_17] : memref<144x384xbf16, #tpu.memory_space<vmem>>, vector<16x384xbf16>
    tpu.vector_store %arg5[%c48, %c0_17], %13 {strides = array<i32>} : memref<144x384xbf16, #tpu.memory_space<vmem>>, vector<16x384xbf16>,
    %c0_18 = arith.constant 0 : index
    %c3 = arith.constant 3 : index
    %c0_19 = arith.constant 0 : index
    %c0_20 = arith.constant 0 : index
    %15 = vector.load %arg1[%c0_18, %c3, %c0_19, %c0_20] : memref<1x4x16x384xbf16, #tpu.memory_space<vmem>>, vector<1x1x16x384xbf16>
    %16 = vector.shape_cast %15 : vector<1x1x16x384xbf16> to vector<16x384xbf16>
    %c64 = arith.constant 64 : index
    %c0_21 = arith.constant 0 : index
    %17 = vector.load %arg5[%c64, %c0_21] : memref<144x384xbf16, #tpu.memory_space<vmem>>, vector<16x384xbf16>
    tpu.vector_store %arg5[%c64, %c0_21], %16 {strides = array<i32>} : memref<144x384xbf16, #tpu.memory_space<vmem>>, vector<16x384xbf16>,
    %c0_22 = arith.constant 0 : index
    %c2_23 = arith.constant 2 : index
    %c0_24 = arith.constant 0 : index
    %c0_25 = arith.constant 0 : index
    %18 = vector.load %arg1[%c0_22, %c2_23, %c0_24, %c0_25] : memref<1x4x16x384xbf16, #tpu.memory_space<vmem>>, vector<1x1x16x384xbf16>
    %19 = vector.shape_cast %18 : vector<1x1x16x384xbf16> to vector<16x384xbf16>
    %20 = arith.extf %19 : vector<16x384xbf16> to vector<16x384xf32>
    %c383_i32_26 = arith.constant 383 : i32
    %21 = tpu.dynamic_rotate %20 by %c383_i32_26 dim 1 : vector<16x384xf32>, i32 -> vector<16x384xf32>
    %22 = arith.truncf %21 : vector<16x384xf32> to vector<16x384xbf16>
    %c80 = arith.constant 80 : index
    %c0_27 = arith.constant 0 : index
    %23 = vector.load %arg5[%c80, %c0_27] : memref<144x384xbf16, #tpu.memory_space<vmem>>, vector<16x384xbf16>
    tpu.vector_store %arg5[%c80, %c0_27], %22 {strides = array<i32>} : memref<144x384xbf16, #tpu.memory_space<vmem>>, vector<16x384xbf16>,
    %c0_28 = arith.constant 0 : index
    %c0_29 = arith.constant 0 : index
    %c0_30 = arith.constant 0 : index
    %c0_31 = arith.constant 0 : index
    %24 = vector.load %arg1[%c0_28, %c0_29, %c0_30, %c0_31] : memref<1x4x16x384xbf16, #tpu.memory_space<vmem>>, vector<1x1x16x384xbf16>
    %25 = vector.shape_cast %24 : vector<1x1x16x384xbf16> to vector<16x384xbf16>
    %26 = arith.extf %25 : vector<16x384xbf16> to vector<16x384xf32>
    %c367_i32 = arith.constant 367 : i32
    %27 = tpu.dynamic_rotate %26 by %c367_i32 dim 1 : vector<16x384xf32>, i32 -> vector<16x384xf32>
    %28 = arith.truncf %27 : vector<16x384xf32> to vector<16x384xbf16>
    %c96 = arith.constant 96 : index
    %c0_32 = arith.constant 0 : index
    %29 = vector.load %arg5[%c96, %c0_32] : memref<144x384xbf16, #tpu.memory_space<vmem>>, vector<16x384xbf16>
    tpu.vector_store %arg5[%c96, %c0_32], %28 {strides = array<i32>} : memref<144x384xbf16, #tpu.memory_space<vmem>>, vector<16x384xbf16>,
    %c0_33 = arith.constant 0 : index
    %c1_34 = arith.constant 1 : index
    %c0_35 = arith.constant 0 : index
    %c0_36 = arith.constant 0 : index
    %30 = vector.load %arg1[%c0_33, %c1_34, %c0_35, %c0_36] : memref<1x4x16x384xbf16, #tpu.memory_space<vmem>>, vector<1x1x16x384xbf16>
    %31 = vector.shape_cast %30 : vector<1x1x16x384xbf16> to vector<16x384xbf16>
    %32 = arith.extf %31 : vector<16x384xbf16> to vector<16x384xf32>
    %c367_i32_37 = arith.constant 367 : i32
    %33 = tpu.dynamic_rotate %32 by %c367_i32_37 dim 1 : vector<16x384xf32>, i32 -> vector<16x384xf32>
    %34 = arith.truncf %33 : vector<16x384xf32> to vector<16x384xbf16>
    %c112 = arith.constant 112 : index
    %c0_38 = arith.constant 0 : index
    %35 = vector.load %arg5[%c112, %c0_38] : memref<144x384xbf16, #tpu.memory_space<vmem>>, vector<16x384xbf16>
    tpu.vector_store %arg5[%c112, %c0_38], %34 {strides = array<i32>} : memref<144x384xbf16, #tpu.memory_space<vmem>>, vector<16x384xbf16>,
    %c0_39 = arith.constant 0 : index
    %c0_40 = arith.constant 0 : index
    %c0_41 = arith.constant 0 : index
    %c0_42 = arith.constant 0 : index
    %36 = vector.load %arg1[%c0_39, %c0_40, %c0_41, %c0_42] : memref<1x4x16x384xbf16, #tpu.memory_space<vmem>>, vector<1x1x16x384xbf16>
    %37 = vector.shape_cast %36 : vector<1x1x16x384xbf16> to vector<16x384xbf16>
    %38 = arith.extf %37 : vector<16x384xbf16> to vector<16x384xf32>
    %c366_i32 = arith.constant 366 : i32
    %39 = tpu.dynamic_rotate %38 by %c366_i32 dim 1 : vector<16x384xf32>, i32 -> vector<16x384xf32>
    %40 = arith.truncf %39 : vector<16x384xf32> to vector<16x384xbf16>
    %c128 = arith.constant 128 : index
    %c0_43 = arith.constant 0 : index
    %41 = vector.load %arg5[%c128, %c0_43] : memref<144x384xbf16, #tpu.memory_space<vmem>>, vector<16x384xbf16>
    tpu.vector_store %arg5[%c128, %c0_43], %40 {strides = array<i32>} : memref<144x384xbf16, #tpu.memory_space<vmem>>, vector<16x384xbf16>,
    %c0_44 = arith.constant 0 : index
    %c0_45 = arith.constant 0 : index
    %42 = vector.load %arg2[%c0_44, %c0_45] : memref<16x144xbf16, #tpu.memory_space<vmem>>, vector<16x144xbf16>
    %c0_46 = arith.constant 0 : index
    %c0_47 = arith.constant 0 : index
    %43 = vector.load %arg5[%c0_46, %c0_47] : memref<144x384xbf16, #tpu.memory_space<vmem>>, vector<144x384xbf16>
    %cst = arith.constant dense<0.000000e+00> : vector<16x384xf32>
    %44 = tpu.matmul %42, %43, %cst {dimension_numbers = #tpu.dot_dimension_numbers<[1], [0], [0], [1], [0, 0, 1, 1], [], []>} : vector<16x144xbf16>, vector<144x384xbf16>, vector<16x384xf32> -> vector<16x384xf32>
    %c0_48 = arith.constant 0 : index
    %c0_49 = arith.constant 0 : index
    %45 = vector.load %arg3[%c0_48, %c0_49] : memref<16x1xf32, #tpu.memory_space<vmem>>, vector<16x1xf32>
    %46 = vector.broadcast %45 : vector<16x1xf32> to vector<16x384xf32>
    %47 = arith.addf %44, %46 : vector<16x384xf32>
    %48 = arith.truncf %47 : vector<16x384xf32> to vector<16x384xbf16>
    %c0_50 = arith.constant 0 : index
    %c0_51 = arith.constant 0 : index
    %c0_52 = arith.constant 0 : index
    %49 = vector.load %arg4[%c0_50, %c0_51, %c0_52] : memref<1x16x384xbf16, #tpu.memory_space<vmem>>, vector<1x16x384xbf16>
    %50 = vector.shape_cast %49 : vector<1x16x384xbf16> to vector<16x384xbf16>
    %51 = vector.shape_cast %48 : vector<16x384xbf16> to vector<1x16x384xbf16>
    tpu.vector_store %arg4[%c0_50, %c0_51, %c0_52], %51 {strides = array<i32>} : memref<1x16x384xbf16, #tpu.memory_space<vmem>>, vector<1x16x384xbf16>,
    return
  }
  func.func @transform_0(%arg0: i32) -> (i32, i32, i32, i32) {
    %c0_i32 = arith.constant 0 : i32
    %c0_i32_0 = arith.constant 0 : i32
    %c0_i32_1 = arith.constant 0 : i32
    %c0_i32_2 = arith.constant 0 : i32
    return %arg0, %c0_i32, %c0_i32_0, %c0_i32_1 : i32, i32, i32, i32
  }
  func.func @transform_1(%arg0: i32) -> (i32, i32) {
    %c0_i32 = arith.constant 0 : i32
    %c0_i32_0 = arith.constant 0 : i32
    %c0_i32_1 = arith.constant 0 : i32
    return %c0_i32, %c0_i32_0 : i32, i32
  }
  func.func @transform_2(%arg0: i32) -> (i32, i32) {
    %c0_i32 = arith.constant 0 : i32
    %c0_i32_0 = arith.constant 0 : i32
    %c0_i32_1 = arith.constant 0 : i32
    return %c0_i32, %c0_i32_0 : i32, i32
  }
  func.func @transform_3(%arg0: i32) -> (i32, i32, i32) {
    %c0_i32 = arith.constant 0 : i32
    %c0_i32_0 = arith.constant 0 : i32
    %c0_i32_1 = arith.constant 0 : i32
    return %arg0, %c0_i32, %c0_i32_0 : i32, i32, i32
  }
}

module attributes {stable_mosaic.version = 11 : i64} {
  func.func @_conv3x3_bn_kernel(%arg0: i32, %arg1: memref<1x4x16x128xbf16, #tpu.memory_space<vmem>>, %arg2: memref<16x144xbf16, #tpu.memory_space<vmem>>, %arg3: memref<16x1xf32, #tpu.memory_space<vmem>>, %arg4: memref<1x16x128xbf16, #tpu.memory_space<vmem>>, %arg5: memref<144x128xbf16, #tpu.memory_space<vmem>>) attributes {dimension_semantics = [#tpu.dimension_semantics<parallel>], iteration_bounds = array<i64: 2>, scalar_prefetch = 0 : i64, scratch_operands = 1 : i64, tpu.core_type = #tpu.core_type<tc>, window_params = [{transform_indices = @transform_0, window_bounds = array<i64: 1, 4, 16, 128>}, {pipeline_mode = #tpu.pipeline_mode<synchronous>, transform_indices = @transform_1, window_bounds = array<i64: 16, 144>}, {pipeline_mode = #tpu.pipeline_mode<synchronous>, transform_indices = @transform_2, window_bounds = array<i64: 16, 1>}, {transform_indices = @transform_3, window_bounds = array<i64: 1, 16, 128>}]} {
    %c0 = arith.constant 0 : index
    %c0_0 = arith.constant 0 : index
    %c0_1 = arith.constant 0 : index
    %c0_2 = arith.constant 0 : index
    %0 = vector.load %arg1[%c0, %c0_0, %c0_1, %c0_2] : memref<1x4x16x128xbf16, #tpu.memory_space<vmem>>, vector<1x1x16x128xbf16>
    %1 = vector.shape_cast %0 : vector<1x1x16x128xbf16> to vector<16x128xbf16>
    %c0_3 = arith.constant 0 : index
    %c0_4 = arith.constant 0 : index
    %2 = vector.load %arg5[%c0_3, %c0_4] : memref<144x128xbf16, #tpu.memory_space<vmem>>, vector<16x128xbf16>
    tpu.vector_store %arg5[%c0_3, %c0_4], %1 {strides = array<i32>} : memref<144x128xbf16, #tpu.memory_space<vmem>>, vector<16x128xbf16>,
    %c0_5 = arith.constant 0 : index
    %c1 = arith.constant 1 : index
    %c0_6 = arith.constant 0 : index
    %c0_7 = arith.constant 0 : index
    %3 = vector.load %arg1[%c0_5, %c1, %c0_6, %c0_7] : memref<1x4x16x128xbf16, #tpu.memory_space<vmem>>, vector<1x1x16x128xbf16>
    %4 = vector.shape_cast %3 : vector<1x1x16x128xbf16> to vector<16x128xbf16>
    %c16 = arith.constant 16 : index
    %c0_8 = arith.constant 0 : index
    %5 = vector.load %arg5[%c16, %c0_8] : memref<144x128xbf16, #tpu.memory_space<vmem>>, vector<16x128xbf16>
    tpu.vector_store %arg5[%c16, %c0_8], %4 {strides = array<i32>} : memref<144x128xbf16, #tpu.memory_space<vmem>>, vector<16x128xbf16>,
    %c0_9 = arith.constant 0 : index
    %c0_10 = arith.constant 0 : index
    %c0_11 = arith.constant 0 : index
    %c0_12 = arith.constant 0 : index
    %6 = vector.load %arg1[%c0_9, %c0_10, %c0_11, %c0_12] : memref<1x4x16x128xbf16, #tpu.memory_space<vmem>>, vector<1x1x16x128xbf16>
    %7 = vector.shape_cast %6 : vector<1x1x16x128xbf16> to vector<16x128xbf16>
    %8 = arith.extf %7 : vector<16x128xbf16> to vector<16x128xf32>
    %c127_i32 = arith.constant 127 : i32
    %9 = tpu.dynamic_rotate %8 by %c127_i32 dim 1 : vector<16x128xf32>, i32 -> vector<16x128xf32>
    %10 = arith.truncf %9 : vector<16x128xf32> to vector<16x128xbf16>
    %c32 = arith.constant 32 : index
    %c0_13 = arith.constant 0 : index
    %11 = vector.load %arg5[%c32, %c0_13] : memref<144x128xbf16, #tpu.memory_space<vmem>>, vector<16x128xbf16>
    tpu.vector_store %arg5[%c32, %c0_13], %10 {strides = array<i32>} : memref<144x128xbf16, #tpu.memory_space<vmem>>, vector<16x128xbf16>,
    %c0_14 = arith.constant 0 : index
    %c2 = arith.constant 2 : index
    %c0_15 = arith.constant 0 : index
    %c0_16 = arith.constant 0 : index
    %12 = vector.load %arg1[%c0_14, %c2, %c0_15, %c0_16] : memref<1x4x16x128xbf16, #tpu.memory_space<vmem>>, vector<1x1x16x128xbf16>
    %13 = vector.shape_cast %12 : vector<1x1x16x128xbf16> to vector<16x128xbf16>
    %c48 = arith.constant 48 : index
    %c0_17 = arith.constant 0 : index
    %14 = vector.load %arg5[%c48, %c0_17] : memref<144x128xbf16, #tpu.memory_space<vmem>>, vector<16x128xbf16>
    tpu.vector_store %arg5[%c48, %c0_17], %13 {strides = array<i32>} : memref<144x128xbf16, #tpu.memory_space<vmem>>, vector<16x128xbf16>,
    %c0_18 = arith.constant 0 : index
    %c3 = arith.constant 3 : index
    %c0_19 = arith.constant 0 : index
    %c0_20 = arith.constant 0 : index
    %15 = vector.load %arg1[%c0_18, %c3, %c0_19, %c0_20] : memref<1x4x16x128xbf16, #tpu.memory_space<vmem>>, vector<1x1x16x128xbf16>
    %16 = vector.shape_cast %15 : vector<1x1x16x128xbf16> to vector<16x128xbf16>
    %c64 = arith.constant 64 : index
    %c0_21 = arith.constant 0 : index
    %17 = vector.load %arg5[%c64, %c0_21] : memref<144x128xbf16, #tpu.memory_space<vmem>>, vector<16x128xbf16>
    tpu.vector_store %arg5[%c64, %c0_21], %16 {strides = array<i32>} : memref<144x128xbf16, #tpu.memory_space<vmem>>, vector<16x128xbf16>,
    %c0_22 = arith.constant 0 : index
    %c2_23 = arith.constant 2 : index
    %c0_24 = arith.constant 0 : index
    %c0_25 = arith.constant 0 : index
    %18 = vector.load %arg1[%c0_22, %c2_23, %c0_24, %c0_25] : memref<1x4x16x128xbf16, #tpu.memory_space<vmem>>, vector<1x1x16x128xbf16>
    %19 = vector.shape_cast %18 : vector<1x1x16x128xbf16> to vector<16x128xbf16>
    %20 = arith.extf %19 : vector<16x128xbf16> to vector<16x128xf32>
    %c127_i32_26 = arith.constant 127 : i32
    %21 = tpu.dynamic_rotate %20 by %c127_i32_26 dim 1 : vector<16x128xf32>, i32 -> vector<16x128xf32>
    %22 = arith.truncf %21 : vector<16x128xf32> to vector<16x128xbf16>
    %c80 = arith.constant 80 : index
    %c0_27 = arith.constant 0 : index
    %23 = vector.load %arg5[%c80, %c0_27] : memref<144x128xbf16, #tpu.memory_space<vmem>>, vector<16x128xbf16>
    tpu.vector_store %arg5[%c80, %c0_27], %22 {strides = array<i32>} : memref<144x128xbf16, #tpu.memory_space<vmem>>, vector<16x128xbf16>,
    %c0_28 = arith.constant 0 : index
    %c0_29 = arith.constant 0 : index
    %c0_30 = arith.constant 0 : index
    %c0_31 = arith.constant 0 : index
    %24 = vector.load %arg1[%c0_28, %c0_29, %c0_30, %c0_31] : memref<1x4x16x128xbf16, #tpu.memory_space<vmem>>, vector<1x1x16x128xbf16>
    %25 = vector.shape_cast %24 : vector<1x1x16x128xbf16> to vector<16x128xbf16>
    %26 = arith.extf %25 : vector<16x128xbf16> to vector<16x128xf32>
    %c119_i32 = arith.constant 119 : i32
    %27 = tpu.dynamic_rotate %26 by %c119_i32 dim 1 : vector<16x128xf32>, i32 -> vector<16x128xf32>
    %28 = arith.truncf %27 : vector<16x128xf32> to vector<16x128xbf16>
    %c96 = arith.constant 96 : index
    %c0_32 = arith.constant 0 : index
    %29 = vector.load %arg5[%c96, %c0_32] : memref<144x128xbf16, #tpu.memory_space<vmem>>, vector<16x128xbf16>
    tpu.vector_store %arg5[%c96, %c0_32], %28 {strides = array<i32>} : memref<144x128xbf16, #tpu.memory_space<vmem>>, vector<16x128xbf16>,
    %c0_33 = arith.constant 0 : index
    %c1_34 = arith.constant 1 : index
    %c0_35 = arith.constant 0 : index
    %c0_36 = arith.constant 0 : index
    %30 = vector.load %arg1[%c0_33, %c1_34, %c0_35, %c0_36] : memref<1x4x16x128xbf16, #tpu.memory_space<vmem>>, vector<1x1x16x128xbf16>
    %31 = vector.shape_cast %30 : vector<1x1x16x128xbf16> to vector<16x128xbf16>
    %32 = arith.extf %31 : vector<16x128xbf16> to vector<16x128xf32>
    %c119_i32_37 = arith.constant 119 : i32
    %33 = tpu.dynamic_rotate %32 by %c119_i32_37 dim 1 : vector<16x128xf32>, i32 -> vector<16x128xf32>
    %34 = arith.truncf %33 : vector<16x128xf32> to vector<16x128xbf16>
    %c112 = arith.constant 112 : index
    %c0_38 = arith.constant 0 : index
    %35 = vector.load %arg5[%c112, %c0_38] : memref<144x128xbf16, #tpu.memory_space<vmem>>, vector<16x128xbf16>
    tpu.vector_store %arg5[%c112, %c0_38], %34 {strides = array<i32>} : memref<144x128xbf16, #tpu.memory_space<vmem>>, vector<16x128xbf16>,
    %c0_39 = arith.constant 0 : index
    %c0_40 = arith.constant 0 : index
    %c0_41 = arith.constant 0 : index
    %c0_42 = arith.constant 0 : index
    %36 = vector.load %arg1[%c0_39, %c0_40, %c0_41, %c0_42] : memref<1x4x16x128xbf16, #tpu.memory_space<vmem>>, vector<1x1x16x128xbf16>
    %37 = vector.shape_cast %36 : vector<1x1x16x128xbf16> to vector<16x128xbf16>
    %38 = arith.extf %37 : vector<16x128xbf16> to vector<16x128xf32>
    %c118_i32 = arith.constant 118 : i32
    %39 = tpu.dynamic_rotate %38 by %c118_i32 dim 1 : vector<16x128xf32>, i32 -> vector<16x128xf32>
    %40 = arith.truncf %39 : vector<16x128xf32> to vector<16x128xbf16>
    %c128 = arith.constant 128 : index
    %c0_43 = arith.constant 0 : index
    %41 = vector.load %arg5[%c128, %c0_43] : memref<144x128xbf16, #tpu.memory_space<vmem>>, vector<16x128xbf16>
    tpu.vector_store %arg5[%c128, %c0_43], %40 {strides = array<i32>} : memref<144x128xbf16, #tpu.memory_space<vmem>>, vector<16x128xbf16>,
    %c0_44 = arith.constant 0 : index
    %c0_45 = arith.constant 0 : index
    %42 = vector.load %arg2[%c0_44, %c0_45] : memref<16x144xbf16, #tpu.memory_space<vmem>>, vector<16x144xbf16>
    %c0_46 = arith.constant 0 : index
    %c0_47 = arith.constant 0 : index
    %43 = vector.load %arg5[%c0_46, %c0_47] : memref<144x128xbf16, #tpu.memory_space<vmem>>, vector<144x128xbf16>
    %cst = arith.constant dense<0.000000e+00> : vector<16x128xf32>
    %44 = tpu.matmul %42, %43, %cst {dimension_numbers = #tpu.dot_dimension_numbers<[1], [0], [0], [1], [0, 0, 1, 1], [], []>} : vector<16x144xbf16>, vector<144x128xbf16>, vector<16x128xf32> -> vector<16x128xf32>
    %c0_48 = arith.constant 0 : index
    %c0_49 = arith.constant 0 : index
    %45 = vector.load %arg3[%c0_48, %c0_49] : memref<16x1xf32, #tpu.memory_space<vmem>>, vector<16x1xf32>
    %46 = vector.broadcast %45 : vector<16x1xf32> to vector<16x128xf32>
    %47 = arith.addf %44, %46 : vector<16x128xf32>
    %48 = arith.truncf %47 : vector<16x128xf32> to vector<16x128xbf16>
    %c0_50 = arith.constant 0 : index
    %c0_51 = arith.constant 0 : index
    %c0_52 = arith.constant 0 : index
    %49 = vector.load %arg4[%c0_50, %c0_51, %c0_52] : memref<1x16x128xbf16, #tpu.memory_space<vmem>>, vector<1x16x128xbf16>
    %50 = vector.shape_cast %49 : vector<1x16x128xbf16> to vector<16x128xbf16>
    %51 = vector.shape_cast %48 : vector<16x128xbf16> to vector<1x16x128xbf16>
    tpu.vector_store %arg4[%c0_50, %c0_51, %c0_52], %51 {strides = array<i32>} : memref<1x16x128xbf16, #tpu.memory_space<vmem>>, vector<1x16x128xbf16>,
    return
  }
  func.func @transform_0(%arg0: i32) -> (i32, i32, i32, i32) {
    %c0_i32 = arith.constant 0 : i32
    %c0_i32_0 = arith.constant 0 : i32
    %c0_i32_1 = arith.constant 0 : i32
    %c0_i32_2 = arith.constant 0 : i32
    return %arg0, %c0_i32, %c0_i32_0, %c0_i32_1 : i32, i32, i32, i32
  }
  func.func @transform_1(%arg0: i32) -> (i32, i32) {
    %c0_i32 = arith.constant 0 : i32
    %c0_i32_0 = arith.constant 0 : i32
    %c0_i32_1 = arith.constant 0 : i32
    return %c0_i32, %c0_i32_0 : i32, i32
  }
  func.func @transform_2(%arg0: i32) -> (i32, i32) {
    %c0_i32 = arith.constant 0 : i32
    %c0_i32_0 = arith.constant 0 : i32
    %c0_i32_1 = arith.constant 0 : i32
    return %c0_i32, %c0_i32_0 : i32, i32
  }
  func.func @transform_3(%arg0: i32) -> (i32, i32, i32) {
    %c0_i32 = arith.constant 0 : i32
    %c0_i32_0 = arith.constant 0 : i32
    %c0_i32_1 = arith.constant 0 : i32
    return %arg0, %c0_i32, %c0_i32_0 : i32, i32, i32
  }
}

module attributes {stable_mosaic.version = 11 : i64} {
  func.func @_conv3x3_bn_kernel(%arg0: i32, %arg1: memref<1x4x16x128xbf16, #tpu.memory_space<vmem>>, %arg2: memref<16x144xbf16, #tpu.memory_space<vmem>>, %arg3: memref<16x1xf32, #tpu.memory_space<vmem>>, %arg4: memref<1x16x128xbf16, #tpu.memory_space<vmem>>, %arg5: memref<144x128xbf16, #tpu.memory_space<vmem>>) attributes {dimension_semantics = [#tpu.dimension_semantics<parallel>], iteration_bounds = array<i64: 2>, scalar_prefetch = 0 : i64, scratch_operands = 1 : i64, tpu.core_type = #tpu.core_type<tc>, window_params = [{transform_indices = @transform_0, window_bounds = array<i64: 1, 4, 16, 128>}, {pipeline_mode = #tpu.pipeline_mode<synchronous>, transform_indices = @transform_1, window_bounds = array<i64: 16, 144>}, {pipeline_mode = #tpu.pipeline_mode<synchronous>, transform_indices = @transform_2, window_bounds = array<i64: 16, 1>}, {transform_indices = @transform_3, window_bounds = array<i64: 1, 16, 128>}]} {
    %c0 = arith.constant 0 : index
    %c0_0 = arith.constant 0 : index
    %c0_1 = arith.constant 0 : index
    %c0_2 = arith.constant 0 : index
    %0 = vector.load %arg1[%c0, %c0_0, %c0_1, %c0_2] : memref<1x4x16x128xbf16, #tpu.memory_space<vmem>>, vector<1x1x16x128xbf16>
    %1 = vector.shape_cast %0 : vector<1x1x16x128xbf16> to vector<16x128xbf16>
    %c0_3 = arith.constant 0 : index
    %c0_4 = arith.constant 0 : index
    %2 = vector.load %arg5[%c0_3, %c0_4] : memref<144x128xbf16, #tpu.memory_space<vmem>>, vector<16x128xbf16>
    tpu.vector_store %arg5[%c0_3, %c0_4], %1 {strides = array<i32>} : memref<144x128xbf16, #tpu.memory_space<vmem>>, vector<16x128xbf16>,
    %c0_5 = arith.constant 0 : index
    %c1 = arith.constant 1 : index
    %c0_6 = arith.constant 0 : index
    %c0_7 = arith.constant 0 : index
    %3 = vector.load %arg1[%c0_5, %c1, %c0_6, %c0_7] : memref<1x4x16x128xbf16, #tpu.memory_space<vmem>>, vector<1x1x16x128xbf16>
    %4 = vector.shape_cast %3 : vector<1x1x16x128xbf16> to vector<16x128xbf16>
    %c16 = arith.constant 16 : index
    %c0_8 = arith.constant 0 : index
    %5 = vector.load %arg5[%c16, %c0_8] : memref<144x128xbf16, #tpu.memory_space<vmem>>, vector<16x128xbf16>
    tpu.vector_store %arg5[%c16, %c0_8], %4 {strides = array<i32>} : memref<144x128xbf16, #tpu.memory_space<vmem>>, vector<16x128xbf16>,
    %c0_9 = arith.constant 0 : index
    %c0_10 = arith.constant 0 : index
    %c0_11 = arith.constant 0 : index
    %c0_12 = arith.constant 0 : index
    %6 = vector.load %arg1[%c0_9, %c0_10, %c0_11, %c0_12] : memref<1x4x16x128xbf16, #tpu.memory_space<vmem>>, vector<1x1x16x128xbf16>
    %7 = vector.shape_cast %6 : vector<1x1x16x128xbf16> to vector<16x128xbf16>
    %8 = arith.extf %7 : vector<16x128xbf16> to vector<16x128xf32>
    %c127_i32 = arith.constant 127 : i32
    %9 = tpu.dynamic_rotate %8 by %c127_i32 dim 1 : vector<16x128xf32>, i32 -> vector<16x128xf32>
    %10 = arith.truncf %9 : vector<16x128xf32> to vector<16x128xbf16>
    %c32 = arith.constant 32 : index
    %c0_13 = arith.constant 0 : index
    %11 = vector.load %arg5[%c32, %c0_13] : memref<144x128xbf16, #tpu.memory_space<vmem>>, vector<16x128xbf16>
    tpu.vector_store %arg5[%c32, %c0_13], %10 {strides = array<i32>} : memref<144x128xbf16, #tpu.memory_space<vmem>>, vector<16x128xbf16>,
    %c0_14 = arith.constant 0 : index
    %c2 = arith.constant 2 : index
    %c0_15 = arith.constant 0 : index
    %c0_16 = arith.constant 0 : index
    %12 = vector.load %arg1[%c0_14, %c2, %c0_15, %c0_16] : memref<1x4x16x128xbf16, #tpu.memory_space<vmem>>, vector<1x1x16x128xbf16>
    %13 = vector.shape_cast %12 : vector<1x1x16x128xbf16> to vector<16x128xbf16>
    %c48 = arith.constant 48 : index
    %c0_17 = arith.constant 0 : index
    %14 = vector.load %arg5[%c48, %c0_17] : memref<144x128xbf16, #tpu.memory_space<vmem>>, vector<16x128xbf16>
    tpu.vector_store %arg5[%c48, %c0_17], %13 {strides = array<i32>} : memref<144x128xbf16, #tpu.memory_space<vmem>>, vector<16x128xbf16>,
    %c0_18 = arith.constant 0 : index
    %c3 = arith.constant 3 : index
    %c0_19 = arith.constant 0 : index
    %c0_20 = arith.constant 0 : index
    %15 = vector.load %arg1[%c0_18, %c3, %c0_19, %c0_20] : memref<1x4x16x128xbf16, #tpu.memory_space<vmem>>, vector<1x1x16x128xbf16>
    %16 = vector.shape_cast %15 : vector<1x1x16x128xbf16> to vector<16x128xbf16>
    %c64 = arith.constant 64 : index
    %c0_21 = arith.constant 0 : index
    %17 = vector.load %arg5[%c64, %c0_21] : memref<144x128xbf16, #tpu.memory_space<vmem>>, vector<16x128xbf16>
    tpu.vector_store %arg5[%c64, %c0_21], %16 {strides = array<i32>} : memref<144x128xbf16, #tpu.memory_space<vmem>>, vector<16x128xbf16>,
    %c0_22 = arith.constant 0 : index
    %c2_23 = arith.constant 2 : index
    %c0_24 = arith.constant 0 : index
    %c0_25 = arith.constant 0 : index
    %18 = vector.load %arg1[%c0_22, %c2_23, %c0_24, %c0_25] : memref<1x4x16x128xbf16, #tpu.memory_space<vmem>>, vector<1x1x16x128xbf16>
    %19 = vector.shape_cast %18 : vector<1x1x16x128xbf16> to vector<16x128xbf16>
    %20 = arith.extf %19 : vector<16x128xbf16> to vector<16x128xf32>
    %c127_i32_26 = arith.constant 127 : i32
    %21 = tpu.dynamic_rotate %20 by %c127_i32_26 dim 1 : vector<16x128xf32>, i32 -> vector<16x128xf32>
    %22 = arith.truncf %21 : vector<16x128xf32> to vector<16x128xbf16>
    %c80 = arith.constant 80 : index
    %c0_27 = arith.constant 0 : index
    %23 = vector.load %arg5[%c80, %c0_27] : memref<144x128xbf16, #tpu.memory_space<vmem>>, vector<16x128xbf16>
    tpu.vector_store %arg5[%c80, %c0_27], %22 {strides = array<i32>} : memref<144x128xbf16, #tpu.memory_space<vmem>>, vector<16x128xbf16>,
    %c0_28 = arith.constant 0 : index
    %c0_29 = arith.constant 0 : index
    %c0_30 = arith.constant 0 : index
    %c0_31 = arith.constant 0 : index
    %24 = vector.load %arg1[%c0_28, %c0_29, %c0_30, %c0_31] : memref<1x4x16x128xbf16, #tpu.memory_space<vmem>>, vector<1x1x16x128xbf16>
    %25 = vector.shape_cast %24 : vector<1x1x16x128xbf16> to vector<16x128xbf16>
    %26 = arith.extf %25 : vector<16x128xbf16> to vector<16x128xf32>
    %c123_i32 = arith.constant 123 : i32
    %27 = tpu.dynamic_rotate %26 by %c123_i32 dim 1 : vector<16x128xf32>, i32 -> vector<16x128xf32>
    %28 = arith.truncf %27 : vector<16x128xf32> to vector<16x128xbf16>
    %c96 = arith.constant 96 : index
    %c0_32 = arith.constant 0 : index
    %29 = vector.load %arg5[%c96, %c0_32] : memref<144x128xbf16, #tpu.memory_space<vmem>>, vector<16x128xbf16>
    tpu.vector_store %arg5[%c96, %c0_32], %28 {strides = array<i32>} : memref<144x128xbf16, #tpu.memory_space<vmem>>, vector<16x128xbf16>,
    %c0_33 = arith.constant 0 : index
    %c1_34 = arith.constant 1 : index
    %c0_35 = arith.constant 0 : index
    %c0_36 = arith.constant 0 : index
    %30 = vector.load %arg1[%c0_33, %c1_34, %c0_35, %c0_36] : memref<1x4x16x128xbf16, #tpu.memory_space<vmem>>, vector<1x1x16x128xbf16>
    %31 = vector.shape_cast %30 : vector<1x1x16x128xbf16> to vector<16x128xbf16>
    %32 = arith.extf %31 : vector<16x128xbf16> to vector<16x128xf32>
    %c123_i32_37 = arith.constant 123 : i32
    %33 = tpu.dynamic_rotate %32 by %c123_i32_37 dim 1 : vector<16x128xf32>, i32 -> vector<16x128xf32>
    %34 = arith.truncf %33 : vector<16x128xf32> to vector<16x128xbf16>
    %c112 = arith.constant 112 : index
    %c0_38 = arith.constant 0 : index
    %35 = vector.load %arg5[%c112, %c0_38] : memref<144x128xbf16, #tpu.memory_space<vmem>>, vector<16x128xbf16>
    tpu.vector_store %arg5[%c112, %c0_38], %34 {strides = array<i32>} : memref<144x128xbf16, #tpu.memory_space<vmem>>, vector<16x128xbf16>,
    %c0_39 = arith.constant 0 : index
    %c0_40 = arith.constant 0 : index
    %c0_41 = arith.constant 0 : index
    %c0_42 = arith.constant 0 : index
    %36 = vector.load %arg1[%c0_39, %c0_40, %c0_41, %c0_42] : memref<1x4x16x128xbf16, #tpu.memory_space<vmem>>, vector<1x1x16x128xbf16>
    %37 = vector.shape_cast %36 : vector<1x1x16x128xbf16> to vector<16x128xbf16>
    %38 = arith.extf %37 : vector<16x128xbf16> to vector<16x128xf32>
    %c122_i32 = arith.constant 122 : i32
    %39 = tpu.dynamic_rotate %38 by %c122_i32 dim 1 : vector<16x128xf32>, i32 -> vector<16x128xf32>
    %40 = arith.truncf %39 : vector<16x128xf32> to vector<16x128xbf16>
    %c128 = arith.constant 128 : index
    %c0_43 = arith.constant 0 : index
    %41 = vector.load %arg5[%c128, %c0_43] : memref<144x128xbf16, #tpu.memory_space<vmem>>, vector<16x128xbf16>
    tpu.vector_store %arg5[%c128, %c0_43], %40 {strides = array<i32>} : memref<144x128xbf16, #tpu.memory_space<vmem>>, vector<16x128xbf16>,
    %c0_44 = arith.constant 0 : index
    %c0_45 = arith.constant 0 : index
    %42 = vector.load %arg2[%c0_44, %c0_45] : memref<16x144xbf16, #tpu.memory_space<vmem>>, vector<16x144xbf16>
    %c0_46 = arith.constant 0 : index
    %c0_47 = arith.constant 0 : index
    %43 = vector.load %arg5[%c0_46, %c0_47] : memref<144x128xbf16, #tpu.memory_space<vmem>>, vector<144x128xbf16>
    %cst = arith.constant dense<0.000000e+00> : vector<16x128xf32>
    %44 = tpu.matmul %42, %43, %cst {dimension_numbers = #tpu.dot_dimension_numbers<[1], [0], [0], [1], [0, 0, 1, 1], [], []>} : vector<16x144xbf16>, vector<144x128xbf16>, vector<16x128xf32> -> vector<16x128xf32>
    %c0_48 = arith.constant 0 : index
    %c0_49 = arith.constant 0 : index
    %45 = vector.load %arg3[%c0_48, %c0_49] : memref<16x1xf32, #tpu.memory_space<vmem>>, vector<16x1xf32>
    %46 = vector.broadcast %45 : vector<16x1xf32> to vector<16x128xf32>
    %47 = arith.addf %44, %46 : vector<16x128xf32>
    %48 = arith.truncf %47 : vector<16x128xf32> to vector<16x128xbf16>
    %c0_50 = arith.constant 0 : index
    %c0_51 = arith.constant 0 : index
    %c0_52 = arith.constant 0 : index
    %49 = vector.load %arg4[%c0_50, %c0_51, %c0_52] : memref<1x16x128xbf16, #tpu.memory_space<vmem>>, vector<1x16x128xbf16>
    %50 = vector.shape_cast %49 : vector<1x16x128xbf16> to vector<16x128xbf16>
    %51 = vector.shape_cast %48 : vector<16x128xbf16> to vector<1x16x128xbf16>
    tpu.vector_store %arg4[%c0_50, %c0_51, %c0_52], %51 {strides = array<i32>} : memref<1x16x128xbf16, #tpu.memory_space<vmem>>, vector<1x16x128xbf16>,
    return
  }
  func.func @transform_0(%arg0: i32) -> (i32, i32, i32, i32) {
    %c0_i32 = arith.constant 0 : i32
    %c0_i32_0 = arith.constant 0 : i32
    %c0_i32_1 = arith.constant 0 : i32
    %c0_i32_2 = arith.constant 0 : i32
    return %arg0, %c0_i32, %c0_i32_0, %c0_i32_1 : i32, i32, i32, i32
  }
  func.func @transform_1(%arg0: i32) -> (i32, i32) {
    %c0_i32 = arith.constant 0 : i32
    %c0_i32_0 = arith.constant 0 : i32
    %c0_i32_1 = arith.constant 0 : i32
    return %c0_i32, %c0_i32_0 : i32, i32
  }
  func.func @transform_2(%arg0: i32) -> (i32, i32) {
    %c0_i32 = arith.constant 0 : i32
    %c0_i32_0 = arith.constant 0 : i32
    %c0_i32_1 = arith.constant 0 : i32
    return %c0_i32, %c0_i32_0 : i32, i32
  }
  func.func @transform_3(%arg0: i32) -> (i32, i32, i32) {
    %c0_i32 = arith.constant 0 : i32
    %c0_i32_0 = arith.constant 0 : i32
    %c0_i32_1 = arith.constant 0 : i32
    return %arg0, %c0_i32, %c0_i32_0 : i32, i32, i32
  }
}

module attributes {stable_mosaic.version = 11 : i64} {
  func.func @_conv3x3_bn_kernel(%arg0: i32, %arg1: memref<1x1x16x128xbf16, #tpu.memory_space<vmem>>, %arg2: memref<16x144xbf16, #tpu.memory_space<vmem>>, %arg3: memref<16x1xf32, #tpu.memory_space<vmem>>, %arg4: memref<1x16x128xbf16, #tpu.memory_space<vmem>>, %arg5: memref<144x128xbf16, #tpu.memory_space<vmem>>) attributes {dimension_semantics = [#tpu.dimension_semantics<parallel>], iteration_bounds = array<i64: 2>, scalar_prefetch = 0 : i64, scratch_operands = 1 : i64, tpu.core_type = #tpu.core_type<tc>, window_params = [{transform_indices = @transform_0, window_bounds = array<i64: 1, 1, 16, 128>}, {pipeline_mode = #tpu.pipeline_mode<synchronous>, transform_indices = @transform_1, window_bounds = array<i64: 16, 144>}, {pipeline_mode = #tpu.pipeline_mode<synchronous>, transform_indices = @transform_2, window_bounds = array<i64: 16, 1>}, {transform_indices = @transform_3, window_bounds = array<i64: 1, 16, 128>}]} {
    %c0 = arith.constant 0 : index
    %c0_0 = arith.constant 0 : index
    %c0_1 = arith.constant 0 : index
    %c0_2 = arith.constant 0 : index
    %0 = vector.load %arg1[%c0, %c0_0, %c0_1, %c0_2] : memref<1x1x16x128xbf16, #tpu.memory_space<vmem>>, vector<1x1x16x128xbf16>
    %1 = vector.shape_cast %0 : vector<1x1x16x128xbf16> to vector<16x128xbf16>
    %c0_3 = arith.constant 0 : index
    %c0_4 = arith.constant 0 : index
    %2 = vector.load %arg5[%c0_3, %c0_4] : memref<144x128xbf16, #tpu.memory_space<vmem>>, vector<16x128xbf16>
    tpu.vector_store %arg5[%c0_3, %c0_4], %1 {strides = array<i32>} : memref<144x128xbf16, #tpu.memory_space<vmem>>, vector<16x128xbf16>,
    %c0_5 = arith.constant 0 : index
    %c0_6 = arith.constant 0 : index
    %c0_7 = arith.constant 0 : index
    %c0_8 = arith.constant 0 : index
    %3 = vector.load %arg1[%c0_5, %c0_6, %c0_7, %c0_8] : memref<1x1x16x128xbf16, #tpu.memory_space<vmem>>, vector<1x1x16x128xbf16>
    %4 = vector.shape_cast %3 : vector<1x1x16x128xbf16> to vector<16x128xbf16>
    %5 = arith.extf %4 : vector<16x128xbf16> to vector<16x128xf32>
    %c127_i32 = arith.constant 127 : i32
    %6 = tpu.dynamic_rotate %5 by %c127_i32 dim 1 : vector<16x128xf32>, i32 -> vector<16x128xf32>
    %7 = arith.truncf %6 : vector<16x128xf32> to vector<16x128xbf16>
    %c16 = arith.constant 16 : index
    %c0_9 = arith.constant 0 : index
    %8 = vector.load %arg5[%c16, %c0_9] : memref<144x128xbf16, #tpu.memory_space<vmem>>, vector<16x128xbf16>
    tpu.vector_store %arg5[%c16, %c0_9], %7 {strides = array<i32>} : memref<144x128xbf16, #tpu.memory_space<vmem>>, vector<16x128xbf16>,
    %c0_10 = arith.constant 0 : index
    %c0_11 = arith.constant 0 : index
    %c0_12 = arith.constant 0 : index
    %c0_13 = arith.constant 0 : index
    %9 = vector.load %arg1[%c0_10, %c0_11, %c0_12, %c0_13] : memref<1x1x16x128xbf16, #tpu.memory_space<vmem>>, vector<1x1x16x128xbf16>
    %10 = vector.shape_cast %9 : vector<1x1x16x128xbf16> to vector<16x128xbf16>
    %11 = arith.extf %10 : vector<16x128xbf16> to vector<16x128xf32>
    %c126_i32 = arith.constant 126 : i32
    %12 = tpu.dynamic_rotate %11 by %c126_i32 dim 1 : vector<16x128xf32>, i32 -> vector<16x128xf32>
    %13 = arith.truncf %12 : vector<16x128xf32> to vector<16x128xbf16>
    %c32 = arith.constant 32 : index
    %c0_14 = arith.constant 0 : index
    %14 = vector.load %arg5[%c32, %c0_14] : memref<144x128xbf16, #tpu.memory_space<vmem>>, vector<16x128xbf16>
    tpu.vector_store %arg5[%c32, %c0_14], %13 {strides = array<i32>} : memref<144x128xbf16, #tpu.memory_space<vmem>>, vector<16x128xbf16>,
    %c0_15 = arith.constant 0 : index
    %c0_16 = arith.constant 0 : index
    %c0_17 = arith.constant 0 : index
    %c0_18 = arith.constant 0 : index
    %15 = vector.load %arg1[%c0_15, %c0_16, %c0_17, %c0_18] : memref<1x1x16x128xbf16, #tpu.memory_space<vmem>>, vector<1x1x16x128xbf16>
    %16 = vector.shape_cast %15 : vector<1x1x16x128xbf16> to vector<16x128xbf16>
    %17 = arith.extf %16 : vector<16x128xbf16> to vector<16x128xf32>
    %c122_i32 = arith.constant 122 : i32
    %18 = tpu.dynamic_rotate %17 by %c122_i32 dim 1 : vector<16x128xf32>, i32 -> vector<16x128xf32>
    %19 = arith.truncf %18 : vector<16x128xf32> to vector<16x128xbf16>
    %c48 = arith.constant 48 : index
    %c0_19 = arith.constant 0 : index
    %20 = vector.load %arg5[%c48, %c0_19] : memref<144x128xbf16, #tpu.memory_space<vmem>>, vector<16x128xbf16>
    tpu.vector_store %arg5[%c48, %c0_19], %19 {strides = array<i32>} : memref<144x128xbf16, #tpu.memory_space<vmem>>, vector<16x128xbf16>,
    %c0_20 = arith.constant 0 : index
    %c0_21 = arith.constant 0 : index
    %c0_22 = arith.constant 0 : index
    %c0_23 = arith.constant 0 : index
    %21 = vector.load %arg1[%c0_20, %c0_21, %c0_22, %c0_23] : memref<1x1x16x128xbf16, #tpu.memory_space<vmem>>, vector<1x1x16x128xbf16>
    %22 = vector.shape_cast %21 : vector<1x1x16x128xbf16> to vector<16x128xbf16>
    %23 = arith.extf %22 : vector<16x128xbf16> to vector<16x128xf32>
    %c121_i32 = arith.constant 121 : i32
    %24 = tpu.dynamic_rotate %23 by %c121_i32 dim 1 : vector<16x128xf32>, i32 -> vector<16x128xf32>
    %25 = arith.truncf %24 : vector<16x128xf32> to vector<16x128xbf16>
    %c64 = arith.constant 64 : index
    %c0_24 = arith.constant 0 : index
    %26 = vector.load %arg5[%c64, %c0_24] : memref<144x128xbf16, #tpu.memory_space<vmem>>, vector<16x128xbf16>
    tpu.vector_store %arg5[%c64, %c0_24], %25 {strides = array<i32>} : memref<144x128xbf16, #tpu.memory_space<vmem>>, vector<16x128xbf16>,
    %c0_25 = arith.constant 0 : index
    %c0_26 = arith.constant 0 : index
    %c0_27 = arith.constant 0 : index
    %c0_28 = arith.constant 0 : index
    %27 = vector.load %arg1[%c0_25, %c0_26, %c0_27, %c0_28] : memref<1x1x16x128xbf16, #tpu.memory_space<vmem>>, vector<1x1x16x128xbf16>
    %28 = vector.shape_cast %27 : vector<1x1x16x128xbf16> to vector<16x128xbf16>
    %29 = arith.extf %28 : vector<16x128xbf16> to vector<16x128xf32>
    %c120_i32 = arith.constant 120 : i32
    %30 = tpu.dynamic_rotate %29 by %c120_i32 dim 1 : vector<16x128xf32>, i32 -> vector<16x128xf32>
    %31 = arith.truncf %30 : vector<16x128xf32> to vector<16x128xbf16>
    %c80 = arith.constant 80 : index
    %c0_29 = arith.constant 0 : index
    %32 = vector.load %arg5[%c80, %c0_29] : memref<144x128xbf16, #tpu.memory_space<vmem>>, vector<16x128xbf16>
    tpu.vector_store %arg5[%c80, %c0_29], %31 {strides = array<i32>} : memref<144x128xbf16, #tpu.memory_space<vmem>>, vector<16x128xbf16>,
    %c0_30 = arith.constant 0 : index
    %c0_31 = arith.constant 0 : index
    %c0_32 = arith.constant 0 : index
    %c0_33 = arith.constant 0 : index
    %33 = vector.load %arg1[%c0_30, %c0_31, %c0_32, %c0_33] : memref<1x1x16x128xbf16, #tpu.memory_space<vmem>>, vector<1x1x16x128xbf16>
    %34 = vector.shape_cast %33 : vector<1x1x16x128xbf16> to vector<16x128xbf16>
    %35 = arith.extf %34 : vector<16x128xbf16> to vector<16x128xf32>
    %c116_i32 = arith.constant 116 : i32
    %36 = tpu.dynamic_rotate %35 by %c116_i32 dim 1 : vector<16x128xf32>, i32 -> vector<16x128xf32>
    %37 = arith.truncf %36 : vector<16x128xf32> to vector<16x128xbf16>
    %c96 = arith.constant 96 : index
    %c0_34 = arith.constant 0 : index
    %38 = vector.load %arg5[%c96, %c0_34] : memref<144x128xbf16, #tpu.memory_space<vmem>>, vector<16x128xbf16>
    tpu.vector_store %arg5[%c96, %c0_34], %37 {strides = array<i32>} : memref<144x128xbf16, #tpu.memory_space<vmem>>, vector<16x128xbf16>,
    %c0_35 = arith.constant 0 : index
    %c0_36 = arith.constant 0 : index
    %c0_37 = arith.constant 0 : index
    %c0_38 = arith.constant 0 : index
    %39 = vector.load %arg1[%c0_35, %c0_36, %c0_37, %c0_38] : memref<1x1x16x128xbf16, #tpu.memory_space<vmem>>, vector<1x1x16x128xbf16>
    %40 = vector.shape_cast %39 : vector<1x1x16x128xbf16> to vector<16x128xbf16>
    %41 = arith.extf %40 : vector<16x128xbf16> to vector<16x128xf32>
    %c115_i32 = arith.constant 115 : i32
    %42 = tpu.dynamic_rotate %41 by %c115_i32 dim 1 : vector<16x128xf32>, i32 -> vector<16x128xf32>
    %43 = arith.truncf %42 : vector<16x128xf32> to vector<16x128xbf16>
    %c112 = arith.constant 112 : index
    %c0_39 = arith.constant 0 : index
    %44 = vector.load %arg5[%c112, %c0_39] : memref<144x128xbf16, #tpu.memory_space<vmem>>, vector<16x128xbf16>
    tpu.vector_store %arg5[%c112, %c0_39], %43 {strides = array<i32>} : memref<144x128xbf16, #tpu.memory_space<vmem>>, vector<16x128xbf16>,
    %c0_40 = arith.constant 0 : index
    %c0_41 = arith.constant 0 : index
    %c0_42 = arith.constant 0 : index
    %c0_43 = arith.constant 0 : index
    %45 = vector.load %arg1[%c0_40, %c0_41, %c0_42, %c0_43] : memref<1x1x16x128xbf16, #tpu.memory_space<vmem>>, vector<1x1x16x128xbf16>
    %46 = vector.shape_cast %45 : vector<1x1x16x128xbf16> to vector<16x128xbf16>
    %47 = arith.extf %46 : vector<16x128xbf16> to vector<16x128xf32>
    %c114_i32 = arith.constant 114 : i32
    %48 = tpu.dynamic_rotate %47 by %c114_i32 dim 1 : vector<16x128xf32>, i32 -> vector<16x128xf32>
    %49 = arith.truncf %48 : vector<16x128xf32> to vector<16x128xbf16>
    %c128 = arith.constant 128 : index
    %c0_44 = arith.constant 0 : index
    %50 = vector.load %arg5[%c128, %c0_44] : memref<144x128xbf16, #tpu.memory_space<vmem>>, vector<16x128xbf16>
    tpu.vector_store %arg5[%c128, %c0_44], %49 {strides = array<i32>} : memref<144x128xbf16, #tpu.memory_space<vmem>>, vector<16x128xbf16>,
    %c0_45 = arith.constant 0 : index
    %c0_46 = arith.constant 0 : index
    %51 = vector.load %arg2[%c0_45, %c0_46] : memref<16x144xbf16, #tpu.memory_space<vmem>>, vector<16x144xbf16>
    %c0_47 = arith.constant 0 : index
    %c0_48 = arith.constant 0 : index
    %52 = vector.load %arg5[%c0_47, %c0_48] : memref<144x128xbf16, #tpu.memory_space<vmem>>, vector<144x128xbf16>
    %cst = arith.constant dense<0.000000e+00> : vector<16x128xf32>
    %53 = tpu.matmul %51, %52, %cst {dimension_numbers = #tpu.dot_dimension_numbers<[1], [0], [0], [1], [0, 0, 1, 1], [], []>} : vector<16x144xbf16>, vector<144x128xbf16>, vector<16x128xf32> -> vector<16x128xf32>
    %c0_49 = arith.constant 0 : index
    %c0_50 = arith.constant 0 : index
    %54 = vector.load %arg3[%c0_49, %c0_50] : memref<16x1xf32, #tpu.memory_space<vmem>>, vector<16x1xf32>
    %55 = vector.broadcast %54 : vector<16x1xf32> to vector<16x128xf32>
    %56 = arith.addf %53, %55 : vector<16x128xf32>
    %57 = arith.truncf %56 : vector<16x128xf32> to vector<16x128xbf16>
    %c0_51 = arith.constant 0 : index
    %c0_52 = arith.constant 0 : index
    %c0_53 = arith.constant 0 : index
    %58 = vector.load %arg4[%c0_51, %c0_52, %c0_53] : memref<1x16x128xbf16, #tpu.memory_space<vmem>>, vector<1x16x128xbf16>
    %59 = vector.shape_cast %58 : vector<1x16x128xbf16> to vector<16x128xbf16>
    %60 = vector.shape_cast %57 : vector<16x128xbf16> to vector<1x16x128xbf16>
    tpu.vector_store %arg4[%c0_51, %c0_52, %c0_53], %60 {strides = array<i32>} : memref<1x16x128xbf16, #tpu.memory_space<vmem>>, vector<1x16x128xbf16>,
    return
  }
  func.func @transform_0(%arg0: i32) -> (i32, i32, i32, i32) {
    %c0_i32 = arith.constant 0 : i32
    %c0_i32_0 = arith.constant 0 : i32
    %c0_i32_1 = arith.constant 0 : i32
    %c0_i32_2 = arith.constant 0 : i32
    return %arg0, %c0_i32, %c0_i32_0, %c0_i32_1 : i32, i32, i32, i32
  }
  func.func @transform_1(%arg0: i32) -> (i32, i32) {
    %c0_i32 = arith.constant 0 : i32
    %c0_i32_0 = arith.constant 0 : i32
    %c0_i32_1 = arith.constant 0 : i32
    return %c0_i32, %c0_i32_0 : i32, i32
  }
  func.func @transform_2(%arg0: i32) -> (i32, i32) {
    %c0_i32 = arith.constant 0 : i32
    %c0_i32_0 = arith.constant 0 : i32
    %c0_i32_1 = arith.constant 0 : i32
    return %c0_i32, %c0_i32_0 : i32, i32
  }
  func.func @transform_3(%arg0: i32) -> (i32, i32, i32) {
    %c0_i32 = arith.constant 0 : i32
    %c0_i32_0 = arith.constant 0 : i32
    %c0_i32_1 = arith.constant 0 : i32
    return %arg0, %c0_i32, %c0_i32_0 : i32, i32, i32
  }
}

module attributes {stable_mosaic.version = 11 : i64} {
  func.func @_conv3x3_bn_kernel(%arg0: i32, %arg1: memref<1x1x16x128xbf16, #tpu.memory_space<vmem>>, %arg2: memref<16x144xbf16, #tpu.memory_space<vmem>>, %arg3: memref<16x1xf32, #tpu.memory_space<vmem>>, %arg4: memref<1x16x128xbf16, #tpu.memory_space<vmem>>, %arg5: memref<144x128xbf16, #tpu.memory_space<vmem>>) attributes {dimension_semantics = [#tpu.dimension_semantics<parallel>], iteration_bounds = array<i64: 2>, scalar_prefetch = 0 : i64, scratch_operands = 1 : i64, tpu.core_type = #tpu.core_type<tc>, window_params = [{transform_indices = @transform_0, window_bounds = array<i64: 1, 1, 16, 128>}, {pipeline_mode = #tpu.pipeline_mode<synchronous>, transform_indices = @transform_1, window_bounds = array<i64: 16, 144>}, {pipeline_mode = #tpu.pipeline_mode<synchronous>, transform_indices = @transform_2, window_bounds = array<i64: 16, 1>}, {transform_indices = @transform_3, window_bounds = array<i64: 1, 16, 128>}]} {
    %c0 = arith.constant 0 : index
    %c0_0 = arith.constant 0 : index
    %c0_1 = arith.constant 0 : index
    %c0_2 = arith.constant 0 : index
    %0 = vector.load %arg1[%c0, %c0_0, %c0_1, %c0_2] : memref<1x1x16x128xbf16, #tpu.memory_space<vmem>>, vector<1x1x16x128xbf16>
    %1 = vector.shape_cast %0 : vector<1x1x16x128xbf16> to vector<16x128xbf16>
    %c0_3 = arith.constant 0 : index
    %c0_4 = arith.constant 0 : index
    %2 = vector.load %arg5[%c0_3, %c0_4] : memref<144x128xbf16, #tpu.memory_space<vmem>>, vector<16x128xbf16>
    tpu.vector_store %arg5[%c0_3, %c0_4], %1 {strides = array<i32>} : memref<144x128xbf16, #tpu.memory_space<vmem>>, vector<16x128xbf16>,
    %c0_5 = arith.constant 0 : index
    %c0_6 = arith.constant 0 : index
    %c0_7 = arith.constant 0 : index
    %c0_8 = arith.constant 0 : index
    %3 = vector.load %arg1[%c0_5, %c0_6, %c0_7, %c0_8] : memref<1x1x16x128xbf16, #tpu.memory_space<vmem>>, vector<1x1x16x128xbf16>
    %4 = vector.shape_cast %3 : vector<1x1x16x128xbf16> to vector<16x128xbf16>
    %5 = arith.extf %4 : vector<16x128xbf16> to vector<16x128xf32>
    %c126_i32 = arith.constant 126 : i32
    %6 = tpu.dynamic_rotate %5 by %c126_i32 dim 1 : vector<16x128xf32>, i32 -> vector<16x128xf32>
    %7 = arith.truncf %6 : vector<16x128xf32> to vector<16x128xbf16>
    %c16 = arith.constant 16 : index
    %c0_9 = arith.constant 0 : index
    %8 = vector.load %arg5[%c16, %c0_9] : memref<144x128xbf16, #tpu.memory_space<vmem>>, vector<16x128xbf16>
    tpu.vector_store %arg5[%c16, %c0_9], %7 {strides = array<i32>} : memref<144x128xbf16, #tpu.memory_space<vmem>>, vector<16x128xbf16>,
    %c0_10 = arith.constant 0 : index
    %c0_11 = arith.constant 0 : index
    %c0_12 = arith.constant 0 : index
    %c0_13 = arith.constant 0 : index
    %9 = vector.load %arg1[%c0_10, %c0_11, %c0_12, %c0_13] : memref<1x1x16x128xbf16, #tpu.memory_space<vmem>>, vector<1x1x16x128xbf16>
    %10 = vector.shape_cast %9 : vector<1x1x16x128xbf16> to vector<16x128xbf16>
    %11 = arith.extf %10 : vector<16x128xbf16> to vector<16x128xf32>
    %c124_i32 = arith.constant 124 : i32
    %12 = tpu.dynamic_rotate %11 by %c124_i32 dim 1 : vector<16x128xf32>, i32 -> vector<16x128xf32>
    %13 = arith.truncf %12 : vector<16x128xf32> to vector<16x128xbf16>
    %c32 = arith.constant 32 : index
    %c0_14 = arith.constant 0 : index
    %14 = vector.load %arg5[%c32, %c0_14] : memref<144x128xbf16, #tpu.memory_space<vmem>>, vector<16x128xbf16>
    tpu.vector_store %arg5[%c32, %c0_14], %13 {strides = array<i32>} : memref<144x128xbf16, #tpu.memory_space<vmem>>, vector<16x128xbf16>,
    %c0_15 = arith.constant 0 : index
    %c0_16 = arith.constant 0 : index
    %c0_17 = arith.constant 0 : index
    %c0_18 = arith.constant 0 : index
    %15 = vector.load %arg1[%c0_15, %c0_16, %c0_17, %c0_18] : memref<1x1x16x128xbf16, #tpu.memory_space<vmem>>, vector<1x1x16x128xbf16>
    %16 = vector.shape_cast %15 : vector<1x1x16x128xbf16> to vector<16x128xbf16>
    %17 = arith.extf %16 : vector<16x128xbf16> to vector<16x128xf32>
    %c112_i32 = arith.constant 112 : i32
    %18 = tpu.dynamic_rotate %17 by %c112_i32 dim 1 : vector<16x128xf32>, i32 -> vector<16x128xf32>
    %19 = arith.truncf %18 : vector<16x128xf32> to vector<16x128xbf16>
    %c48 = arith.constant 48 : index
    %c0_19 = arith.constant 0 : index
    %20 = vector.load %arg5[%c48, %c0_19] : memref<144x128xbf16, #tpu.memory_space<vmem>>, vector<16x128xbf16>
    tpu.vector_store %arg5[%c48, %c0_19], %19 {strides = array<i32>} : memref<144x128xbf16, #tpu.memory_space<vmem>>, vector<16x128xbf16>,
    %c0_20 = arith.constant 0 : index
    %c0_21 = arith.constant 0 : index
    %c0_22 = arith.constant 0 : index
    %c0_23 = arith.constant 0 : index
    %21 = vector.load %arg1[%c0_20, %c0_21, %c0_22, %c0_23] : memref<1x1x16x128xbf16, #tpu.memory_space<vmem>>, vector<1x1x16x128xbf16>
    %22 = vector.shape_cast %21 : vector<1x1x16x128xbf16> to vector<16x128xbf16>
    %23 = arith.extf %22 : vector<16x128xbf16> to vector<16x128xf32>
    %c110_i32 = arith.constant 110 : i32
    %24 = tpu.dynamic_rotate %23 by %c110_i32 dim 1 : vector<16x128xf32>, i32 -> vector<16x128xf32>
    %25 = arith.truncf %24 : vector<16x128xf32> to vector<16x128xbf16>
    %c64 = arith.constant 64 : index
    %c0_24 = arith.constant 0 : index
    %26 = vector.load %arg5[%c64, %c0_24] : memref<144x128xbf16, #tpu.memory_space<vmem>>, vector<16x128xbf16>
    tpu.vector_store %arg5[%c64, %c0_24], %25 {strides = array<i32>} : memref<144x128xbf16, #tpu.memory_space<vmem>>, vector<16x128xbf16>,
    %c0_25 = arith.constant 0 : index
    %c0_26 = arith.constant 0 : index
    %c0_27 = arith.constant 0 : index
    %c0_28 = arith.constant 0 : index
    %27 = vector.load %arg1[%c0_25, %c0_26, %c0_27, %c0_28] : memref<1x1x16x128xbf16, #tpu.memory_space<vmem>>, vector<1x1x16x128xbf16>
    %28 = vector.shape_cast %27 : vector<1x1x16x128xbf16> to vector<16x128xbf16>
    %29 = arith.extf %28 : vector<16x128xbf16> to vector<16x128xf32>
    %c108_i32 = arith.constant 108 : i32
    %30 = tpu.dynamic_rotate %29 by %c108_i32 dim 1 : vector<16x128xf32>, i32 -> vector<16x128xf32>
    %31 = arith.truncf %30 : vector<16x128xf32> to vector<16x128xbf16>
    %c80 = arith.constant 80 : index
    %c0_29 = arith.constant 0 : index
    %32 = vector.load %arg5[%c80, %c0_29] : memref<144x128xbf16, #tpu.memory_space<vmem>>, vector<16x128xbf16>
    tpu.vector_store %arg5[%c80, %c0_29], %31 {strides = array<i32>} : memref<144x128xbf16, #tpu.memory_space<vmem>>, vector<16x128xbf16>,
    %c0_30 = arith.constant 0 : index
    %c0_31 = arith.constant 0 : index
    %c0_32 = arith.constant 0 : index
    %c0_33 = arith.constant 0 : index
    %33 = vector.load %arg1[%c0_30, %c0_31, %c0_32, %c0_33] : memref<1x1x16x128xbf16, #tpu.memory_space<vmem>>, vector<1x1x16x128xbf16>
    %34 = vector.shape_cast %33 : vector<1x1x16x128xbf16> to vector<16x128xbf16>
    %35 = arith.extf %34 : vector<16x128xbf16> to vector<16x128xf32>
    %c96_i32 = arith.constant 96 : i32
    %36 = tpu.dynamic_rotate %35 by %c96_i32 dim 1 : vector<16x128xf32>, i32 -> vector<16x128xf32>
    %37 = arith.truncf %36 : vector<16x128xf32> to vector<16x128xbf16>
    %c96 = arith.constant 96 : index
    %c0_34 = arith.constant 0 : index
    %38 = vector.load %arg5[%c96, %c0_34] : memref<144x128xbf16, #tpu.memory_space<vmem>>, vector<16x128xbf16>
    tpu.vector_store %arg5[%c96, %c0_34], %37 {strides = array<i32>} : memref<144x128xbf16, #tpu.memory_space<vmem>>, vector<16x128xbf16>,
    %c0_35 = arith.constant 0 : index
    %c0_36 = arith.constant 0 : index
    %c0_37 = arith.constant 0 : index
    %c0_38 = arith.constant 0 : index
    %39 = vector.load %arg1[%c0_35, %c0_36, %c0_37, %c0_38] : memref<1x1x16x128xbf16, #tpu.memory_space<vmem>>, vector<1x1x16x128xbf16>
    %40 = vector.shape_cast %39 : vector<1x1x16x128xbf16> to vector<16x128xbf16>
    %41 = arith.extf %40 : vector<16x128xbf16> to vector<16x128xf32>
    %c94_i32 = arith.constant 94 : i32
    %42 = tpu.dynamic_rotate %41 by %c94_i32 dim 1 : vector<16x128xf32>, i32 -> vector<16x128xf32>
    %43 = arith.truncf %42 : vector<16x128xf32> to vector<16x128xbf16>
    %c112 = arith.constant 112 : index
    %c0_39 = arith.constant 0 : index
    %44 = vector.load %arg5[%c112, %c0_39] : memref<144x128xbf16, #tpu.memory_space<vmem>>, vector<16x128xbf16>
    tpu.vector_store %arg5[%c112, %c0_39], %43 {strides = array<i32>} : memref<144x128xbf16, #tpu.memory_space<vmem>>, vector<16x128xbf16>,
    %c0_40 = arith.constant 0 : index
    %c0_41 = arith.constant 0 : index
    %c0_42 = arith.constant 0 : index
    %c0_43 = arith.constant 0 : index
    %45 = vector.load %arg1[%c0_40, %c0_41, %c0_42, %c0_43] : memref<1x1x16x128xbf16, #tpu.memory_space<vmem>>, vector<1x1x16x128xbf16>
    %46 = vector.shape_cast %45 : vector<1x1x16x128xbf16> to vector<16x128xbf16>
    %47 = arith.extf %46 : vector<16x128xbf16> to vector<16x128xf32>
    %c92_i32 = arith.constant 92 : i32
    %48 = tpu.dynamic_rotate %47 by %c92_i32 dim 1 : vector<16x128xf32>, i32 -> vector<16x128xf32>
    %49 = arith.truncf %48 : vector<16x128xf32> to vector<16x128xbf16>
    %c128 = arith.constant 128 : index
    %c0_44 = arith.constant 0 : index
    %50 = vector.load %arg5[%c128, %c0_44] : memref<144x128xbf16, #tpu.memory_space<vmem>>, vector<16x128xbf16>
    tpu.vector_store %arg5[%c128, %c0_44], %49 {strides = array<i32>} : memref<144x128xbf16, #tpu.memory_space<vmem>>, vector<16x128xbf16>,
    %c0_45 = arith.constant 0 : index
    %c0_46 = arith.constant 0 : index
    %51 = vector.load %arg2[%c0_45, %c0_46] : memref<16x144xbf16, #tpu.memory_space<vmem>>, vector<16x144xbf16>
    %c0_47 = arith.constant 0 : index
    %c0_48 = arith.constant 0 : index
    %52 = vector.load %arg5[%c0_47, %c0_48] : memref<144x128xbf16, #tpu.memory_space<vmem>>, vector<144x128xbf16>
    %cst = arith.constant dense<0.000000e+00> : vector<16x128xf32>
    %53 = tpu.matmul %51, %52, %cst {dimension_numbers = #tpu.dot_dimension_numbers<[1], [0], [0], [1], [0, 0, 1, 1], [], []>} : vector<16x144xbf16>, vector<144x128xbf16>, vector<16x128xf32> -> vector<16x128xf32>
    %c0_49 = arith.constant 0 : index
    %c0_50 = arith.constant 0 : index
    %54 = vector.load %arg3[%c0_49, %c0_50] : memref<16x1xf32, #tpu.memory_space<vmem>>, vector<16x1xf32>
    %55 = vector.broadcast %54 : vector<16x1xf32> to vector<16x128xf32>
    %56 = arith.addf %53, %55 : vector<16x128xf32>
    %57 = arith.truncf %56 : vector<16x128xf32> to vector<16x128xbf16>
    %c0_51 = arith.constant 0 : index
    %c0_52 = arith.constant 0 : index
    %c0_53 = arith.constant 0 : index
    %58 = vector.load %arg4[%c0_51, %c0_52, %c0_53] : memref<1x16x128xbf16, #tpu.memory_space<vmem>>, vector<1x16x128xbf16>
    %59 = vector.shape_cast %58 : vector<1x16x128xbf16> to vector<16x128xbf16>
    %60 = vector.shape_cast %57 : vector<16x128xbf16> to vector<1x16x128xbf16>
    tpu.vector_store %arg4[%c0_51, %c0_52, %c0_53], %60 {strides = array<i32>} : memref<1x16x128xbf16, #tpu.memory_space<vmem>>, vector<1x16x128xbf16>,
    return
  }
  func.func @transform_0(%arg0: i32) -> (i32, i32, i32, i32) {
    %c0_i32 = arith.constant 0 : i32
    %c0_i32_0 = arith.constant 0 : i32
    %c0_i32_1 = arith.constant 0 : i32
    %c0_i32_2 = arith.constant 0 : i32
    return %arg0, %c0_i32, %c0_i32_0, %c0_i32_1 : i32, i32, i32, i32
  }
  func.func @transform_1(%arg0: i32) -> (i32, i32) {
    %c0_i32 = arith.constant 0 : i32
    %c0_i32_0 = arith.constant 0 : i32
    %c0_i32_1 = arith.constant 0 : i32
    return %c0_i32, %c0_i32_0 : i32, i32
  }
  func.func @transform_2(%arg0: i32) -> (i32, i32) {
    %c0_i32 = arith.constant 0 : i32
    %c0_i32_0 = arith.constant 0 : i32
    %c0_i32_1 = arith.constant 0 : i32
    return %c0_i32, %c0_i32_0 : i32, i32
  }
  func.func @transform_3(%arg0: i32) -> (i32, i32, i32) {
    %c0_i32 = arith.constant 0 : i32
    %c0_i32_0 = arith.constant 0 : i32
    %c0_i32_1 = arith.constant 0 : i32
    return %arg0, %c0_i32, %c0_i32_0 : i32, i32, i32
  }
}

module attributes {stable_mosaic.version = 11 : i64} {
  func.func @_conv3x3_bn_kernel(%arg0: i32, %arg1: memref<1x1x16x128xbf16, #tpu.memory_space<vmem>>, %arg2: memref<16x144xbf16, #tpu.memory_space<vmem>>, %arg3: memref<16x1xf32, #tpu.memory_space<vmem>>, %arg4: memref<1x16x128xbf16, #tpu.memory_space<vmem>>, %arg5: memref<144x128xbf16, #tpu.memory_space<vmem>>) attributes {dimension_semantics = [#tpu.dimension_semantics<parallel>], iteration_bounds = array<i64: 2>, scalar_prefetch = 0 : i64, scratch_operands = 1 : i64, tpu.core_type = #tpu.core_type<tc>, window_params = [{transform_indices = @transform_0, window_bounds = array<i64: 1, 1, 16, 128>}, {pipeline_mode = #tpu.pipeline_mode<synchronous>, transform_indices = @transform_1, window_bounds = array<i64: 16, 144>}, {pipeline_mode = #tpu.pipeline_mode<synchronous>, transform_indices = @transform_2, window_bounds = array<i64: 16, 1>}, {transform_indices = @transform_3, window_bounds = array<i64: 1, 16, 128>}]} {
    %c0 = arith.constant 0 : index
    %c0_0 = arith.constant 0 : index
    %c0_1 = arith.constant 0 : index
    %c0_2 = arith.constant 0 : index
    %0 = vector.load %arg1[%c0, %c0_0, %c0_1, %c0_2] : memref<1x1x16x128xbf16, #tpu.memory_space<vmem>>, vector<1x1x16x128xbf16>
    %1 = vector.shape_cast %0 : vector<1x1x16x128xbf16> to vector<16x128xbf16>
    %c0_3 = arith.constant 0 : index
    %c0_4 = arith.constant 0 : index
    %2 = vector.load %arg5[%c0_3, %c0_4] : memref<144x128xbf16, #tpu.memory_space<vmem>>, vector<16x128xbf16>
    tpu.vector_store %arg5[%c0_3, %c0_4], %1 {strides = array<i32>} : memref<144x128xbf16, #tpu.memory_space<vmem>>, vector<16x128xbf16>,
    %c0_5 = arith.constant 0 : index
    %c0_6 = arith.constant 0 : index
    %c0_7 = arith.constant 0 : index
    %c0_8 = arith.constant 0 : index
    %3 = vector.load %arg1[%c0_5, %c0_6, %c0_7, %c0_8] : memref<1x1x16x128xbf16, #tpu.memory_space<vmem>>, vector<1x1x16x128xbf16>
    %4 = vector.shape_cast %3 : vector<1x1x16x128xbf16> to vector<16x128xbf16>
    %5 = arith.extf %4 : vector<16x128xbf16> to vector<16x128xf32>
    %c127_i32 = arith.constant 127 : i32
    %6 = tpu.dynamic_rotate %5 by %c127_i32 dim 1 : vector<16x128xf32>, i32 -> vector<16x128xf32>
    %7 = arith.truncf %6 : vector<16x128xf32> to vector<16x128xbf16>
    %c16 = arith.constant 16 : index
    %c0_9 = arith.constant 0 : index
    %8 = vector.load %arg5[%c16, %c0_9] : memref<144x128xbf16, #tpu.memory_space<vmem>>, vector<16x128xbf16>
    tpu.vector_store %arg5[%c16, %c0_9], %7 {strides = array<i32>} : memref<144x128xbf16, #tpu.memory_space<vmem>>, vector<16x128xbf16>,
    %c0_10 = arith.constant 0 : index
    %c0_11 = arith.constant 0 : index
    %c0_12 = arith.constant 0 : index
    %c0_13 = arith.constant 0 : index
    %9 = vector.load %arg1[%c0_10, %c0_11, %c0_12, %c0_13] : memref<1x1x16x128xbf16, #tpu.memory_space<vmem>>, vector<1x1x16x128xbf16>
    %10 = vector.shape_cast %9 : vector<1x1x16x128xbf16> to vector<16x128xbf16>
    %11 = arith.extf %10 : vector<16x128xbf16> to vector<16x128xf32>
    %c126_i32 = arith.constant 126 : i32
    %12 = tpu.dynamic_rotate %11 by %c126_i32 dim 1 : vector<16x128xf32>, i32 -> vector<16x128xf32>
    %13 = arith.truncf %12 : vector<16x128xf32> to vector<16x128xbf16>
    %c32 = arith.constant 32 : index
    %c0_14 = arith.constant 0 : index
    %14 = vector.load %arg5[%c32, %c0_14] : memref<144x128xbf16, #tpu.memory_space<vmem>>, vector<16x128xbf16>
    tpu.vector_store %arg5[%c32, %c0_14], %13 {strides = array<i32>} : memref<144x128xbf16, #tpu.memory_space<vmem>>, vector<16x128xbf16>,
    %c0_15 = arith.constant 0 : index
    %c0_16 = arith.constant 0 : index
    %c0_17 = arith.constant 0 : index
    %c0_18 = arith.constant 0 : index
    %15 = vector.load %arg1[%c0_15, %c0_16, %c0_17, %c0_18] : memref<1x1x16x128xbf16, #tpu.memory_space<vmem>>, vector<1x1x16x128xbf16>
    %16 = vector.shape_cast %15 : vector<1x1x16x128xbf16> to vector<16x128xbf16>
    %17 = arith.extf %16 : vector<16x128xbf16> to vector<16x128xf32>
    %c118_i32 = arith.constant 118 : i32
    %18 = tpu.dynamic_rotate %17 by %c118_i32 dim 1 : vector<16x128xf32>, i32 -> vector<16x128xf32>
    %19 = arith.truncf %18 : vector<16x128xf32> to vector<16x128xbf16>
    %c48 = arith.constant 48 : index
    %c0_19 = arith.constant 0 : index
    %20 = vector.load %arg5[%c48, %c0_19] : memref<144x128xbf16, #tpu.memory_space<vmem>>, vector<16x128xbf16>
    tpu.vector_store %arg5[%c48, %c0_19], %19 {strides = array<i32>} : memref<144x128xbf16, #tpu.memory_space<vmem>>, vector<16x128xbf16>,
    %c0_20 = arith.constant 0 : index
    %c0_21 = arith.constant 0 : index
    %c0_22 = arith.constant 0 : index
    %c0_23 = arith.constant 0 : index
    %21 = vector.load %arg1[%c0_20, %c0_21, %c0_22, %c0_23] : memref<1x1x16x128xbf16, #tpu.memory_space<vmem>>, vector<1x1x16x128xbf16>
    %22 = vector.shape_cast %21 : vector<1x1x16x128xbf16> to vector<16x128xbf16>
    %23 = arith.extf %22 : vector<16x128xbf16> to vector<16x128xf32>
    %c117_i32 = arith.constant 117 : i32
    %24 = tpu.dynamic_rotate %23 by %c117_i32 dim 1 : vector<16x128xf32>, i32 -> vector<16x128xf32>
    %25 = arith.truncf %24 : vector<16x128xf32> to vector<16x128xbf16>
    %c64 = arith.constant 64 : index
    %c0_24 = arith.constant 0 : index
    %26 = vector.load %arg5[%c64, %c0_24] : memref<144x128xbf16, #tpu.memory_space<vmem>>, vector<16x128xbf16>
    tpu.vector_store %arg5[%c64, %c0_24], %25 {strides = array<i32>} : memref<144x128xbf16, #tpu.memory_space<vmem>>, vector<16x128xbf16>,
    %c0_25 = arith.constant 0 : index
    %c0_26 = arith.constant 0 : index
    %c0_27 = arith.constant 0 : index
    %c0_28 = arith.constant 0 : index
    %27 = vector.load %arg1[%c0_25, %c0_26, %c0_27, %c0_28] : memref<1x1x16x128xbf16, #tpu.memory_space<vmem>>, vector<1x1x16x128xbf16>
    %28 = vector.shape_cast %27 : vector<1x1x16x128xbf16> to vector<16x128xbf16>
    %29 = arith.extf %28 : vector<16x128xbf16> to vector<16x128xf32>
    %c116_i32 = arith.constant 116 : i32
    %30 = tpu.dynamic_rotate %29 by %c116_i32 dim 1 : vector<16x128xf32>, i32 -> vector<16x128xf32>
    %31 = arith.truncf %30 : vector<16x128xf32> to vector<16x128xbf16>
    %c80 = arith.constant 80 : index
    %c0_29 = arith.constant 0 : index
    %32 = vector.load %arg5[%c80, %c0_29] : memref<144x128xbf16, #tpu.memory_space<vmem>>, vector<16x128xbf16>
    tpu.vector_store %arg5[%c80, %c0_29], %31 {strides = array<i32>} : memref<144x128xbf16, #tpu.memory_space<vmem>>, vector<16x128xbf16>,
    %c0_30 = arith.constant 0 : index
    %c0_31 = arith.constant 0 : index
    %c0_32 = arith.constant 0 : index
    %c0_33 = arith.constant 0 : index
    %33 = vector.load %arg1[%c0_30, %c0_31, %c0_32, %c0_33] : memref<1x1x16x128xbf16, #tpu.memory_space<vmem>>, vector<1x1x16x128xbf16>
    %34 = vector.shape_cast %33 : vector<1x1x16x128xbf16> to vector<16x128xbf16>
    %35 = arith.extf %34 : vector<16x128xbf16> to vector<16x128xf32>
    %c108_i32 = arith.constant 108 : i32
    %36 = tpu.dynamic_rotate %35 by %c108_i32 dim 1 : vector<16x128xf32>, i32 -> vector<16x128xf32>
    %37 = arith.truncf %36 : vector<16x128xf32> to vector<16x128xbf16>
    %c96 = arith.constant 96 : index
    %c0_34 = arith.constant 0 : index
    %38 = vector.load %arg5[%c96, %c0_34] : memref<144x128xbf16, #tpu.memory_space<vmem>>, vector<16x128xbf16>
    tpu.vector_store %arg5[%c96, %c0_34], %37 {strides = array<i32>} : memref<144x128xbf16, #tpu.memory_space<vmem>>, vector<16x128xbf16>,
    %c0_35 = arith.constant 0 : index
    %c0_36 = arith.constant 0 : index
    %c0_37 = arith.constant 0 : index
    %c0_38 = arith.constant 0 : index
    %39 = vector.load %arg1[%c0_35, %c0_36, %c0_37, %c0_38] : memref<1x1x16x128xbf16, #tpu.memory_space<vmem>>, vector<1x1x16x128xbf16>
    %40 = vector.shape_cast %39 : vector<1x1x16x128xbf16> to vector<16x128xbf16>
    %41 = arith.extf %40 : vector<16x128xbf16> to vector<16x128xf32>
    %c107_i32 = arith.constant 107 : i32
    %42 = tpu.dynamic_rotate %41 by %c107_i32 dim 1 : vector<16x128xf32>, i32 -> vector<16x128xf32>
    %43 = arith.truncf %42 : vector<16x128xf32> to vector<16x128xbf16>
    %c112 = arith.constant 112 : index
    %c0_39 = arith.constant 0 : index
    %44 = vector.load %arg5[%c112, %c0_39] : memref<144x128xbf16, #tpu.memory_space<vmem>>, vector<16x128xbf16>
    tpu.vector_store %arg5[%c112, %c0_39], %43 {strides = array<i32>} : memref<144x128xbf16, #tpu.memory_space<vmem>>, vector<16x128xbf16>,
    %c0_40 = arith.constant 0 : index
    %c0_41 = arith.constant 0 : index
    %c0_42 = arith.constant 0 : index
    %c0_43 = arith.constant 0 : index
    %45 = vector.load %arg1[%c0_40, %c0_41, %c0_42, %c0_43] : memref<1x1x16x128xbf16, #tpu.memory_space<vmem>>, vector<1x1x16x128xbf16>
    %46 = vector.shape_cast %45 : vector<1x1x16x128xbf16> to vector<16x128xbf16>
    %47 = arith.extf %46 : vector<16x128xbf16> to vector<16x128xf32>
    %c106_i32 = arith.constant 106 : i32
    %48 = tpu.dynamic_rotate %47 by %c106_i32 dim 1 : vector<16x128xf32>, i32 -> vector<16x128xf32>
    %49 = arith.truncf %48 : vector<16x128xf32> to vector<16x128xbf16>
    %c128 = arith.constant 128 : index
    %c0_44 = arith.constant 0 : index
    %50 = vector.load %arg5[%c128, %c0_44] : memref<144x128xbf16, #tpu.memory_space<vmem>>, vector<16x128xbf16>
    tpu.vector_store %arg5[%c128, %c0_44], %49 {strides = array<i32>} : memref<144x128xbf16, #tpu.memory_space<vmem>>, vector<16x128xbf16>,
    %c0_45 = arith.constant 0 : index
    %c0_46 = arith.constant 0 : index
    %51 = vector.load %arg2[%c0_45, %c0_46] : memref<16x144xbf16, #tpu.memory_space<vmem>>, vector<16x144xbf16>
    %c0_47 = arith.constant 0 : index
    %c0_48 = arith.constant 0 : index
    %52 = vector.load %arg5[%c0_47, %c0_48] : memref<144x128xbf16, #tpu.memory_space<vmem>>, vector<144x128xbf16>
    %cst = arith.constant dense<0.000000e+00> : vector<16x128xf32>
    %53 = tpu.matmul %51, %52, %cst {dimension_numbers = #tpu.dot_dimension_numbers<[1], [0], [0], [1], [0, 0, 1, 1], [], []>} : vector<16x144xbf16>, vector<144x128xbf16>, vector<16x128xf32> -> vector<16x128xf32>
    %c0_49 = arith.constant 0 : index
    %c0_50 = arith.constant 0 : index
    %54 = vector.load %arg3[%c0_49, %c0_50] : memref<16x1xf32, #tpu.memory_space<vmem>>, vector<16x1xf32>
    %55 = vector.broadcast %54 : vector<16x1xf32> to vector<16x128xf32>
    %56 = arith.addf %53, %55 : vector<16x128xf32>
    %57 = arith.truncf %56 : vector<16x128xf32> to vector<16x128xbf16>
    %c0_51 = arith.constant 0 : index
    %c0_52 = arith.constant 0 : index
    %c0_53 = arith.constant 0 : index
    %58 = vector.load %arg4[%c0_51, %c0_52, %c0_53] : memref<1x16x128xbf16, #tpu.memory_space<vmem>>, vector<1x16x128xbf16>
    %59 = vector.shape_cast %58 : vector<1x16x128xbf16> to vector<16x128xbf16>
    %60 = vector.shape_cast %57 : vector<16x128xbf16> to vector<1x16x128xbf16>
    tpu.vector_store %arg4[%c0_51, %c0_52, %c0_53], %60 {strides = array<i32>} : memref<1x16x128xbf16, #tpu.memory_space<vmem>>, vector<1x16x128xbf16>,
    return
  }
  func.func @transform_0(%arg0: i32) -> (i32, i32, i32, i32) {
    %c0_i32 = arith.constant 0 : i32
    %c0_i32_0 = arith.constant 0 : i32
    %c0_i32_1 = arith.constant 0 : i32
    %c0_i32_2 = arith.constant 0 : i32
    return %arg0, %c0_i32, %c0_i32_0, %c0_i32_1 : i32, i32, i32, i32
  }
  func.func @transform_1(%arg0: i32) -> (i32, i32) {
    %c0_i32 = arith.constant 0 : i32
    %c0_i32_0 = arith.constant 0 : i32
    %c0_i32_1 = arith.constant 0 : i32
    return %c0_i32, %c0_i32_0 : i32, i32
  }
  func.func @transform_2(%arg0: i32) -> (i32, i32) {
    %c0_i32 = arith.constant 0 : i32
    %c0_i32_0 = arith.constant 0 : i32
    %c0_i32_1 = arith.constant 0 : i32
    return %c0_i32, %c0_i32_0 : i32, i32
  }
  func.func @transform_3(%arg0: i32) -> (i32, i32, i32) {
    %c0_i32 = arith.constant 0 : i32
    %c0_i32_0 = arith.constant 0 : i32
    %c0_i32_1 = arith.constant 0 : i32
    return %arg0, %c0_i32, %c0_i32_0 : i32, i32, i32
  }
}

module attributes {stable_mosaic.version = 11 : i64} {
  func.func @_conv3x3_bn_kernel(%arg0: i32, %arg1: memref<1x1x16x384xbf16, #tpu.memory_space<vmem>>, %arg2: memref<16x144xbf16, #tpu.memory_space<vmem>>, %arg3: memref<16x1xf32, #tpu.memory_space<vmem>>, %arg4: memref<1x16x384xbf16, #tpu.memory_space<vmem>>, %arg5: memref<144x384xbf16, #tpu.memory_space<vmem>>) attributes {dimension_semantics = [#tpu.dimension_semantics<parallel>], iteration_bounds = array<i64: 2>, scalar_prefetch = 0 : i64, scratch_operands = 1 : i64, tpu.core_type = #tpu.core_type<tc>, window_params = [{transform_indices = @transform_0, window_bounds = array<i64: 1, 1, 16, 384>}, {pipeline_mode = #tpu.pipeline_mode<synchronous>, transform_indices = @transform_1, window_bounds = array<i64: 16, 144>}, {pipeline_mode = #tpu.pipeline_mode<synchronous>, transform_indices = @transform_2, window_bounds = array<i64: 16, 1>}, {transform_indices = @transform_3, window_bounds = array<i64: 1, 16, 384>}]} {
    %c0 = arith.constant 0 : index
    %c0_0 = arith.constant 0 : index
    %c0_1 = arith.constant 0 : index
    %c0_2 = arith.constant 0 : index
    %0 = vector.load %arg1[%c0, %c0_0, %c0_1, %c0_2] : memref<1x1x16x384xbf16, #tpu.memory_space<vmem>>, vector<1x1x16x384xbf16>
    %1 = vector.shape_cast %0 : vector<1x1x16x384xbf16> to vector<16x384xbf16>
    %c0_3 = arith.constant 0 : index
    %c0_4 = arith.constant 0 : index
    %2 = vector.load %arg5[%c0_3, %c0_4] : memref<144x384xbf16, #tpu.memory_space<vmem>>, vector<16x384xbf16>
    tpu.vector_store %arg5[%c0_3, %c0_4], %1 {strides = array<i32>} : memref<144x384xbf16, #tpu.memory_space<vmem>>, vector<16x384xbf16>,
    %c0_5 = arith.constant 0 : index
    %c0_6 = arith.constant 0 : index
    %c0_7 = arith.constant 0 : index
    %c0_8 = arith.constant 0 : index
    %3 = vector.load %arg1[%c0_5, %c0_6, %c0_7, %c0_8] : memref<1x1x16x384xbf16, #tpu.memory_space<vmem>>, vector<1x1x16x384xbf16>
    %4 = vector.shape_cast %3 : vector<1x1x16x384xbf16> to vector<16x384xbf16>
    %5 = arith.extf %4 : vector<16x384xbf16> to vector<16x384xf32>
    %c383_i32 = arith.constant 383 : i32
    %6 = tpu.dynamic_rotate %5 by %c383_i32 dim 1 : vector<16x384xf32>, i32 -> vector<16x384xf32>
    %7 = arith.truncf %6 : vector<16x384xf32> to vector<16x384xbf16>
    %c16 = arith.constant 16 : index
    %c0_9 = arith.constant 0 : index
    %8 = vector.load %arg5[%c16, %c0_9] : memref<144x384xbf16, #tpu.memory_space<vmem>>, vector<16x384xbf16>
    tpu.vector_store %arg5[%c16, %c0_9], %7 {strides = array<i32>} : memref<144x384xbf16, #tpu.memory_space<vmem>>, vector<16x384xbf16>,
    %c0_10 = arith.constant 0 : index
    %c0_11 = arith.constant 0 : index
    %c0_12 = arith.constant 0 : index
    %c0_13 = arith.constant 0 : index
    %9 = vector.load %arg1[%c0_10, %c0_11, %c0_12, %c0_13] : memref<1x1x16x384xbf16, #tpu.memory_space<vmem>>, vector<1x1x16x384xbf16>
    %10 = vector.shape_cast %9 : vector<1x1x16x384xbf16> to vector<16x384xbf16>
    %11 = arith.extf %10 : vector<16x384xbf16> to vector<16x384xf32>
    %c382_i32 = arith.constant 382 : i32
    %12 = tpu.dynamic_rotate %11 by %c382_i32 dim 1 : vector<16x384xf32>, i32 -> vector<16x384xf32>
    %13 = arith.truncf %12 : vector<16x384xf32> to vector<16x384xbf16>
    %c32 = arith.constant 32 : index
    %c0_14 = arith.constant 0 : index
    %14 = vector.load %arg5[%c32, %c0_14] : memref<144x384xbf16, #tpu.memory_space<vmem>>, vector<16x384xbf16>
    tpu.vector_store %arg5[%c32, %c0_14], %13 {strides = array<i32>} : memref<144x384xbf16, #tpu.memory_space<vmem>>, vector<16x384xbf16>,
    %c0_15 = arith.constant 0 : index
    %c0_16 = arith.constant 0 : index
    %c0_17 = arith.constant 0 : index
    %c0_18 = arith.constant 0 : index
    %15 = vector.load %arg1[%c0_15, %c0_16, %c0_17, %c0_18] : memref<1x1x16x384xbf16, #tpu.memory_space<vmem>>, vector<1x1x16x384xbf16>
    %16 = vector.shape_cast %15 : vector<1x1x16x384xbf16> to vector<16x384xbf16>
    %17 = arith.extf %16 : vector<16x384xbf16> to vector<16x384xf32>
    %c366_i32 = arith.constant 366 : i32
    %18 = tpu.dynamic_rotate %17 by %c366_i32 dim 1 : vector<16x384xf32>, i32 -> vector<16x384xf32>
    %19 = arith.truncf %18 : vector<16x384xf32> to vector<16x384xbf16>
    %c48 = arith.constant 48 : index
    %c0_19 = arith.constant 0 : index
    %20 = vector.load %arg5[%c48, %c0_19] : memref<144x384xbf16, #tpu.memory_space<vmem>>, vector<16x384xbf16>
    tpu.vector_store %arg5[%c48, %c0_19], %19 {strides = array<i32>} : memref<144x384xbf16, #tpu.memory_space<vmem>>, vector<16x384xbf16>,
    %c0_20 = arith.constant 0 : index
    %c0_21 = arith.constant 0 : index
    %c0_22 = arith.constant 0 : index
    %c0_23 = arith.constant 0 : index
    %21 = vector.load %arg1[%c0_20, %c0_21, %c0_22, %c0_23] : memref<1x1x16x384xbf16, #tpu.memory_space<vmem>>, vector<1x1x16x384xbf16>
    %22 = vector.shape_cast %21 : vector<1x1x16x384xbf16> to vector<16x384xbf16>
    %23 = arith.extf %22 : vector<16x384xbf16> to vector<16x384xf32>
    %c365_i32 = arith.constant 365 : i32
    %24 = tpu.dynamic_rotate %23 by %c365_i32 dim 1 : vector<16x384xf32>, i32 -> vector<16x384xf32>
    %25 = arith.truncf %24 : vector<16x384xf32> to vector<16x384xbf16>
    %c64 = arith.constant 64 : index
    %c0_24 = arith.constant 0 : index
    %26 = vector.load %arg5[%c64, %c0_24] : memref<144x384xbf16, #tpu.memory_space<vmem>>, vector<16x384xbf16>
    tpu.vector_store %arg5[%c64, %c0_24], %25 {strides = array<i32>} : memref<144x384xbf16, #tpu.memory_space<vmem>>, vector<16x384xbf16>,
    %c0_25 = arith.constant 0 : index
    %c0_26 = arith.constant 0 : index
    %c0_27 = arith.constant 0 : index
    %c0_28 = arith.constant 0 : index
    %27 = vector.load %arg1[%c0_25, %c0_26, %c0_27, %c0_28] : memref<1x1x16x384xbf16, #tpu.memory_space<vmem>>, vector<1x1x16x384xbf16>
    %28 = vector.shape_cast %27 : vector<1x1x16x384xbf16> to vector<16x384xbf16>
    %29 = arith.extf %28 : vector<16x384xbf16> to vector<16x384xf32>
    %c364_i32 = arith.constant 364 : i32
    %30 = tpu.dynamic_rotate %29 by %c364_i32 dim 1 : vector<16x384xf32>, i32 -> vector<16x384xf32>
    %31 = arith.truncf %30 : vector<16x384xf32> to vector<16x384xbf16>
    %c80 = arith.constant 80 : index
    %c0_29 = arith.constant 0 : index
    %32 = vector.load %arg5[%c80, %c0_29] : memref<144x384xbf16, #tpu.memory_space<vmem>>, vector<16x384xbf16>
    tpu.vector_store %arg5[%c80, %c0_29], %31 {strides = array<i32>} : memref<144x384xbf16, #tpu.memory_space<vmem>>, vector<16x384xbf16>,
    %c0_30 = arith.constant 0 : index
    %c0_31 = arith.constant 0 : index
    %c0_32 = arith.constant 0 : index
    %c0_33 = arith.constant 0 : index
    %33 = vector.load %arg1[%c0_30, %c0_31, %c0_32, %c0_33] : memref<1x1x16x384xbf16, #tpu.memory_space<vmem>>, vector<1x1x16x384xbf16>
    %34 = vector.shape_cast %33 : vector<1x1x16x384xbf16> to vector<16x384xbf16>
    %35 = arith.extf %34 : vector<16x384xbf16> to vector<16x384xf32>
    %c348_i32 = arith.constant 348 : i32
    %36 = tpu.dynamic_rotate %35 by %c348_i32 dim 1 : vector<16x384xf32>, i32 -> vector<16x384xf32>
    %37 = arith.truncf %36 : vector<16x384xf32> to vector<16x384xbf16>
    %c96 = arith.constant 96 : index
    %c0_34 = arith.constant 0 : index
    %38 = vector.load %arg5[%c96, %c0_34] : memref<144x384xbf16, #tpu.memory_space<vmem>>, vector<16x384xbf16>
    tpu.vector_store %arg5[%c96, %c0_34], %37 {strides = array<i32>} : memref<144x384xbf16, #tpu.memory_space<vmem>>, vector<16x384xbf16>,
    %c0_35 = arith.constant 0 : index
    %c0_36 = arith.constant 0 : index
    %c0_37 = arith.constant 0 : index
    %c0_38 = arith.constant 0 : index
    %39 = vector.load %arg1[%c0_35, %c0_36, %c0_37, %c0_38] : memref<1x1x16x384xbf16, #tpu.memory_space<vmem>>, vector<1x1x16x384xbf16>
    %40 = vector.shape_cast %39 : vector<1x1x16x384xbf16> to vector<16x384xbf16>
    %41 = arith.extf %40 : vector<16x384xbf16> to vector<16x384xf32>
    %c347_i32 = arith.constant 347 : i32
    %42 = tpu.dynamic_rotate %41 by %c347_i32 dim 1 : vector<16x384xf32>, i32 -> vector<16x384xf32>
    %43 = arith.truncf %42 : vector<16x384xf32> to vector<16x384xbf16>
    %c112 = arith.constant 112 : index
    %c0_39 = arith.constant 0 : index
    %44 = vector.load %arg5[%c112, %c0_39] : memref<144x384xbf16, #tpu.memory_space<vmem>>, vector<16x384xbf16>
    tpu.vector_store %arg5[%c112, %c0_39], %43 {strides = array<i32>} : memref<144x384xbf16, #tpu.memory_space<vmem>>, vector<16x384xbf16>,
    %c0_40 = arith.constant 0 : index
    %c0_41 = arith.constant 0 : index
    %c0_42 = arith.constant 0 : index
    %c0_43 = arith.constant 0 : index
    %45 = vector.load %arg1[%c0_40, %c0_41, %c0_42, %c0_43] : memref<1x1x16x384xbf16, #tpu.memory_space<vmem>>, vector<1x1x16x384xbf16>
    %46 = vector.shape_cast %45 : vector<1x1x16x384xbf16> to vector<16x384xbf16>
    %47 = arith.extf %46 : vector<16x384xbf16> to vector<16x384xf32>
    %c346_i32 = arith.constant 346 : i32
    %48 = tpu.dynamic_rotate %47 by %c346_i32 dim 1 : vector<16x384xf32>, i32 -> vector<16x384xf32>
    %49 = arith.truncf %48 : vector<16x384xf32> to vector<16x384xbf16>
    %c128 = arith.constant 128 : index
    %c0_44 = arith.constant 0 : index
    %50 = vector.load %arg5[%c128, %c0_44] : memref<144x384xbf16, #tpu.memory_space<vmem>>, vector<16x384xbf16>
    tpu.vector_store %arg5[%c128, %c0_44], %49 {strides = array<i32>} : memref<144x384xbf16, #tpu.memory_space<vmem>>, vector<16x384xbf16>,
    %c0_45 = arith.constant 0 : index
    %c0_46 = arith.constant 0 : index
    %51 = vector.load %arg2[%c0_45, %c0_46] : memref<16x144xbf16, #tpu.memory_space<vmem>>, vector<16x144xbf16>
    %c0_47 = arith.constant 0 : index
    %c0_48 = arith.constant 0 : index
    %52 = vector.load %arg5[%c0_47, %c0_48] : memref<144x384xbf16, #tpu.memory_space<vmem>>, vector<144x384xbf16>
    %cst = arith.constant dense<0.000000e+00> : vector<16x384xf32>
    %53 = tpu.matmul %51, %52, %cst {dimension_numbers = #tpu.dot_dimension_numbers<[1], [0], [0], [1], [0, 0, 1, 1], [], []>} : vector<16x144xbf16>, vector<144x384xbf16>, vector<16x384xf32> -> vector<16x384xf32>
    %c0_49 = arith.constant 0 : index
    %c0_50 = arith.constant 0 : index
    %54 = vector.load %arg3[%c0_49, %c0_50] : memref<16x1xf32, #tpu.memory_space<vmem>>, vector<16x1xf32>
    %55 = vector.broadcast %54 : vector<16x1xf32> to vector<16x384xf32>
    %56 = arith.addf %53, %55 : vector<16x384xf32>
    %57 = arith.truncf %56 : vector<16x384xf32> to vector<16x384xbf16>
    %c0_51 = arith.constant 0 : index
    %c0_52 = arith.constant 0 : index
    %c0_53 = arith.constant 0 : index
    %58 = vector.load %arg4[%c0_51, %c0_52, %c0_53] : memref<1x16x384xbf16, #tpu.memory_space<vmem>>, vector<1x16x384xbf16>
    %59 = vector.shape_cast %58 : vector<1x16x384xbf16> to vector<16x384xbf16>
    %60 = vector.shape_cast %57 : vector<16x384xbf16> to vector<1x16x384xbf16>
    tpu.vector_store %arg4[%c0_51, %c0_52, %c0_53], %60 {strides = array<i32>} : memref<1x16x384xbf16, #tpu.memory_space<vmem>>, vector<1x16x384xbf16>,
    return
  }
  func.func @transform_0(%arg0: i32) -> (i32, i32, i32, i32) {
    %c0_i32 = arith.constant 0 : i32
    %c0_i32_0 = arith.constant 0 : i32
    %c0_i32_1 = arith.constant 0 : i32
    %c0_i32_2 = arith.constant 0 : i32
    return %arg0, %c0_i32, %c0_i32_0, %c0_i32_1 : i32, i32, i32, i32
  }
  func.func @transform_1(%arg0: i32) -> (i32, i32) {
    %c0_i32 = arith.constant 0 : i32
    %c0_i32_0 = arith.constant 0 : i32
    %c0_i32_1 = arith.constant 0 : i32
    return %c0_i32, %c0_i32_0 : i32, i32
  }
  func.func @transform_2(%arg0: i32) -> (i32, i32) {
    %c0_i32 = arith.constant 0 : i32
    %c0_i32_0 = arith.constant 0 : i32
    %c0_i32_1 = arith.constant 0 : i32
    return %c0_i32, %c0_i32_0 : i32, i32
  }
  func.func @transform_3(%arg0: i32) -> (i32, i32, i32) {
    %c0_i32 = arith.constant 0 : i32
    %c0_i32_0 = arith.constant 0 : i32
    %c0_i32_1 = arith.constant 0 : i32
    return %arg0, %c0_i32, %c0_i32_0 : i32, i32, i32
  }
}

module attributes {stable_mosaic.version = 11 : i64} {
  func.func @_conv3x3_bn_kernel(%arg0: i32, %arg1: memref<1x1x16x1280xbf16, #tpu.memory_space<vmem>>, %arg2: memref<16x144xbf16, #tpu.memory_space<vmem>>, %arg3: memref<16x1xf32, #tpu.memory_space<vmem>>, %arg4: memref<1x16x1280xbf16, #tpu.memory_space<vmem>>, %arg5: memref<144x1280xbf16, #tpu.memory_space<vmem>>) attributes {dimension_semantics = [#tpu.dimension_semantics<parallel>], iteration_bounds = array<i64: 2>, scalar_prefetch = 0 : i64, scratch_operands = 1 : i64, tpu.core_type = #tpu.core_type<tc>, window_params = [{transform_indices = @transform_0, window_bounds = array<i64: 1, 1, 16, 1280>}, {pipeline_mode = #tpu.pipeline_mode<synchronous>, transform_indices = @transform_1, window_bounds = array<i64: 16, 144>}, {pipeline_mode = #tpu.pipeline_mode<synchronous>, transform_indices = @transform_2, window_bounds = array<i64: 16, 1>}, {transform_indices = @transform_3, window_bounds = array<i64: 1, 16, 1280>}]} {
    %c0 = arith.constant 0 : index
    %c0_0 = arith.constant 0 : index
    %c0_1 = arith.constant 0 : index
    %c0_2 = arith.constant 0 : index
    %0 = vector.load %arg1[%c0, %c0_0, %c0_1, %c0_2] : memref<1x1x16x1280xbf16, #tpu.memory_space<vmem>>, vector<1x1x16x1280xbf16>
    %1 = vector.shape_cast %0 : vector<1x1x16x1280xbf16> to vector<16x1280xbf16>
    %c0_3 = arith.constant 0 : index
    %c0_4 = arith.constant 0 : index
    %2 = vector.load %arg5[%c0_3, %c0_4] : memref<144x1280xbf16, #tpu.memory_space<vmem>>, vector<16x1280xbf16>
    tpu.vector_store %arg5[%c0_3, %c0_4], %1 {strides = array<i32>} : memref<144x1280xbf16, #tpu.memory_space<vmem>>, vector<16x1280xbf16>,
    %c0_5 = arith.constant 0 : index
    %c0_6 = arith.constant 0 : index
    %c0_7 = arith.constant 0 : index
    %c0_8 = arith.constant 0 : index
    %3 = vector.load %arg1[%c0_5, %c0_6, %c0_7, %c0_8] : memref<1x1x16x1280xbf16, #tpu.memory_space<vmem>>, vector<1x1x16x1280xbf16>
    %4 = vector.shape_cast %3 : vector<1x1x16x1280xbf16> to vector<16x1280xbf16>
    %5 = arith.extf %4 : vector<16x1280xbf16> to vector<16x1280xf32>
    %c1279_i32 = arith.constant 1279 : i32
    %6 = tpu.dynamic_rotate %5 by %c1279_i32 dim 1 : vector<16x1280xf32>, i32 -> vector<16x1280xf32>
    %7 = arith.truncf %6 : vector<16x1280xf32> to vector<16x1280xbf16>
    %c16 = arith.constant 16 : index
    %c0_9 = arith.constant 0 : index
    %8 = vector.load %arg5[%c16, %c0_9] : memref<144x1280xbf16, #tpu.memory_space<vmem>>, vector<16x1280xbf16>
    tpu.vector_store %arg5[%c16, %c0_9], %7 {strides = array<i32>} : memref<144x1280xbf16, #tpu.memory_space<vmem>>, vector<16x1280xbf16>,
    %c0_10 = arith.constant 0 : index
    %c0_11 = arith.constant 0 : index
    %c0_12 = arith.constant 0 : index
    %c0_13 = arith.constant 0 : index
    %9 = vector.load %arg1[%c0_10, %c0_11, %c0_12, %c0_13] : memref<1x1x16x1280xbf16, #tpu.memory_space<vmem>>, vector<1x1x16x1280xbf16>
    %10 = vector.shape_cast %9 : vector<1x1x16x1280xbf16> to vector<16x1280xbf16>
    %11 = arith.extf %10 : vector<16x1280xbf16> to vector<16x1280xf32>
    %c1278_i32 = arith.constant 1278 : i32
    %12 = tpu.dynamic_rotate %11 by %c1278_i32 dim 1 : vector<16x1280xf32>, i32 -> vector<16x1280xf32>
    %13 = arith.truncf %12 : vector<16x1280xf32> to vector<16x1280xbf16>
    %c32 = arith.constant 32 : index
    %c0_14 = arith.constant 0 : index
    %14 = vector.load %arg5[%c32, %c0_14] : memref<144x1280xbf16, #tpu.memory_space<vmem>>, vector<16x1280xbf16>
    tpu.vector_store %arg5[%c32, %c0_14], %13 {strides = array<i32>} : memref<144x1280xbf16, #tpu.memory_space<vmem>>, vector<16x1280xbf16>,
    %c0_15 = arith.constant 0 : index
    %c0_16 = arith.constant 0 : index
    %c0_17 = arith.constant 0 : index
    %c0_18 = arith.constant 0 : index
    %15 = vector.load %arg1[%c0_15, %c0_16, %c0_17, %c0_18] : memref<1x1x16x1280xbf16, #tpu.memory_space<vmem>>, vector<1x1x16x1280xbf16>
    %16 = vector.shape_cast %15 : vector<1x1x16x1280xbf16> to vector<16x1280xbf16>
    %17 = arith.extf %16 : vector<16x1280xbf16> to vector<16x1280xf32>
    %c1246_i32 = arith.constant 1246 : i32
    %18 = tpu.dynamic_rotate %17 by %c1246_i32 dim 1 : vector<16x1280xf32>, i32 -> vector<16x1280xf32>
    %19 = arith.truncf %18 : vector<16x1280xf32> to vector<16x1280xbf16>
    %c48 = arith.constant 48 : index
    %c0_19 = arith.constant 0 : index
    %20 = vector.load %arg5[%c48, %c0_19] : memref<144x1280xbf16, #tpu.memory_space<vmem>>, vector<16x1280xbf16>
    tpu.vector_store %arg5[%c48, %c0_19], %19 {strides = array<i32>} : memref<144x1280xbf16, #tpu.memory_space<vmem>>, vector<16x1280xbf16>,
    %c0_20 = arith.constant 0 : index
    %c0_21 = arith.constant 0 : index
    %c0_22 = arith.constant 0 : index
    %c0_23 = arith.constant 0 : index
    %21 = vector.load %arg1[%c0_20, %c0_21, %c0_22, %c0_23] : memref<1x1x16x1280xbf16, #tpu.memory_space<vmem>>, vector<1x1x16x1280xbf16>
    %22 = vector.shape_cast %21 : vector<1x1x16x1280xbf16> to vector<16x1280xbf16>
    %23 = arith.extf %22 : vector<16x1280xbf16> to vector<16x1280xf32>
    %c1245_i32 = arith.constant 1245 : i32
    %24 = tpu.dynamic_rotate %23 by %c1245_i32 dim 1 : vector<16x1280xf32>, i32 -> vector<16x1280xf32>
    %25 = arith.truncf %24 : vector<16x1280xf32> to vector<16x1280xbf16>
    %c64 = arith.constant 64 : index
    %c0_24 = arith.constant 0 : index
    %26 = vector.load %arg5[%c64, %c0_24] : memref<144x1280xbf16, #tpu.memory_space<vmem>>, vector<16x1280xbf16>
    tpu.vector_store %arg5[%c64, %c0_24], %25 {strides = array<i32>} : memref<144x1280xbf16, #tpu.memory_space<vmem>>, vector<16x1280xbf16>,
    %c0_25 = arith.constant 0 : index
    %c0_26 = arith.constant 0 : index
    %c0_27 = arith.constant 0 : index
    %c0_28 = arith.constant 0 : index
    %27 = vector.load %arg1[%c0_25, %c0_26, %c0_27, %c0_28] : memref<1x1x16x1280xbf16, #tpu.memory_space<vmem>>, vector<1x1x16x1280xbf16>
    %28 = vector.shape_cast %27 : vector<1x1x16x1280xbf16> to vector<16x1280xbf16>
    %29 = arith.extf %28 : vector<16x1280xbf16> to vector<16x1280xf32>
    %c1244_i32 = arith.constant 1244 : i32
    %30 = tpu.dynamic_rotate %29 by %c1244_i32 dim 1 : vector<16x1280xf32>, i32 -> vector<16x1280xf32>
    %31 = arith.truncf %30 : vector<16x1280xf32> to vector<16x1280xbf16>
    %c80 = arith.constant 80 : index
    %c0_29 = arith.constant 0 : index
    %32 = vector.load %arg5[%c80, %c0_29] : memref<144x1280xbf16, #tpu.memory_space<vmem>>, vector<16x1280xbf16>
    tpu.vector_store %arg5[%c80, %c0_29], %31 {strides = array<i32>} : memref<144x1280xbf16, #tpu.memory_space<vmem>>, vector<16x1280xbf16>,
    %c0_30 = arith.constant 0 : index
    %c0_31 = arith.constant 0 : index
    %c0_32 = arith.constant 0 : index
    %c0_33 = arith.constant 0 : index
    %33 = vector.load %arg1[%c0_30, %c0_31, %c0_32, %c0_33] : memref<1x1x16x1280xbf16, #tpu.memory_space<vmem>>, vector<1x1x16x1280xbf16>
    %34 = vector.shape_cast %33 : vector<1x1x16x1280xbf16> to vector<16x1280xbf16>
    %35 = arith.extf %34 : vector<16x1280xbf16> to vector<16x1280xf32>
    %c1212_i32 = arith.constant 1212 : i32
    %36 = tpu.dynamic_rotate %35 by %c1212_i32 dim 1 : vector<16x1280xf32>, i32 -> vector<16x1280xf32>
    %37 = arith.truncf %36 : vector<16x1280xf32> to vector<16x1280xbf16>
    %c96 = arith.constant 96 : index
    %c0_34 = arith.constant 0 : index
    %38 = vector.load %arg5[%c96, %c0_34] : memref<144x1280xbf16, #tpu.memory_space<vmem>>, vector<16x1280xbf16>
    tpu.vector_store %arg5[%c96, %c0_34], %37 {strides = array<i32>} : memref<144x1280xbf16, #tpu.memory_space<vmem>>, vector<16x1280xbf16>,
    %c0_35 = arith.constant 0 : index
    %c0_36 = arith.constant 0 : index
    %c0_37 = arith.constant 0 : index
    %c0_38 = arith.constant 0 : index
    %39 = vector.load %arg1[%c0_35, %c0_36, %c0_37, %c0_38] : memref<1x1x16x1280xbf16, #tpu.memory_space<vmem>>, vector<1x1x16x1280xbf16>
    %40 = vector.shape_cast %39 : vector<1x1x16x1280xbf16> to vector<16x1280xbf16>
    %41 = arith.extf %40 : vector<16x1280xbf16> to vector<16x1280xf32>
    %c1211_i32 = arith.constant 1211 : i32
    %42 = tpu.dynamic_rotate %41 by %c1211_i32 dim 1 : vector<16x1280xf32>, i32 -> vector<16x1280xf32>
    %43 = arith.truncf %42 : vector<16x1280xf32> to vector<16x1280xbf16>
    %c112 = arith.constant 112 : index
    %c0_39 = arith.constant 0 : index
    %44 = vector.load %arg5[%c112, %c0_39] : memref<144x1280xbf16, #tpu.memory_space<vmem>>, vector<16x1280xbf16>
    tpu.vector_store %arg5[%c112, %c0_39], %43 {strides = array<i32>} : memref<144x1280xbf16, #tpu.memory_space<vmem>>, vector<16x1280xbf16>,
    %c0_40 = arith.constant 0 : index
    %c0_41 = arith.constant 0 : index
    %c0_42 = arith.constant 0 : index
    %c0_43 = arith.constant 0 : index
    %45 = vector.load %arg1[%c0_40, %c0_41, %c0_42, %c0_43] : memref<1x1x16x1280xbf16, #tpu.memory_space<vmem>>, vector<1x1x16x1280xbf16>
    %46 = vector.shape_cast %45 : vector<1x1x16x1280xbf16> to vector<16x1280xbf16>
    %47 = arith.extf %46 : vector<16x1280xbf16> to vector<16x1280xf32>
    %c1210_i32 = arith.constant 1210 : i32
    %48 = tpu.dynamic_rotate %47 by %c1210_i32 dim 1 : vector<16x1280xf32>, i32 -> vector<16x1280xf32>
    %49 = arith.truncf %48 : vector<16x1280xf32> to vector<16x1280xbf16>
    %c128 = arith.constant 128 : index
    %c0_44 = arith.constant 0 : index
    %50 = vector.load %arg5[%c128, %c0_44] : memref<144x1280xbf16, #tpu.memory_space<vmem>>, vector<16x1280xbf16>
    tpu.vector_store %arg5[%c128, %c0_44], %49 {strides = array<i32>} : memref<144x1280xbf16, #tpu.memory_space<vmem>>, vector<16x1280xbf16>,
    %c0_45 = arith.constant 0 : index
    %c0_46 = arith.constant 0 : index
    %51 = vector.load %arg2[%c0_45, %c0_46] : memref<16x144xbf16, #tpu.memory_space<vmem>>, vector<16x144xbf16>
    %c0_47 = arith.constant 0 : index
    %c0_48 = arith.constant 0 : index
    %52 = vector.load %arg5[%c0_47, %c0_48] : memref<144x1280xbf16, #tpu.memory_space<vmem>>, vector<144x1280xbf16>
    %cst = arith.constant dense<0.000000e+00> : vector<16x1280xf32>
    %53 = tpu.matmul %51, %52, %cst {dimension_numbers = #tpu.dot_dimension_numbers<[1], [0], [0], [1], [0, 0, 1, 1], [], []>} : vector<16x144xbf16>, vector<144x1280xbf16>, vector<16x1280xf32> -> vector<16x1280xf32>
    %c0_49 = arith.constant 0 : index
    %c0_50 = arith.constant 0 : index
    %54 = vector.load %arg3[%c0_49, %c0_50] : memref<16x1xf32, #tpu.memory_space<vmem>>, vector<16x1xf32>
    %55 = vector.broadcast %54 : vector<16x1xf32> to vector<16x1280xf32>
    %56 = arith.addf %53, %55 : vector<16x1280xf32>
    %57 = arith.truncf %56 : vector<16x1280xf32> to vector<16x1280xbf16>
    %c0_51 = arith.constant 0 : index
    %c0_52 = arith.constant 0 : index
    %c0_53 = arith.constant 0 : index
    %58 = vector.load %arg4[%c0_51, %c0_52, %c0_53] : memref<1x16x1280xbf16, #tpu.memory_space<vmem>>, vector<1x16x1280xbf16>
    %59 = vector.shape_cast %58 : vector<1x16x1280xbf16> to vector<16x1280xbf16>
    %60 = vector.shape_cast %57 : vector<16x1280xbf16> to vector<1x16x1280xbf16>
    tpu.vector_store %arg4[%c0_51, %c0_52, %c0_53], %60 {strides = array<i32>} : memref<1x16x1280xbf16, #tpu.memory_space<vmem>>, vector<1x16x1280xbf16>,
    return
  }
  func.func @transform_0(%arg0: i32) -> (i32, i32, i32, i32) {
    %c0_i32 = arith.constant 0 : i32
    %c0_i32_0 = arith.constant 0 : i32
    %c0_i32_1 = arith.constant 0 : i32
    %c0_i32_2 = arith.constant 0 : i32
    return %arg0, %c0_i32, %c0_i32_0, %c0_i32_1 : i32, i32, i32, i32
  }
  func.func @transform_1(%arg0: i32) -> (i32, i32) {
    %c0_i32 = arith.constant 0 : i32
    %c0_i32_0 = arith.constant 0 : i32
    %c0_i32_1 = arith.constant 0 : i32
    return %c0_i32, %c0_i32_0 : i32, i32
  }
  func.func @transform_2(%arg0: i32) -> (i32, i32) {
    %c0_i32 = arith.constant 0 : i32
    %c0_i32_0 = arith.constant 0 : i32
    %c0_i32_1 = arith.constant 0 : i32
    return %c0_i32, %c0_i32_0 : i32, i32
  }
  func.func @transform_3(%arg0: i32) -> (i32, i32, i32) {
    %c0_i32 = arith.constant 0 : i32
    %c0_i32_0 = arith.constant 0 : i32
    %c0_i32_1 = arith.constant 0 : i32
    return %arg0, %c0_i32, %c0_i32_0 : i32, i32, i32
  }
}

</mosaic_0001>

<bundles_post_ra>
// kernel: _lambda_.8
= control target key start
LH: loop header
LB: loop body
LE: loop exit
PB: predicated region body
PF: predicated region fallthrough
CT: control target
= control target key end

     0   :  { %s825_s12 = smov 0   ;;  %s987_s0 = inlined_call_operand.vmem [shape: bf16[2,4,16,384], index: 0, kind: input, shape index: {}]   ;;  %s988_s1 = inlined_call_operand.vmem [shape: bf16[16,144], index: 1, kind: input, shape index: {}]   ;;  %s989_s2 = inlined_call_operand.vmem [shape: f32[16,1], index: 2, kind: input, shape index: {}]   ;;  %s990_s3 = inlined_call_operand.vmem [shape: bf16[2,16,384], index: 3, kind: output, shape index: {}]  }
   0x1 LB: > { %s641_s13 = sadd.s32 4294967295, %s799_s12   ;;  %p645_p0 = scmp.ge.s32.totalorder %s799_s12, 1  ;;  %s799_s12 = sphi %s825_s12, %s13_s12  }
   0x2   : > { %p137_p1 = scmp.lt.s32.totalorder %s799_s12, 3 }
   0x4   : > { %p138_p2 = pnand %p645_p0, %p137_p1 }
   0x5   : > { %p161_p3 = scmp.lt.s32.totalorder (!%p138_p2), %s641_s13, 1  ;;  %v801_v0 = vmov (!%p138_p2), 0   ;;  %s802_s18 = smov (!%p138_p2), 127   ;;  %v792_v53 = vld [vmem:[%s988_s1 + $0x4] ss:$8 sps:$4 sm:$0xff] (!%p138_p2)   ;;  %vm492_vm0 = vcmask (!%p138_p2), 130048   ;;  %v241_v56 = vlaneseq (!%p138_p2) }
   0x6   : > { %141 = sbr.rel (%p138_p2) target bundleno = 394 (0x18a), region = 32  ;;  %539 = vmatprep.subr.bf16.mxu1 (!%p138_p2), %v801_v0  ;;  %775 = vset.pattern.permute.xlu1 (!%p138_p2), %v801_v0  ;;  %s803_s19 = smov (!%p138_p2), 111   ;;  %v471_v54 = vld [vmem:[%s989_s2] sm:$0xff] (!%p138_p2)  ;;  %v472_v55 = vld [vmem:[%s989_s2 + $0x8] sm:$0xff] (!%p138_p2) }
   0x7   : > { %776 = vset.pattern.permute.xlu0 (!%p138_p2), %v801_v0  ;;  %683 = vmatprep.mubr.msk.bf16.mxu1 (!%p138_p2), %vm492_vm0, %v792_v53  ;;  %s804_s22 = smov (!%p138_p2), 110   ;;  %v896_v57 = vand.u32 (!%p138_p2), 127, %v241_v56 }
   0x8   : > { %682 = vmatprep.mubr.msk.bf16.mxu0 (!%p138_p2), %vm492_vm0, %v792_v53 }
   0x9   : > { %vm243_vm1 = vcmp.lt.s32.totalorder (!%p138_p2), %v896_v57, 127  ;;  %vm360_vm2 = vcmp.lt.s32.totalorder (!%p138_p2), %v896_v57, 111  ;;  %vm429_vm3 = vcmp.lt.s32.totalorder (!%p138_p2), %v896_v57, 110 }
   0xd   : > { %s992_s13 = smov (!%p161_p3, %s641_s13), 1 }
   0xe   : > { %s686_s14 = smul.u32 96, %s992_s13 }
   0xf   : > { %s687_s29 = smul.u32 24, %s992_s13 }
  0x10   : > { %s842_s17 = scalar_lea.vmem %s987_s0, %s686_s14 }
  0x11   : > { %v219_v1 = vld [vmem:[%s842_s17] sm:$0xff]  ;;  %v221_v2 = vld [vmem:[%s842_s17 + $0xc] sm:$0xff]  ;;  %v220_v3 = vld [vmem:[%s842_s17 + $0x8] ss:$12 sps:$4 sm:$0xff]   ;;  %s170_s5 = scalar_lea.vmem %s990_s3, %s687_s29 }
  0x12   : > { %v224_v4 = vunpack.c.h.bf16 %v219_v1  ;;  %v227_v5 = vunpack.c.h.bf16 %v221_v2  ;;  %v223_v6 = vunpack.c.l.bf16 %v219_v1  ;;  %v226_v7 = vunpack.c.l.bf16 %v221_v2  ;;  %v848_v8 = vld [vmem:[%s842_s17 + $0x30] sm:$0xff]  ;;  %v851_v9 = vld [vmem:[%s842_s17 + $0x3c] sm:$0xff]  ;;  %v673_v10 = vld [vmem:[%s842_s17 + $0x38] ss:$12 sps:$4 sm:$0xff]  }
  0x13   : > { %v225_v11 = vunpack.c.l.bf16 %v220_v3  ;;  %v228_v12 = vunpack.c.h.bf16 %v220_v3  ;;  %v309_v13 = vunpack.c.h.bf16 %v848_v8  ;;  %v312_v14 = vunpack.c.h.bf16 %v851_v9  ;;  %v778_v19 = vld [vmem:[%s842_s17 + $0x8] ss:$12 sps:$4 sm:$0xff]   ;;  %v781_v25 = vld [vmem:[%s842_s17 + $0x20] ss:$12 sps:$4 sm:$0xff]   ;;  %v676_v26 = vld [vmem:[%s842_s17 + $0x18] sm:$0xff] }
  0x14   : > { %v856_v15 = vpack.i.bf16 %v227_v5, %v224_v4  ;;  %v858_v16 = vpack.i.bf16 %v226_v7, %v223_v6  ;;  %v310_v17 = vunpack.c.l.bf16 %v673_v10  ;;  %v313_v18 = vunpack.c.h.bf16 %v673_v10  ;;  %v339_v24 = vld [vmem:[%s842_s17 + $0x8] ss:$12 sps:$4 sm:$0xff]   ;;  %540 = vmatpush1.bf16.msra.mxu1 %v778_v19  ;;  %v677_v41 = vld [vmem:[%s842_s17 + $0x20] ss:$12 sps:$4 sm:$0xff]  }
  0x15   : > { %v705_v20 = vpack.i.bf16 %v228_v12, %v225_v11  ;;  %v715_v21 = vpack.i.bf16 %v312_v14, %v309_v13  ;;  %v308_v22 = vunpack.c.l.bf16 %v848_v8  ;;  %v311_v23 = vunpack.c.l.bf16 %v851_v9  ;;  %541 = vmatprep.subr.bf16.mxu1 %v801_v0  ;;  %v678_v29 = vld [vmem:[%s842_s17 + $0x24] sm:$0xff] }
  0x16   : > { %701 = vrot.lane.b32.xlu0 %v856_v15, %s802_s18  ;;  %711 = vrot.lane.b32.xlu1 %v858_v16, %s802_s18  ;;  %v720_v27 = vpack.i.bf16 %v313_v18, %v310_v17  ;;  %v344_v28 = vunpack.c.l.bf16 %v339_v24  ;;  %v649_v30 = vcombine.high %v219_v1, %v221_v2  ;;  %v347_v32 = vunpack.c.h.bf16 %v339_v24  ;;  %v408_v47 = vld [vmem:[%s842_s17 + $0x8] ss:$12 sps:$4 sm:$0xff]   ;;  %v784_v24 = vld [vmem:[%s842_s17 + $0x38] ss:$12 sps:$4 sm:$0xff]  }
  0x17   : > { %v725_v31 = vpack.i.bf16 %v311_v23, %v308_v22  ;;  %v648_v33 = vcombine.low %v219_v1, %v221_v2  ;;  %v656_v34 = vcombine.high %v676_v26, %v678_v29  ;;  %v663_v35 = vcombine.high %v848_v8, %v851_v9 }
  0x18   : > { %496 = vmatprep.subr.bf16.mxu0 %v649_v30  ;;  %542 = vmatpush1.bf16.msra.mxu1 %v781_v25  ;;  %v655_v36 = vcombine.low %v676_v26, %v678_v29  ;;  %v662_v37 = vcombine.low %v848_v8, %v851_v9  ;;  %v735_v38 = vpack.i.bf16 %v347_v32, %v344_v28  ;;  %v378_v39 = vunpack.c.h.bf16 %v676_v26  ;;  %v788_v30 = vld [vmem:[%s842_s17 + $0x50] ss:$12 sps:$4 sm:$0xff]  }
  0x19   : > { %497 = vmatpush1.bf16.msra.mxu0 %v648_v33  ;;  %543 = vmatprep.subr.bf16.mxu1 %v801_v0  ;;  %v381_v40 = vunpack.c.h.bf16 %v678_v29  ;;  %v379_v42 = vunpack.c.l.bf16 %v677_v41  ;;  %v382_v44 = vunpack.c.h.bf16 %v677_v41  ;;  %v377_v45 = vunpack.c.l.bf16 %v676_v26 }
  0x1a   : > { %706 = vrot.lane.b32.xlu0 %v705_v20, %s802_s18  ;;  %716 = vrot.lane.b32.xlu1 %v715_v21, %s802_s18  ;;  %v380_v46 = vunpack.c.l.bf16 %v678_v29  ;;  %v413_v50 = vunpack.c.l.bf16 %v408_v47  ;;  %v416_v51 = vunpack.c.h.bf16 %v408_v47 }
  0x1b   : > { %498 = vmatprep.subr.bf16.mxu0 %v656_v34  ;;  %v745_v43 = vpack.i.bf16 %v381_v40, %v378_v39  ;;  %v750_v48 = vpack.i.bf16 %v382_v44, %v379_v42  ;;  %v789_v40 = vld [vmem:[%s842_s17 + $0x48] ss:$12 sps:$4 sm:$0xff]  }
  0x1c   : > { %v755_v49 = vpack.i.bf16 %v380_v46, %v377_v45  ;;  %v765_v52 = vpack.i.bf16 %v416_v51, %v413_v50 }
  0x1d   : > { %499 = vmatpush1.bf16.msra.mxu0 %v655_v36 }
  0x1e   : > { %721 = vrot.lane.b32.xlu0 %v720_v27, %s802_s18  ;;  %726 = vrot.lane.b32.xlu1 %v725_v31, %s802_s18  ;;  %v786_v27 = vld [vmem:[%s842_s17 + $0x4c] ss:$12 sps:$4 sm:$0xff]  }
  0x22   : > { %731 = vrot.lane.b32.xlu0 %v856_v15, %s803_s19  ;;  %736 = vrot.lane.b32.xlu1 %v735_v38, %s803_s19 }
  0x26   : > { %741 = vrot.lane.b32.xlu0 %v858_v16, %s803_s19  ;;  %746 = vrot.lane.b32.xlu1 %v745_v43, %s803_s19 }
  0x2a   : > { %751 = vrot.lane.b32.xlu0 %v750_v48, %s803_s19  ;;  %756 = vrot.lane.b32.xlu1 %v755_v49, %s803_s19 }
  0x2e   : > { %761 = vrot.lane.b32.xlu0 %v856_v15, %s804_s22  ;;  %766 = vrot.lane.b32.xlu1 %v765_v52, %s804_s22 }
  0x32   : > { %771 = vrot.lane.b32.xlu0 %v858_v16, %s804_s22  ;;  %475 = vperm.xlu1 %775, %v471_v54  }
  0x36   : > { %480 = vperm.xlu0 %776, %v472_v55  }
  0x88   : > { %v702_v58 = vpop.permute.xlu0 %701  ;;  %v712_v59 = vpop.permute.xlu1 %711 }
  0x89   : > { %v704_v60 = vunpack.i.h.bf16 %v702_v58  ;;  %v703_v61 = vunpack.i.l.bf16 %v702_v58  ;;  %v714_v62 = vunpack.i.h.bf16 %v712_v59  ;;  %v713_v63 = vunpack.i.l.bf16 %v712_v59 }
  0x8b   : > { %v246_v5 = vsel %vm243_vm1, %v713_v63, %v703_v61  ;;  %v247_v6 = vsel %vm243_vm1, %v714_v62, %v704_v60 }
  0x8c   : > { %v707_v1 = vpop.permute.xlu0 %706  ;;  %v717_v2 = vpop.permute.xlu1 %716  ;;  %v250_v17 = vpack.c.bf16 %v247_v6, %v246_v5 }
  0x8d   : > { %v709_v3 = vunpack.i.h.bf16 %v707_v1  ;;  %v708_v4 = vunpack.i.l.bf16 %v707_v1  ;;  %v719_v18 = vunpack.i.h.bf16 %v717_v2  ;;  %v718_v19 = vunpack.i.l.bf16 %v717_v2 }
  0x8f   : > { %v244_v7 = vsel %vm243_vm1, %v703_v61, %v708_v4  ;;  %v245_v10 = vsel %vm243_vm1, %v704_v60, %v709_v3  ;;  %v248_v11 = vsel %vm243_vm1, %v708_v4, %v713_v63  ;;  %v249_v12 = vsel %vm243_vm1, %v709_v3, %v714_v62 }
  0x90   : > { %v722_v13 = vpop.permute.xlu0 %721  ;;  %v727_v14 = vpop.permute.xlu1 %726  ;;  %v251_v15 = vpack.c.bf16 %v245_v10, %v244_v7  ;;  %v252_v16 = vpack.c.bf16 %v249_v12, %v248_v11 }
  0x91   : > { %v724_v20 = vunpack.i.h.bf16 %v722_v13  ;;  %v723_v21 = vunpack.i.l.bf16 %v722_v13  ;;  %v729_v22 = vunpack.i.h.bf16 %v727_v14  ;;  %v728_v23 = vunpack.i.l.bf16 %v727_v14 }
  0x92   : > { %500 = vmatprep.subr.bf16.mxu0 %v251_v15  ;;  %544 = vmatpush1.bf16.msra.mxu1 %v252_v16 }
  0x93   : > { %501 = vmatpush1.bf16.msra.mxu0 %v250_v17  ;;  %545 = vmatprep.subr.bf16.mxu1 %v801_v0  ;;  %v326_v28 = vsel %vm243_vm1, %v718_v19, %v723_v21  ;;  %v327_v29 = vsel %vm243_vm1, %v719_v18, %v724_v20  ;;  %v330_v31 = vsel %vm243_vm1, %v723_v21, %v728_v23 }
  0x94   : > { %v732_v25 = vpop.permute.xlu0 %731  ;;  %v737_v26 = vpop.permute.xlu1 %736  ;;  %502 = vmatprep.subr.bf16.mxu0 %v663_v35  ;;  %v331_v32 = vsel %vm243_vm1, %v724_v20, %v729_v22  ;;  %v328_v33 = vsel %vm243_vm1, %v728_v23, %v718_v19  ;;  %v329_v34 = vsel %vm243_vm1, %v729_v22, %v719_v18  ;;  %v333_v45 = vpack.c.bf16 %v327_v29, %v326_v28 }
  0x95   : > { %v734_v35 = vunpack.i.h.bf16 %v732_v25  ;;  %v733_v36 = vunpack.i.l.bf16 %v732_v25  ;;  %v739_v38 = vunpack.i.h.bf16 %v737_v26  ;;  %v738_v39 = vunpack.i.l.bf16 %v737_v26 }
  0x96   : > { %546 = vmatpush1.bf16.msra.mxu1 %v784_v24  ;;  %v334_v46 = vpack.c.bf16 %v331_v32, %v330_v31  ;;  %v332_v47 = vpack.c.bf16 %v329_v34, %v328_v33 }
  0x97   : > { %503 = vmatpush1.bf16.msra.mxu0 %v662_v37  ;;  %547 = vmatprep.subr.bf16.mxu1 %v801_v0  ;;  %v361_v8 = vsel %vm360_vm2, %v733_v36, %v738_v39  ;;  %v362_v9 = vsel %vm360_vm2, %v734_v35, %v739_v38 }
  0x98   : > { %v742_v41 = vpop.permute.xlu0 %741  ;;  %v747_v42 = vpop.permute.xlu1 %746  ;;  %504 = vmatprep.subr.bf16.mxu0 %v786_v27  ;;  %v368_v60 = vpack.c.bf16 %v362_v9, %v361_v8 }
  0x99   : > { %v744_v43 = vunpack.i.h.bf16 %v742_v41  ;;  %v743_v44 = vunpack.i.l.bf16 %v742_v41  ;;  %v749_v48 = vunpack.i.h.bf16 %v747_v42  ;;  %v748_v49 = vunpack.i.l.bf16 %v747_v42 }
  0x9a   : > { %548 = vmatpush1.bf16.msra.mxu1 %v788_v30 }
  0x9b   : > { %505 = vmatpush1.bf16.msra.mxu0 %v789_v40  ;;  %549 = vmatprep.subr.bf16.mxu1 %v801_v0  ;;  %v365_v51 = vsel %vm360_vm2, %v738_v39, %v743_v44  ;;  %v366_v52 = vsel %vm360_vm2, %v739_v38, %v744_v43  ;;  %v363_v53 = vsel %vm360_vm2, %v743_v44, %v733_v36 }
  0x9c   : > { %v752_v37 = vpop.permute.xlu0 %751  ;;  %v757_v50 = vpop.permute.xlu1 %756  ;;  %506 = vmatprep.subr.bf16.mxu0 %v333_v45  ;;  %v364_v54 = vsel %vm360_vm2, %v744_v43, %v734_v35  ;;  %v369_v2 = vpack.c.bf16 %v366_v52, %v365_v51 }
  0x9d   : > { %v754_v55 = vunpack.i.h.bf16 %v752_v37  ;;  %v753_v56 = vunpack.i.l.bf16 %v752_v37  ;;  %v759_v58 = vunpack.i.h.bf16 %v757_v50  ;;  %v758_v59 = vunpack.i.l.bf16 %v757_v50 }
  0x9e   : > { %550 = vmatpush1.bf16.msra.mxu1 %v334_v46  ;;  %v367_v3 = vpack.c.bf16 %v364_v54, %v363_v53 }
  0x9f   : > { %507 = vmatpush1.bf16.msra.mxu0 %v332_v47  ;;  %551 = vmatprep.subr.bf16.mxu1 %v801_v0  ;;  %v395_v61 = vsel %vm360_vm2, %v748_v49, %v753_v56  ;;  %v396_v62 = vsel %vm360_vm2, %v749_v48, %v754_v55  ;;  %v399_v4 = vsel %vm360_vm2, %v753_v56, %v758_v59 }
  0xa0   : > { %v762_v63 = vpop.permute.xlu0 %761  ;;  %508 = vmatprep.subr.bf16.mxu0 %v368_v60  ;;  %v767_v1 = vpop.permute.xlu1 %766  ;;  %v400_v5 = vsel %vm360_vm2, %v754_v55, %v759_v58  ;;  %v402_v12 = vpack.c.bf16 %v396_v62, %v395_v61  ;;  %v397_v13 = vsel %vm360_vm2, %v758_v59, %v748_v49  ;;  %v398_v14 = vsel %vm360_vm2, %v759_v58, %v749_v48 }
  0xa1   : > { %v764_v6 = vunpack.i.h.bf16 %v762_v63  ;;  %v763_v7 = vunpack.i.l.bf16 %v762_v63  ;;  %v769_v10 = vunpack.i.h.bf16 %v767_v1  ;;  %v768_v11 = vunpack.i.l.bf16 %v767_v1 }
  0xa2   : > { %552 = vmatpush1.bf16.msra.mxu1 %v369_v2  ;;  %v403_v18 = vpack.c.bf16 %v400_v5, %v399_v4  ;;  %v401_v22 = vpack.c.bf16 %v398_v14, %v397_v13 }
  0xa3   : > { %509 = vmatpush1.bf16.msra.mxu0 %v367_v3  ;;  %553 = vmatprep.subr.bf16.mxu1 %v801_v0  ;;  %v430_v15 = vsel %vm429_vm3, %v763_v7, %v768_v11  ;;  %v431_v16 = vsel %vm429_vm3, %v764_v6, %v769_v10 }
  0xa4   : > { %v772_v17 = vpop.permute.xlu0 %771  ;;  %510 = vmatprep.subr.bf16.mxu0 %v402_v12  ;;  %v437_v19 = vpack.c.bf16 %v431_v16, %v430_v15 }
  0xa5   : > { %v774_v20 = vunpack.i.h.bf16 %v772_v17  ;;  %v773_v21 = vunpack.i.l.bf16 %v772_v17 }
  0xa6   : > { %554 = vmatpush1.bf16.msra.mxu1 %v403_v18 }
  0xa7   : > { %511 = vmatpush1.bf16.msra.mxu0 %v401_v22  ;;  %555 = vmatprep.subr.bf16.mxu1 %v801_v0  ;;  %v434_v23 = vsel %vm429_vm3, %v768_v11, %v773_v21  ;;  %v435_v24 = vsel %vm429_vm3, %v769_v10, %v774_v20  ;;  %v432_v25 = vsel %vm429_vm3, %v773_v21, %v763_v7  ;;  %v790_v0 = vld [vmem:[%s988_s1] ss:$8 sps:$4 sm:$0xff]  }
  0xa8   : > { %512 = vmatprep.subr.bf16.mxu0 %v437_v19  ;;  %v438_v26 = vpack.c.bf16 %v435_v24, %v434_v23  ;;  %v433_v27 = vsel %vm429_vm3, %v774_v20, %v764_v6 }
  0xa9   : > { %v436_v28 = vpack.c.bf16 %v433_v27, %v432_v25 }
  0xaa   : > { %556 = vmatpush1.bf16.msra.mxu1 %v438_v26 }
  0xab   : > { %513 = vmatpush1.bf16.msra.mxu0 %v436_v28 }
  0xad   : > { %572 = vmatmul.mubr.bf16.vlgmr.msra.gmra.mrb[0].mxu1 %v790_v0 }
  0xae   : > { %529 = vmatmul.mubr.bf16.vlgmr.msra.gmra.mrb[0].mxu0 %v790_v0 }
  0xb1   : > { %v476_v29 = vpop.permute.xlu1 %475 }
  0xb5   : > { %v481_v31 = vpop.permute.xlu0 %480 }
 0x180   : > { %v573_v30 = vpop.f32.mrb[0].mxu1 }
 0x181   : > { %v574_v32 = vadd.f32 %v573_v30, %v476_v29  ;;  %v530_v33 = vpop.f32.mrb[0].mxu0  ;;  %v575_v34 = vpop.f32.mrb[1].mxu1 }
 0x182   : > { %v532_v35 = vpop.f32.mrb[1].mxu0  ;;  %v576_v36 = vpop.f32.mrb[2].mxu1  ;;  %v531_v40 = vadd.f32 %v530_v33, %v476_v29 }
 0x183   : > { %v577_v57 = vadd.f32 %v576_v36, %v481_v31  ;;  %v534_v38 = vpop.f32.mrb[2].mxu0  ;;  %v578_v39 = vpop.f32.mrb[3].mxu1  ;;  %v533_v43 = vadd.f32 %v532_v35, %v476_v29 }
 0x184   : > { %v535_v41 = vadd.f32 %v534_v38, %v481_v31  ;;  %v536_v42 = vpop.f32.mrb[3].mxu0 }
 0x185   : > { %v582_v44 = vpack.c.bf16 %v577_v57, %v574_v32  ;;  %v537_v45 = vadd.f32 %v536_v42, %v481_v31 }
 0x186   : > { %v580_v46 = vpack.c.bf16 %v535_v41, %v531_v40 }
 0x187   : > { %585 = vst [vmem:[%s170_s5 + $0x10] sm:$0xff] %v582_v44  ;;  %v581_v47 = vpack.c.bf16 %v537_v45, %v533_v43 }
 0x188   : > { %583 = vst [vmem:[%s170_s5] sm:$0xff] %v580_v46 }
 0x189   : > { %584 = vst [vmem:[%s170_s5 + $0x8] sm:$0xff] %v581_v47 }
 0x18a PF: > { %s13_s12 = sadd.s32 1, %s799_s12  }
 0x18b   : > { %p10_p4 = scmp.ge.s32.totalorder %s13_s12, 4  }
 0x18d   :  { %12 = sbr.rel (!%p10_p4) target bundleno = 1 (0x1), region = 65 }

// kernel: _lambda_.9
= control target key start
LH: loop header
LB: loop body
LE: loop exit
PB: predicated region body
PF: predicated region fallthrough
CT: control target
= control target key end

     0   :  { %s542_s12 = smov 0   ;;  %s595_s0 = inlined_call_operand.vmem [shape: bf16[2,4,16,128], index: 0, kind: input, shape index: {}]   ;;  %s596_s1 = inlined_call_operand.vmem [shape: bf16[16,144], index: 1, kind: input, shape index: {}]   ;;  %s597_s2 = inlined_call_operand.vmem [shape: f32[16,1], index: 2, kind: input, shape index: {}]   ;;  %s598_s3 = inlined_call_operand.vmem [shape: bf16[2,16,128], index: 3, kind: output, shape index: {}]  }
   0x1 LB: > { %s403_s13 = sadd.s32 4294967295, %s516_s12   ;;  %p407_p0 = scmp.ge.s32.totalorder %s516_s12, 1  ;;  %s516_s12 = sphi %s542_s12, %s13_s12  }
   0x2   : > { %p137_p1 = scmp.lt.s32.totalorder %s516_s12, 3 }
   0x4   : > { %p138_p2 = pnand %p407_p0, %p137_p1 }
   0x5   : > { %p161_p3 = scmp.lt.s32.totalorder (!%p138_p2), %s403_s13, 1  ;;  %v518_v0 = vmov (!%p138_p2), 0   ;;  %s519_s18 = smov (!%p138_p2), 127   ;;  %v509_v15 = vld [vmem:[%s596_s1 + $0x4] ss:$8 sps:$4 sm:$0xff] (!%p138_p2)   ;;  %vm293_vm0 = vcmask (!%p138_p2), 130048  }
   0x6   : > { %141 = sbr.rel (%p138_p2) target bundleno = 386 (0x182), region = 32  ;;  %297 = vmatprep.subr.bf16.mxu0 (!%p138_p2), %v518_v0  ;;  %501 = vset.pattern.permute.xlu1 (!%p138_p2), %v518_v0  ;;  %s520_s19 = smov (!%p138_p2), 119   ;;  %v272_v16 = vld [vmem:[%s597_s2] sm:$0xff] (!%p138_p2)  ;;  %v273_v17 = vld [vmem:[%s597_s2 + $0x8] sm:$0xff] (!%p138_p2) }
   0x7   : > { %502 = vset.pattern.permute.xlu0 (!%p138_p2), %v518_v0  ;;  %s521_s20 = smov (!%p138_p2), 118   ;;  %428 = vmatprep.mubr.msk.bf16.mxu0 (!%p138_p2), %vm293_vm0, %v509_v15  ;;  %v507_v40 = vld [vmem:[%s596_s1] ss:$8 sps:$4 sm:$0xff] (!%p138_p2)  }
   0xd   : > { %s600_s13 = smov (!%p161_p3, %s403_s13), 1 }
   0xe   : > { %s433_s14 = sshll.u32 %s600_s13, 5  ;;  %s434_s29 = sshll.u32 %s600_s13, 3 }
   0xf   : > { %s559_s17 = scalar_lea.vmem %s595_s0, %s433_s14  ;;  %s170_s5 = scalar_lea.vmem %s598_s3, %s434_s29 }
  0x10   : > { %v438_v1 = vld [vmem:[%s559_s17] sm:$0xff]   ;;  %v462_v2 = vld [vmem:[%s559_s17 + $0x10] sm:$0xff]   ;;  %v463_v3 = vld [vmem:[%s559_s17 + $0x8] sm:$0xff]  }
  0x11   : > { %v439_v4 = vunpack.c.l.bf16 %v438_v1  ;;  %v440_v5 = vunpack.c.h.bf16 %v438_v1  ;;  %v443_v6 = vunpack.c.l.bf16 %v462_v2  ;;  %v444_v7 = vunpack.c.h.bf16 %v462_v2  ;;  %v503_v8 = vld [vmem:[%s559_s17] sm:$0xff]   ;;  %v504_v12 = vld [vmem:[%s559_s17 + $0x8] sm:$0xff]   ;;  %v505_v22 = vld [vmem:[%s559_s17 + $0x10] sm:$0xff]  }
  0x12   : > { %v451_v9 = vunpack.c.l.bf16 %v463_v3  ;;  %v452_v10 = vunpack.c.h.bf16 %v463_v3  ;;  %298 = vmatpush1.bf16.msra.mxu0 %v503_v8  ;;  %v506_v27 = vld [vmem:[%s559_s17 + $0x18] sm:$0xff]  }
  0x13   : > { %v476_v11 = vpack.i.bf16 %v440_v5, %v439_v4  ;;  %299 = vmatprep.subr.bf16.mxu0 %v518_v0  ;;  %v481_v13 = vpack.i.bf16 %v444_v7, %v443_v6 }
  0x14   : > { %v491_v14 = vpack.i.bf16 %v452_v10, %v451_v9 }
  0x15   : > { %477 = vrot.lane.b32.xlu0 %v476_v11, %s519_s18  ;;  %487 = vrot.lane.b32.xlu1 %v476_v11, %s520_s19 }
  0x16   : > { %300 = vmatpush1.bf16.msra.mxu0 %v504_v12 }
  0x17   : > { %301 = vmatprep.subr.bf16.mxu0 %v518_v0 }
  0x19   : > { %482 = vrot.lane.b32.xlu0 %v481_v13, %s519_s18  ;;  %492 = vrot.lane.b32.xlu1 %v491_v14, %s520_s19 }
  0x1d   : > { %497 = vrot.lane.b32.xlu0 %v476_v11, %s521_s20  ;;  %276 = vperm.xlu1 %501, %v272_v16  }
  0x21   : > { %281 = vperm.xlu0 %502, %v273_v17  }
  0x87   : > { %v478_v18 = vpop.permute.xlu0 %477  ;;  %v488_v24 = vpop.permute.xlu1 %487 }
  0x88   : > { %v480_v19 = vunpack.i.h.bf16 %v478_v18  ;;  %v479_v20 = vunpack.i.l.bf16 %v478_v18  ;;  %v490_v29 = vunpack.i.h.bf16 %v488_v24  ;;  %v489_v30 = vunpack.i.l.bf16 %v488_v24 }
  0x8a   : > { %v199_v21 = vpack.c.bf16 %v480_v19, %v479_v20  ;;  %v239_v32 = vpack.c.bf16 %v490_v29, %v489_v30 }
  0x8b   : > { %v483_v23 = vpop.permute.xlu0 %482  ;;  %v493_v31 = vpop.permute.xlu1 %492 }
  0x8c   : > { %302 = vmatpush1.bf16.msra.mxu0 %v199_v21  ;;  %v485_v25 = vunpack.i.h.bf16 %v483_v23  ;;  %v484_v26 = vunpack.i.l.bf16 %v483_v23  ;;  %v495_v33 = vunpack.i.h.bf16 %v493_v31  ;;  %v494_v34 = vunpack.i.l.bf16 %v493_v31 }
  0x8d   : > { %303 = vmatprep.subr.bf16.mxu0 %v518_v0 }
  0x8e   : > { %v229_v28 = vpack.c.bf16 %v485_v25, %v484_v26  ;;  %v249_v36 = vpack.c.bf16 %v495_v33, %v494_v34 }
  0x8f   : > { %v498_v35 = vpop.permute.xlu0 %497 }
  0x90   : > { %304 = vmatpush1.bf16.msra.mxu0 %v505_v22  ;;  %v500_v37 = vunpack.i.h.bf16 %v498_v35  ;;  %v499_v38 = vunpack.i.l.bf16 %v498_v35 }
  0x91   : > { %305 = vmatprep.subr.bf16.mxu0 %v518_v0 }
  0x92   : > { %v259_v39 = vpack.c.bf16 %v500_v37, %v499_v38 }
  0x94   : > { %306 = vmatpush1.bf16.msra.mxu0 %v506_v27 }
  0x95   : > { %307 = vmatprep.subr.bf16.mxu0 %v518_v0 }
  0x98   : > { %308 = vmatpush1.bf16.msra.mxu0 %v229_v28 }
  0x99   : > { %309 = vmatprep.subr.bf16.mxu0 %v518_v0 }
  0x9c   : > { %310 = vmatpush1.bf16.msra.mxu0 %v239_v32  ;;  %v277_v41 = vpop.permute.xlu1 %276 }
  0x9d   : > { %311 = vmatprep.subr.bf16.mxu0 %v518_v0 }
  0xa0   : > { %312 = vmatpush1.bf16.msra.mxu0 %v249_v36  ;;  %v282_v43 = vpop.permute.xlu0 %281 }
  0xa1   : > { %313 = vmatprep.subr.bf16.mxu0 %v518_v0 }
  0xa4   : > { %314 = vmatpush1.bf16.msra.mxu0 %v259_v39 }
  0xa7   : > { %330 = vmatmul.mubr.bf16.vlgmr.msra.gmra.mrb[0].mxu0 %v507_v40 }
 0x17a   : > { %v331_v42 = vpop.f32.mrb[0].mxu0 }
 0x17b   : > { %v333_v44 = vpop.f32.mrb[1].mxu0  ;;  %v332_v46 = vadd.f32 %v331_v42, %v277_v41 }
 0x17c   : > { %v334_v45 = vpop.f32.mrb[2].mxu0 }
 0x17d   : > { %v335_v47 = vadd.f32 %v334_v45, %v282_v43  ;;  %v336_v48 = vpop.f32.mrb[3].mxu0 }
 0x17f   : > { %v460_v49 = vpack.c.bf16 %v335_v47, %v332_v46 }
 0x181   : > { %461 = vst [vmem:[%s170_s5] sm:$0xff] %v460_v49  }
 0x182 PF: > { %s13_s12 = sadd.s32 1, %s516_s12  }
 0x183   : > { %p10_p4 = scmp.ge.s32.totalorder %s13_s12, 4  }
 0x185   :  { %12 = sbr.rel (!%p10_p4) target bundleno = 1 (0x1), region = 65 }

// kernel: _lambda_.10
= control target key start
LH: loop header
LB: loop body
LE: loop exit
PB: predicated region body
PF: predicated region fallthrough
CT: control target
= control target key end

     0   :  { %s542_s12 = smov 0   ;;  %s595_s0 = inlined_call_operand.vmem [shape: bf16[2,4,16,128], index: 0, kind: input, shape index: {}]   ;;  %s596_s1 = inlined_call_operand.vmem [shape: bf16[16,144], index: 1, kind: input, shape index: {}]   ;;  %s597_s2 = inlined_call_operand.vmem [shape: f32[16,1], index: 2, kind: input, shape index: {}]   ;;  %s598_s3 = inlined_call_operand.vmem [shape: bf16[2,16,128], index: 3, kind: output, shape index: {}]  }
   0x1 LB: > { %s403_s13 = sadd.s32 4294967295, %s516_s12   ;;  %p407_p0 = scmp.ge.s32.totalorder %s516_s12, 1  ;;  %s516_s12 = sphi %s542_s12, %s13_s12  }
   0x2   : > { %p137_p1 = scmp.lt.s32.totalorder %s516_s12, 3 }
   0x4   : > { %p138_p2 = pnand %p407_p0, %p137_p1 }
   0x5   : > { %p161_p3 = scmp.lt.s32.totalorder (!%p138_p2), %s403_s13, 1  ;;  %v518_v0 = vmov (!%p138_p2), 0   ;;  %s519_s18 = smov (!%p138_p2), 127   ;;  %v509_v15 = vld [vmem:[%s596_s1 + $0x4] ss:$8 sps:$4 sm:$0xff] (!%p138_p2)   ;;  %vm293_vm0 = vcmask (!%p138_p2), 130048  }
   0x6   : > { %141 = sbr.rel (%p138_p2) target bundleno = 386 (0x182), region = 32  ;;  %297 = vmatprep.subr.bf16.mxu0 (!%p138_p2), %v518_v0  ;;  %501 = vset.pattern.permute.xlu1 (!%p138_p2), %v518_v0  ;;  %s520_s19 = smov (!%p138_p2), 123   ;;  %v272_v16 = vld [vmem:[%s597_s2] sm:$0xff] (!%p138_p2)  ;;  %v273_v17 = vld [vmem:[%s597_s2 + $0x8] sm:$0xff] (!%p138_p2) }
   0x7   : > { %502 = vset.pattern.permute.xlu0 (!%p138_p2), %v518_v0  ;;  %s521_s20 = smov (!%p138_p2), 122   ;;  %428 = vmatprep.mubr.msk.bf16.mxu0 (!%p138_p2), %vm293_vm0, %v509_v15  ;;  %v507_v40 = vld [vmem:[%s596_s1] ss:$8 sps:$4 sm:$0xff] (!%p138_p2)  }
   0xd   : > { %s600_s13 = smov (!%p161_p3, %s403_s13), 1 }
   0xe   : > { %s433_s14 = sshll.u32 %s600_s13, 5  ;;  %s434_s29 = sshll.u32 %s600_s13, 3 }
   0xf   : > { %s559_s17 = scalar_lea.vmem %s595_s0, %s433_s14  ;;  %s170_s5 = scalar_lea.vmem %s598_s3, %s434_s29 }
  0x10   : > { %v438_v1 = vld [vmem:[%s559_s17] sm:$0xff]   ;;  %v462_v2 = vld [vmem:[%s559_s17 + $0x10] sm:$0xff]   ;;  %v463_v3 = vld [vmem:[%s559_s17 + $0x8] sm:$0xff]  }
  0x11   : > { %v439_v4 = vunpack.c.l.bf16 %v438_v1  ;;  %v440_v5 = vunpack.c.h.bf16 %v438_v1  ;;  %v443_v6 = vunpack.c.l.bf16 %v462_v2  ;;  %v444_v7 = vunpack.c.h.bf16 %v462_v2  ;;  %v503_v8 = vld [vmem:[%s559_s17] sm:$0xff]   ;;  %v504_v12 = vld [vmem:[%s559_s17 + $0x8] sm:$0xff]   ;;  %v505_v22 = vld [vmem:[%s559_s17 + $0x10] sm:$0xff]  }
  0x12   : > { %v451_v9 = vunpack.c.l.bf16 %v463_v3  ;;  %v452_v10 = vunpack.c.h.bf16 %v463_v3  ;;  %298 = vmatpush1.bf16.msra.mxu0 %v503_v8  ;;  %v506_v27 = vld [vmem:[%s559_s17 + $0x18] sm:$0xff]  }
  0x13   : > { %v476_v11 = vpack.i.bf16 %v440_v5, %v439_v4  ;;  %299 = vmatprep.subr.bf16.mxu0 %v518_v0  ;;  %v481_v13 = vpack.i.bf16 %v444_v7, %v443_v6 }
  0x14   : > { %v491_v14 = vpack.i.bf16 %v452_v10, %v451_v9 }
  0x15   : > { %477 = vrot.lane.b32.xlu0 %v476_v11, %s519_s18  ;;  %487 = vrot.lane.b32.xlu1 %v476_v11, %s520_s19 }
  0x16   : > { %300 = vmatpush1.bf16.msra.mxu0 %v504_v12 }
  0x17   : > { %301 = vmatprep.subr.bf16.mxu0 %v518_v0 }
  0x19   : > { %482 = vrot.lane.b32.xlu0 %v481_v13, %s519_s18  ;;  %492 = vrot.lane.b32.xlu1 %v491_v14, %s520_s19 }
  0x1d   : > { %497 = vrot.lane.b32.xlu0 %v476_v11, %s521_s20  ;;  %276 = vperm.xlu1 %501, %v272_v16  }
  0x21   : > { %281 = vperm.xlu0 %502, %v273_v17  }
  0x87   : > { %v478_v18 = vpop.permute.xlu0 %477  ;;  %v488_v24 = vpop.permute.xlu1 %487 }
  0x88   : > { %v480_v19 = vunpack.i.h.bf16 %v478_v18  ;;  %v479_v20 = vunpack.i.l.bf16 %v478_v18  ;;  %v490_v29 = vunpack.i.h.bf16 %v488_v24  ;;  %v489_v30 = vunpack.i.l.bf16 %v488_v24 }
  0x8a   : > { %v199_v21 = vpack.c.bf16 %v480_v19, %v479_v20  ;;  %v239_v32 = vpack.c.bf16 %v490_v29, %v489_v30 }
  0x8b   : > { %v483_v23 = vpop.permute.xlu0 %482  ;;  %v493_v31 = vpop.permute.xlu1 %492 }
  0x8c   : > { %302 = vmatpush1.bf16.msra.mxu0 %v199_v21  ;;  %v485_v25 = vunpack.i.h.bf16 %v483_v23  ;;  %v484_v26 = vunpack.i.l.bf16 %v483_v23  ;;  %v495_v33 = vunpack.i.h.bf16 %v493_v31  ;;  %v494_v34 = vunpack.i.l.bf16 %v493_v31 }
  0x8d   : > { %303 = vmatprep.subr.bf16.mxu0 %v518_v0 }
  0x8e   : > { %v229_v28 = vpack.c.bf16 %v485_v25, %v484_v26  ;;  %v249_v36 = vpack.c.bf16 %v495_v33, %v494_v34 }
  0x8f   : > { %v498_v35 = vpop.permute.xlu0 %497 }
  0x90   : > { %304 = vmatpush1.bf16.msra.mxu0 %v505_v22  ;;  %v500_v37 = vunpack.i.h.bf16 %v498_v35  ;;  %v499_v38 = vunpack.i.l.bf16 %v498_v35 }
  0x91   : > { %305 = vmatprep.subr.bf16.mxu0 %v518_v0 }
  0x92   : > { %v259_v39 = vpack.c.bf16 %v500_v37, %v499_v38 }
  0x94   : > { %306 = vmatpush1.bf16.msra.mxu0 %v506_v27 }
  0x95   : > { %307 = vmatprep.subr.bf16.mxu0 %v518_v0 }
  0x98   : > { %308 = vmatpush1.bf16.msra.mxu0 %v229_v28 }
  0x99   : > { %309 = vmatprep.subr.bf16.mxu0 %v518_v0 }
  0x9c   : > { %310 = vmatpush1.bf16.msra.mxu0 %v239_v32  ;;  %v277_v41 = vpop.permute.xlu1 %276 }
  0x9d   : > { %311 = vmatprep.subr.bf16.mxu0 %v518_v0 }
  0xa0   : > { %312 = vmatpush1.bf16.msra.mxu0 %v249_v36  ;;  %v282_v43 = vpop.permute.xlu0 %281 }
  0xa1   : > { %313 = vmatprep.subr.bf16.mxu0 %v518_v0 }
  0xa4   : > { %314 = vmatpush1.bf16.msra.mxu0 %v259_v39 }
  0xa7   : > { %330 = vmatmul.mubr.bf16.vlgmr.msra.gmra.mrb[0].mxu0 %v507_v40 }
 0x17a   : > { %v331_v42 = vpop.f32.mrb[0].mxu0 }
 0x17b   : > { %v333_v44 = vpop.f32.mrb[1].mxu0  ;;  %v332_v46 = vadd.f32 %v331_v42, %v277_v41 }
 0x17c   : > { %v334_v45 = vpop.f32.mrb[2].mxu0 }
 0x17d   : > { %v335_v47 = vadd.f32 %v334_v45, %v282_v43  ;;  %v336_v48 = vpop.f32.mrb[3].mxu0 }
 0x17f   : > { %v460_v49 = vpack.c.bf16 %v335_v47, %v332_v46 }
 0x181   : > { %461 = vst [vmem:[%s170_s5] sm:$0xff] %v460_v49  }
 0x182 PF: > { %s13_s12 = sadd.s32 1, %s516_s12  }
 0x183   : > { %p10_p4 = scmp.ge.s32.totalorder %s13_s12, 4  }
 0x185   :  { %12 = sbr.rel (!%p10_p4) target bundleno = 1 (0x1), region = 65 }

// kernel: _lambda_.12
= control target key start
LH: loop header
LB: loop body
LE: loop exit
PB: predicated region body
PF: predicated region fallthrough
CT: control target
= control target key end

     0   :  { %s561_s12 = smov 0   ;;  %s608_s0 = inlined_call_operand.vmem [shape: bf16[2,1,16,128], index: 0, kind: input, shape index: {}]   ;;  %s609_s1 = inlined_call_operand.vmem [shape: bf16[16,144], index: 1, kind: input, shape index: {}]   ;;  %s610_s2 = inlined_call_operand.vmem [shape: f32[16,1], index: 2, kind: input, shape index: {}]   ;;  %s611_s3 = inlined_call_operand.vmem [shape: bf16[2,16,128], index: 3, kind: output, shape index: {}]  }
   0x1 LB: > { %s403_s13 = sadd.s32 4294967295, %s530_s12   ;;  %p407_p0 = scmp.ge.s32.totalorder %s530_s12, 1  ;;  %s530_s12 = sphi %s561_s12, %s13_s12  }
   0x2   : > { %p137_p1 = scmp.lt.s32.totalorder %s530_s12, 3 }
   0x4   : > { %p138_p2 = pnand %p407_p0, %p137_p1 }
   0x5   : > { %p161_p3 = scmp.lt.s32.totalorder (!%p138_p2), %s403_s13, 1  ;;  %v532_v0 = vmov (!%p138_p2), 0   ;;  %s533_s18 = smov (!%p138_p2), 127   ;;  %v523_v6 = vld [vmem:[%s609_s1 + $0x4] ss:$8 sps:$4 sm:$0xff] (!%p138_p2)   ;;  %vm293_vm0 = vcmask (!%p138_p2), 130048  }
   0x6   : > { %141 = sbr.rel (%p138_p2) target bundleno = 390 (0x186), region = 32  ;;  %297 = vmatprep.subr.bf16.mxu0 (!%p138_p2), %v532_v0  ;;  %518 = vset.pattern.permute.xlu0 (!%p138_p2), %v532_v0  ;;  %s534_s19 = smov (!%p138_p2), 122   ;;  %v272_v7 = vld [vmem:[%s610_s2] sm:$0xff] (!%p138_p2)  ;;  %v273_v8 = vld [vmem:[%s610_s2 + $0x8] sm:$0xff] (!%p138_p2) }
   0x7   : > { %519 = vset.pattern.permute.xlu1 (!%p138_p2), %v532_v0  ;;  %s535_s20 = smov (!%p138_p2), 126   ;;  %s536_s21 = smov (!%p138_p2), 121   ;;  %415 = vmatprep.mubr.msk.bf16.mxu0 (!%p138_p2), %vm293_vm0, %v523_v6  ;;  %v521_v41 = vld [vmem:[%s609_s1] ss:$8 sps:$4 sm:$0xff] (!%p138_p2)  }
   0x8   : > { %s537_s22 = smov (!%p138_p2), 120   ;;  %s538_s23 = smov (!%p138_p2), 116  }
   0x9   : > { %s539_s24 = smov (!%p138_p2), 115   ;;  %s540_s25 = smov (!%p138_p2), 114  }
   0xd   : > { %s613_s13 = smov (!%p161_p3, %s403_s13), 1 }
   0xe   : > { %s420_s14 = sshll.u32 %s613_s13, 3 }
   0xf   : > { %s165_s17 = scalar_lea.vmem %s608_s0, %s420_s14  ;;  %s170_s9 = scalar_lea.vmem %s611_s3, %s420_s14 }
  0x10   : > { %v425_v1 = vld [vmem:[%s165_s17] sm:$0xff]  }
  0x11   : > { %v426_v2 = vunpack.c.l.bf16 %v425_v1  ;;  %v427_v3 = vunpack.c.h.bf16 %v425_v1  ;;  %v520_v4 = vld [vmem:[%s165_s17] sm:$0xff]  }
  0x12   : > { %298 = vmatpush1.bf16.msra.mxu0 %v520_v4 }
  0x13   : > { %v478_v5 = vpack.i.bf16 %v427_v3, %v426_v2  ;;  %299 = vmatprep.subr.bf16.mxu0 %v532_v0 }
  0x15   : > { %479 = vrot.lane.b32.xlu0 %v478_v5, %s533_s18  ;;  %489 = vrot.lane.b32.xlu1 %v478_v5, %s534_s19 }
  0x19   : > { %484 = vrot.lane.b32.xlu0 %v478_v5, %s535_s20  ;;  %494 = vrot.lane.b32.xlu1 %v478_v5, %s536_s21 }
  0x1d   : > { %499 = vrot.lane.b32.xlu0 %v478_v5, %s537_s22  ;;  %504 = vrot.lane.b32.xlu1 %v478_v5, %s538_s23 }
  0x21   : > { %509 = vrot.lane.b32.xlu0 %v478_v5, %s539_s24  ;;  %514 = vrot.lane.b32.xlu1 %v478_v5, %s540_s25 }
  0x25   : > { %276 = vperm.xlu0 %518, %v272_v7   ;;  %281 = vperm.xlu1 %519, %v273_v8  }
  0x87   : > { %v480_v9 = vpop.permute.xlu0 %479  ;;  %v490_v10 = vpop.permute.xlu1 %489 }
  0x88   : > { %v482_v11 = vunpack.i.h.bf16 %v480_v9  ;;  %v481_v12 = vunpack.i.l.bf16 %v480_v9  ;;  %v492_v17 = vunpack.i.h.bf16 %v490_v10  ;;  %v491_v18 = vunpack.i.l.bf16 %v490_v10 }
  0x8a   : > { %v189_v13 = vpack.c.bf16 %v482_v11, %v481_v12  ;;  %v209_v21 = vpack.c.bf16 %v492_v17, %v491_v18 }
  0x8b   : > { %v485_v14 = vpop.permute.xlu0 %484  ;;  %v495_v19 = vpop.permute.xlu1 %494 }
  0x8c   : > { %v487_v15 = vunpack.i.h.bf16 %v485_v14  ;;  %v486_v16 = vunpack.i.l.bf16 %v485_v14  ;;  %300 = vmatpush1.bf16.msra.mxu0 %v189_v13  ;;  %v497_v22 = vunpack.i.h.bf16 %v495_v19  ;;  %v496_v23 = vunpack.i.l.bf16 %v495_v19 }
  0x8d   : > { %301 = vmatprep.subr.bf16.mxu0 %v532_v0 }
  0x8e   : > { %v199_v20 = vpack.c.bf16 %v487_v15, %v486_v16  ;;  %v219_v25 = vpack.c.bf16 %v497_v22, %v496_v23 }
  0x8f   : > { %v500_v24 = vpop.permute.xlu0 %499  ;;  %v505_v28 = vpop.permute.xlu1 %504 }
  0x90   : > { %302 = vmatpush1.bf16.msra.mxu0 %v199_v20  ;;  %v502_v26 = vunpack.i.h.bf16 %v500_v24  ;;  %v501_v27 = vunpack.i.l.bf16 %v500_v24  ;;  %v507_v30 = vunpack.i.h.bf16 %v505_v28  ;;  %v506_v31 = vunpack.i.l.bf16 %v505_v28 }
  0x91   : > { %303 = vmatprep.subr.bf16.mxu0 %v532_v0 }
  0x92   : > { %v229_v29 = vpack.c.bf16 %v502_v26, %v501_v27  ;;  %v239_v33 = vpack.c.bf16 %v507_v30, %v506_v31 }
  0x93   : > { %v510_v32 = vpop.permute.xlu0 %509  ;;  %v515_v36 = vpop.permute.xlu1 %514 }
  0x94   : > { %304 = vmatpush1.bf16.msra.mxu0 %v209_v21  ;;  %v512_v34 = vunpack.i.h.bf16 %v510_v32  ;;  %v511_v35 = vunpack.i.l.bf16 %v510_v32  ;;  %v517_v38 = vunpack.i.h.bf16 %v515_v36  ;;  %v516_v39 = vunpack.i.l.bf16 %v515_v36 }
  0x95   : > { %305 = vmatprep.subr.bf16.mxu0 %v532_v0 }
  0x96   : > { %v249_v37 = vpack.c.bf16 %v512_v34, %v511_v35  ;;  %v259_v40 = vpack.c.bf16 %v517_v38, %v516_v39 }
  0x98   : > { %306 = vmatpush1.bf16.msra.mxu0 %v219_v25 }
  0x99   : > { %307 = vmatprep.subr.bf16.mxu0 %v532_v0 }
  0x9c   : > { %308 = vmatpush1.bf16.msra.mxu0 %v229_v29 }
  0x9d   : > { %309 = vmatprep.subr.bf16.mxu0 %v532_v0 }
  0xa0   : > { %310 = vmatpush1.bf16.msra.mxu0 %v239_v33 }
  0xa1   : > { %311 = vmatprep.subr.bf16.mxu0 %v532_v0 }
  0xa4   : > { %312 = vmatpush1.bf16.msra.mxu0 %v249_v37  ;;  %v277_v42 = vpop.permute.xlu0 %276  ;;  %v282_v44 = vpop.permute.xlu1 %281 }
  0xa5   : > { %313 = vmatprep.subr.bf16.mxu0 %v532_v0 }
  0xa8   : > { %314 = vmatpush1.bf16.msra.mxu0 %v259_v40 }
  0xab   : > { %330 = vmatmul.mubr.bf16.vlgmr.msra.gmra.mrb[0].mxu0 %v521_v41 }
 0x17e   : > { %v331_v43 = vpop.f32.mrb[0].mxu0 }
 0x17f   : > { %v333_v45 = vpop.f32.mrb[1].mxu0  ;;  %v332_v47 = vadd.f32 %v331_v43, %v277_v42 }
 0x180   : > { %v334_v46 = vpop.f32.mrb[2].mxu0 }
 0x181   : > { %v335_v48 = vadd.f32 %v334_v46, %v282_v44  ;;  %v336_v49 = vpop.f32.mrb[3].mxu0 }
 0x183   : > { %v459_v50 = vpack.c.bf16 %v335_v48, %v332_v47 }
 0x185   : > { %460 = vst [vmem:[%s170_s9] sm:$0xff] %v459_v50  }
 0x186 PF: > { %s13_s12 = sadd.s32 1, %s530_s12  }
 0x187   : > { %p10_p4 = scmp.ge.s32.totalorder %s13_s12, 4  }
 0x189   :  { %12 = sbr.rel (!%p10_p4) target bundleno = 1 (0x1), region = 62 }

// kernel: _lambda_.11
= control target key start
LH: loop header
LB: loop body
LE: loop exit
PB: predicated region body
PF: predicated region fallthrough
CT: control target
= control target key end

     0   :  { %s561_s12 = smov 0   ;;  %s608_s0 = inlined_call_operand.vmem [shape: bf16[2,1,16,128], index: 0, kind: input, shape index: {}]   ;;  %s609_s1 = inlined_call_operand.vmem [shape: bf16[16,144], index: 1, kind: input, shape index: {}]   ;;  %s610_s2 = inlined_call_operand.vmem [shape: f32[16,1], index: 2, kind: input, shape index: {}]   ;;  %s611_s3 = inlined_call_operand.vmem [shape: bf16[2,16,128], index: 3, kind: output, shape index: {}]  }
   0x1 LB: > { %s403_s13 = sadd.s32 4294967295, %s530_s12   ;;  %p407_p0 = scmp.ge.s32.totalorder %s530_s12, 1  ;;  %s530_s12 = sphi %s561_s12, %s13_s12  }
   0x2   : > { %p137_p1 = scmp.lt.s32.totalorder %s530_s12, 3 }
   0x4   : > { %p138_p2 = pnand %p407_p0, %p137_p1 }
   0x5   : > { %p161_p3 = scmp.lt.s32.totalorder (!%p138_p2), %s403_s13, 1  ;;  %v532_v0 = vmov (!%p138_p2), 0   ;;  %s533_s18 = smov (!%p138_p2), 126   ;;  %v523_v6 = vld [vmem:[%s609_s1 + $0x4] ss:$8 sps:$4 sm:$0xff] (!%p138_p2)   ;;  %vm293_vm0 = vcmask (!%p138_p2), 130048  }
   0x6   : > { %141 = sbr.rel (%p138_p2) target bundleno = 390 (0x186), region = 32  ;;  %297 = vmatprep.subr.bf16.mxu0 (!%p138_p2), %v532_v0  ;;  %518 = vset.pattern.permute.xlu0 (!%p138_p2), %v532_v0  ;;  %s534_s19 = smov (!%p138_p2), 112   ;;  %v272_v7 = vld [vmem:[%s610_s2] sm:$0xff] (!%p138_p2)  ;;  %v273_v8 = vld [vmem:[%s610_s2 + $0x8] sm:$0xff] (!%p138_p2) }
   0x7   : > { %519 = vset.pattern.permute.xlu1 (!%p138_p2), %v532_v0  ;;  %s535_s20 = smov (!%p138_p2), 124   ;;  %s536_s21 = smov (!%p138_p2), 110   ;;  %415 = vmatprep.mubr.msk.bf16.mxu0 (!%p138_p2), %vm293_vm0, %v523_v6  ;;  %v521_v41 = vld [vmem:[%s609_s1] ss:$8 sps:$4 sm:$0xff] (!%p138_p2)  }
   0x8   : > { %s537_s22 = smov (!%p138_p2), 108   ;;  %s538_s23 = smov (!%p138_p2), 96  }
   0x9   : > { %s539_s24 = smov (!%p138_p2), 94   ;;  %s540_s25 = smov (!%p138_p2), 92  }
   0xd   : > { %s613_s13 = smov (!%p161_p3, %s403_s13), 1 }
   0xe   : > { %s420_s14 = sshll.u32 %s613_s13, 3 }
   0xf   : > { %s165_s17 = scalar_lea.vmem %s608_s0, %s420_s14  ;;  %s170_s9 = scalar_lea.vmem %s611_s3, %s420_s14 }
  0x10   : > { %v425_v1 = vld [vmem:[%s165_s17] sm:$0xff]  }
  0x11   : > { %v426_v2 = vunpack.c.l.bf16 %v425_v1  ;;  %v427_v3 = vunpack.c.h.bf16 %v425_v1  ;;  %v520_v4 = vld [vmem:[%s165_s17] sm:$0xff]  }
  0x12   : > { %298 = vmatpush1.bf16.msra.mxu0 %v520_v4 }
  0x13   : > { %v478_v5 = vpack.i.bf16 %v427_v3, %v426_v2  ;;  %299 = vmatprep.subr.bf16.mxu0 %v532_v0 }
  0x15   : > { %479 = vrot.lane.b32.xlu0 %v478_v5, %s533_s18  ;;  %489 = vrot.lane.b32.xlu1 %v478_v5, %s534_s19 }
  0x19   : > { %484 = vrot.lane.b32.xlu0 %v478_v5, %s535_s20  ;;  %494 = vrot.lane.b32.xlu1 %v478_v5, %s536_s21 }
  0x1d   : > { %499 = vrot.lane.b32.xlu0 %v478_v5, %s537_s22  ;;  %504 = vrot.lane.b32.xlu1 %v478_v5, %s538_s23 }
  0x21   : > { %509 = vrot.lane.b32.xlu0 %v478_v5, %s539_s24  ;;  %514 = vrot.lane.b32.xlu1 %v478_v5, %s540_s25 }
  0x25   : > { %276 = vperm.xlu0 %518, %v272_v7   ;;  %281 = vperm.xlu1 %519, %v273_v8  }
  0x87   : > { %v480_v9 = vpop.permute.xlu0 %479  ;;  %v490_v10 = vpop.permute.xlu1 %489 }
  0x88   : > { %v482_v11 = vunpack.i.h.bf16 %v480_v9  ;;  %v481_v12 = vunpack.i.l.bf16 %v480_v9  ;;  %v492_v17 = vunpack.i.h.bf16 %v490_v10  ;;  %v491_v18 = vunpack.i.l.bf16 %v490_v10 }
  0x8a   : > { %v189_v13 = vpack.c.bf16 %v482_v11, %v481_v12  ;;  %v209_v21 = vpack.c.bf16 %v492_v17, %v491_v18 }
  0x8b   : > { %v485_v14 = vpop.permute.xlu0 %484  ;;  %v495_v19 = vpop.permute.xlu1 %494 }
  0x8c   : > { %v487_v15 = vunpack.i.h.bf16 %v485_v14  ;;  %v486_v16 = vunpack.i.l.bf16 %v485_v14  ;;  %300 = vmatpush1.bf16.msra.mxu0 %v189_v13  ;;  %v497_v22 = vunpack.i.h.bf16 %v495_v19  ;;  %v496_v23 = vunpack.i.l.bf16 %v495_v19 }
  0x8d   : > { %301 = vmatprep.subr.bf16.mxu0 %v532_v0 }
  0x8e   : > { %v199_v20 = vpack.c.bf16 %v487_v15, %v486_v16  ;;  %v219_v25 = vpack.c.bf16 %v497_v22, %v496_v23 }
  0x8f   : > { %v500_v24 = vpop.permute.xlu0 %499  ;;  %v505_v28 = vpop.permute.xlu1 %504 }
  0x90   : > { %302 = vmatpush1.bf16.msra.mxu0 %v199_v20  ;;  %v502_v26 = vunpack.i.h.bf16 %v500_v24  ;;  %v501_v27 = vunpack.i.l.bf16 %v500_v24  ;;  %v507_v30 = vunpack.i.h.bf16 %v505_v28  ;;  %v506_v31 = vunpack.i.l.bf16 %v505_v28 }
  0x91   : > { %303 = vmatprep.subr.bf16.mxu0 %v532_v0 }
  0x92   : > { %v229_v29 = vpack.c.bf16 %v502_v26, %v501_v27  ;;  %v239_v33 = vpack.c.bf16 %v507_v30, %v506_v31 }
  0x93   : > { %v510_v32 = vpop.permute.xlu0 %509  ;;  %v515_v36 = vpop.permute.xlu1 %514 }
  0x94   : > { %304 = vmatpush1.bf16.msra.mxu0 %v209_v21  ;;  %v512_v34 = vunpack.i.h.bf16 %v510_v32  ;;  %v511_v35 = vunpack.i.l.bf16 %v510_v32  ;;  %v517_v38 = vunpack.i.h.bf16 %v515_v36  ;;  %v516_v39 = vunpack.i.l.bf16 %v515_v36 }
  0x95   : > { %305 = vmatprep.subr.bf16.mxu0 %v532_v0 }
  0x96   : > { %v249_v37 = vpack.c.bf16 %v512_v34, %v511_v35  ;;  %v259_v40 = vpack.c.bf16 %v517_v38, %v516_v39 }
  0x98   : > { %306 = vmatpush1.bf16.msra.mxu0 %v219_v25 }
  0x99   : > { %307 = vmatprep.subr.bf16.mxu0 %v532_v0 }
  0x9c   : > { %308 = vmatpush1.bf16.msra.mxu0 %v229_v29 }
  0x9d   : > { %309 = vmatprep.subr.bf16.mxu0 %v532_v0 }
  0xa0   : > { %310 = vmatpush1.bf16.msra.mxu0 %v239_v33 }
  0xa1   : > { %311 = vmatprep.subr.bf16.mxu0 %v532_v0 }
  0xa4   : > { %312 = vmatpush1.bf16.msra.mxu0 %v249_v37  ;;  %v277_v42 = vpop.permute.xlu0 %276  ;;  %v282_v44 = vpop.permute.xlu1 %281 }
  0xa5   : > { %313 = vmatprep.subr.bf16.mxu0 %v532_v0 }
  0xa8   : > { %314 = vmatpush1.bf16.msra.mxu0 %v259_v40 }
  0xab   : > { %330 = vmatmul.mubr.bf16.vlgmr.msra.gmra.mrb[0].mxu0 %v521_v41 }
 0x17e   : > { %v331_v43 = vpop.f32.mrb[0].mxu0 }
 0x17f   : > { %v333_v45 = vpop.f32.mrb[1].mxu0  ;;  %v332_v47 = vadd.f32 %v331_v43, %v277_v42 }
 0x180   : > { %v334_v46 = vpop.f32.mrb[2].mxu0 }
 0x181   : > { %v335_v48 = vadd.f32 %v334_v46, %v282_v44  ;;  %v336_v49 = vpop.f32.mrb[3].mxu0 }
 0x183   : > { %v459_v50 = vpack.c.bf16 %v335_v48, %v332_v47 }
 0x185   : > { %460 = vst [vmem:[%s170_s9] sm:$0xff] %v459_v50  }
 0x186 PF: > { %s13_s12 = sadd.s32 1, %s530_s12  }
 0x187   : > { %p10_p4 = scmp.ge.s32.totalorder %s13_s12, 4  }
 0x189   :  { %12 = sbr.rel (!%p10_p4) target bundleno = 1 (0x1), region = 62 }

// kernel: _lambda_.13
= control target key start
LH: loop header
LB: loop body
LE: loop exit
PB: predicated region body
PF: predicated region fallthrough
CT: control target
= control target key end

     0   :  { %s561_s12 = smov 0   ;;  %s608_s0 = inlined_call_operand.vmem [shape: bf16[2,1,16,128], index: 0, kind: input, shape index: {}]   ;;  %s609_s1 = inlined_call_operand.vmem [shape: bf16[16,144], index: 1, kind: input, shape index: {}]   ;;  %s610_s2 = inlined_call_operand.vmem [shape: f32[16,1], index: 2, kind: input, shape index: {}]   ;;  %s611_s3 = inlined_call_operand.vmem [shape: bf16[2,16,128], index: 3, kind: output, shape index: {}]  }
   0x1 LB: > { %s403_s13 = sadd.s32 4294967295, %s530_s12   ;;  %p407_p0 = scmp.ge.s32.totalorder %s530_s12, 1  ;;  %s530_s12 = sphi %s561_s12, %s13_s12  }
   0x2   : > { %p137_p1 = scmp.lt.s32.totalorder %s530_s12, 3 }
   0x4   : > { %p138_p2 = pnand %p407_p0, %p137_p1 }
   0x5   : > { %p161_p3 = scmp.lt.s32.totalorder (!%p138_p2), %s403_s13, 1  ;;  %v532_v0 = vmov (!%p138_p2), 0   ;;  %s533_s18 = smov (!%p138_p2), 127   ;;  %v523_v6 = vld [vmem:[%s609_s1 + $0x4] ss:$8 sps:$4 sm:$0xff] (!%p138_p2)   ;;  %vm293_vm0 = vcmask (!%p138_p2), 130048  }
   0x6   : > { %141 = sbr.rel (%p138_p2) target bundleno = 390 (0x186), region = 32  ;;  %297 = vmatprep.subr.bf16.mxu0 (!%p138_p2), %v532_v0  ;;  %518 = vset.pattern.permute.xlu0 (!%p138_p2), %v532_v0  ;;  %s534_s19 = smov (!%p138_p2), 118   ;;  %v272_v7 = vld [vmem:[%s610_s2] sm:$0xff] (!%p138_p2)  ;;  %v273_v8 = vld [vmem:[%s610_s2 + $0x8] sm:$0xff] (!%p138_p2) }
   0x7   : > { %519 = vset.pattern.permute.xlu1 (!%p138_p2), %v532_v0  ;;  %s535_s20 = smov (!%p138_p2), 126   ;;  %s536_s21 = smov (!%p138_p2), 117   ;;  %415 = vmatprep.mubr.msk.bf16.mxu0 (!%p138_p2), %vm293_vm0, %v523_v6  ;;  %v521_v41 = vld [vmem:[%s609_s1] ss:$8 sps:$4 sm:$0xff] (!%p138_p2)  }
   0x8   : > { %s537_s22 = smov (!%p138_p2), 116   ;;  %s538_s23 = smov (!%p138_p2), 108  }
   0x9   : > { %s539_s24 = smov (!%p138_p2), 107   ;;  %s540_s25 = smov (!%p138_p2), 106  }
   0xd   : > { %s613_s13 = smov (!%p161_p3, %s403_s13), 1 }
   0xe   : > { %s420_s14 = sshll.u32 %s613_s13, 3 }
   0xf   : > { %s165_s17 = scalar_lea.vmem %s608_s0, %s420_s14  ;;  %s170_s9 = scalar_lea.vmem %s611_s3, %s420_s14 }
  0x10   : > { %v425_v1 = vld [vmem:[%s165_s17] sm:$0xff]  }
  0x11   : > { %v426_v2 = vunpack.c.l.bf16 %v425_v1  ;;  %v427_v3 = vunpack.c.h.bf16 %v425_v1  ;;  %v520_v4 = vld [vmem:[%s165_s17] sm:$0xff]  }
  0x12   : > { %298 = vmatpush1.bf16.msra.mxu0 %v520_v4 }
  0x13   : > { %v478_v5 = vpack.i.bf16 %v427_v3, %v426_v2  ;;  %299 = vmatprep.subr.bf16.mxu0 %v532_v0 }
  0x15   : > { %479 = vrot.lane.b32.xlu0 %v478_v5, %s533_s18  ;;  %489 = vrot.lane.b32.xlu1 %v478_v5, %s534_s19 }
  0x19   : > { %484 = vrot.lane.b32.xlu0 %v478_v5, %s535_s20  ;;  %494 = vrot.lane.b32.xlu1 %v478_v5, %s536_s21 }
  0x1d   : > { %499 = vrot.lane.b32.xlu0 %v478_v5, %s537_s22  ;;  %504 = vrot.lane.b32.xlu1 %v478_v5, %s538_s23 }
  0x21   : > { %509 = vrot.lane.b32.xlu0 %v478_v5, %s539_s24  ;;  %514 = vrot.lane.b32.xlu1 %v478_v5, %s540_s25 }
  0x25   : > { %276 = vperm.xlu0 %518, %v272_v7   ;;  %281 = vperm.xlu1 %519, %v273_v8  }
  0x87   : > { %v480_v9 = vpop.permute.xlu0 %479  ;;  %v490_v10 = vpop.permute.xlu1 %489 }
  0x88   : > { %v482_v11 = vunpack.i.h.bf16 %v480_v9  ;;  %v481_v12 = vunpack.i.l.bf16 %v480_v9  ;;  %v492_v17 = vunpack.i.h.bf16 %v490_v10  ;;  %v491_v18 = vunpack.i.l.bf16 %v490_v10 }
  0x8a   : > { %v189_v13 = vpack.c.bf16 %v482_v11, %v481_v12  ;;  %v209_v21 = vpack.c.bf16 %v492_v17, %v491_v18 }
  0x8b   : > { %v485_v14 = vpop.permute.xlu0 %484  ;;  %v495_v19 = vpop.permute.xlu1 %494 }
  0x8c   : > { %v487_v15 = vunpack.i.h.bf16 %v485_v14  ;;  %v486_v16 = vunpack.i.l.bf16 %v485_v14  ;;  %300 = vmatpush1.bf16.msra.mxu0 %v189_v13  ;;  %v497_v22 = vunpack.i.h.bf16 %v495_v19  ;;  %v496_v23 = vunpack.i.l.bf16 %v495_v19 }
  0x8d   : > { %301 = vmatprep.subr.bf16.mxu0 %v532_v0 }
  0x8e   : > { %v199_v20 = vpack.c.bf16 %v487_v15, %v486_v16  ;;  %v219_v25 = vpack.c.bf16 %v497_v22, %v496_v23 }
  0x8f   : > { %v500_v24 = vpop.permute.xlu0 %499  ;;  %v505_v28 = vpop.permute.xlu1 %504 }
  0x90   : > { %302 = vmatpush1.bf16.msra.mxu0 %v199_v20  ;;  %v502_v26 = vunpack.i.h.bf16 %v500_v24  ;;  %v501_v27 = vunpack.i.l.bf16 %v500_v24  ;;  %v507_v30 = vunpack.i.h.bf16 %v505_v28  ;;  %v506_v31 = vunpack.i.l.bf16 %v505_v28 }
  0x91   : > { %303 = vmatprep.subr.bf16.mxu0 %v532_v0 }
  0x92   : > { %v229_v29 = vpack.c.bf16 %v502_v26, %v501_v27  ;;  %v239_v33 = vpack.c.bf16 %v507_v30, %v506_v31 }
  0x93   : > { %v510_v32 = vpop.permute.xlu0 %509  ;;  %v515_v36 = vpop.permute.xlu1 %514 }
  0x94   : > { %304 = vmatpush1.bf16.msra.mxu0 %v209_v21  ;;  %v512_v34 = vunpack.i.h.bf16 %v510_v32  ;;  %v511_v35 = vunpack.i.l.bf16 %v510_v32  ;;  %v517_v38 = vunpack.i.h.bf16 %v515_v36  ;;  %v516_v39 = vunpack.i.l.bf16 %v515_v36 }
  0x95   : > { %305 = vmatprep.subr.bf16.mxu0 %v532_v0 }
  0x96   : > { %v249_v37 = vpack.c.bf16 %v512_v34, %v511_v35  ;;  %v259_v40 = vpack.c.bf16 %v517_v38, %v516_v39 }
  0x98   : > { %306 = vmatpush1.bf16.msra.mxu0 %v219_v25 }
  0x99   : > { %307 = vmatprep.subr.bf16.mxu0 %v532_v0 }
  0x9c   : > { %308 = vmatpush1.bf16.msra.mxu0 %v229_v29 }
  0x9d   : > { %309 = vmatprep.subr.bf16.mxu0 %v532_v0 }
  0xa0   : > { %310 = vmatpush1.bf16.msra.mxu0 %v239_v33 }
  0xa1   : > { %311 = vmatprep.subr.bf16.mxu0 %v532_v0 }
  0xa4   : > { %312 = vmatpush1.bf16.msra.mxu0 %v249_v37  ;;  %v277_v42 = vpop.permute.xlu0 %276  ;;  %v282_v44 = vpop.permute.xlu1 %281 }
  0xa5   : > { %313 = vmatprep.subr.bf16.mxu0 %v532_v0 }
  0xa8   : > { %314 = vmatpush1.bf16.msra.mxu0 %v259_v40 }
  0xab   : > { %330 = vmatmul.mubr.bf16.vlgmr.msra.gmra.mrb[0].mxu0 %v521_v41 }
 0x17e   : > { %v331_v43 = vpop.f32.mrb[0].mxu0 }
 0x17f   : > { %v333_v45 = vpop.f32.mrb[1].mxu0  ;;  %v332_v47 = vadd.f32 %v331_v43, %v277_v42 }
 0x180   : > { %v334_v46 = vpop.f32.mrb[2].mxu0 }
 0x181   : > { %v335_v48 = vadd.f32 %v334_v46, %v282_v44  ;;  %v336_v49 = vpop.f32.mrb[3].mxu0 }
 0x183   : > { %v459_v50 = vpack.c.bf16 %v335_v48, %v332_v47 }
 0x185   : > { %460 = vst [vmem:[%s170_s9] sm:$0xff] %v459_v50  }
 0x186 PF: > { %s13_s12 = sadd.s32 1, %s530_s12  }
 0x187   : > { %p10_p4 = scmp.ge.s32.totalorder %s13_s12, 4  }
 0x189   :  { %12 = sbr.rel (!%p10_p4) target bundleno = 1 (0x1), region = 62 }

// kernel: _lambda_.14
= control target key start
LH: loop header
LB: loop body
LE: loop exit
PB: predicated region body
PF: predicated region fallthrough
CT: control target
= control target key end

     0   :  { %s875_s12 = smov 0   ;;  %s1061_s0 = inlined_call_operand.vmem [shape: bf16[2,1,16,384], index: 0, kind: input, shape index: {}]   ;;  %s1062_s1 = inlined_call_operand.vmem [shape: bf16[16,144], index: 1, kind: input, shape index: {}]   ;;  %s1063_s2 = inlined_call_operand.vmem [shape: f32[16,1], index: 2, kind: input, shape index: {}]   ;;  %s1064_s3 = inlined_call_operand.vmem [shape: bf16[2,16,384], index: 3, kind: output, shape index: {}]  }
   0x1 LB: > { %s676_s13 = sadd.s32 4294967295, %s844_s12   ;;  %p680_p0 = scmp.ge.s32.totalorder %s844_s12, 1  ;;  %s844_s12 = sphi %s875_s12, %s13_s12  }
   0x2   : > { %p137_p1 = scmp.lt.s32.totalorder %s844_s12, 3 }
   0x4   : > { %p138_p2 = pnand %p680_p0, %p137_p1 }
   0x5   : > { %p161_p3 = scmp.lt.s32.totalorder (!%p138_p2), %s676_s13, 1  ;;  %v846_v0 = vmov (!%p138_p2), 0   ;;  %s847_s18 = smov (!%p138_p2), 127   ;;  %v837_v43 = vld [vmem:[%s1062_s1 + $0x4] ss:$8 sps:$4 sm:$0xff] (!%p138_p2)   ;;  %vm527_vm0 = vcmask (!%p138_p2), 130048   ;;  %v217_v47 = vlaneseq (!%p138_p2) }
   0x6   : > { %141 = sbr.rel (%p138_p2) target bundleno = 410 (0x19a), region = 32  ;;  %574 = vmatprep.subr.bf16.mxu1 (!%p138_p2), %v846_v0  ;;  %830 = vset.pattern.permute.xlu0 (!%p138_p2), %v846_v0  ;;  %s848_s19 = smov (!%p138_p2), 126   ;;  %v506_v45 = vld [vmem:[%s1063_s2] sm:$0xff] (!%p138_p2)  ;;  %v507_v46 = vld [vmem:[%s1063_s2 + $0x8] sm:$0xff] (!%p138_p2) }
   0x7   : > { %831 = vset.pattern.permute.xlu1 (!%p138_p2), %v846_v0  ;;  %s849_s20 = smov (!%p138_p2), 110   ;;  %s850_s21 = smov (!%p138_p2), 109   ;;  %689 = vmatprep.mubr.msk.bf16.mxu1 (!%p138_p2), %vm527_vm0, %v837_v43  ;;  %v937_v48 = vand.u32 (!%p138_p2), 127, %v217_v47 }
   0x8   : > { %s851_s22 = smov (!%p138_p2), 108   ;;  %s852_s23 = smov (!%p138_p2), 92   ;;  %688 = vmatprep.mubr.msk.bf16.mxu0 (!%p138_p2), %vm527_vm0, %v837_v43 }
   0x9   : > { %s853_s24 = smov (!%p138_p2), 91   ;;  %s854_s27 = smov (!%p138_p2), 90   ;;  %vm219_vm1 = vcmp.lt.s32.totalorder (!%p138_p2), %v937_v48, 127  ;;  %vm254_vm2 = vcmp.lt.s32.totalorder (!%p138_p2), %v937_v48, 126  ;;  %vm289_vm3 = vcmp.lt.s32.totalorder (!%p138_p2), %v937_v48, 110  ;;  %vm324_vm4 = vcmp.lt.s32.totalorder (!%p138_p2), %v937_v48, 109 }
   0xa   : > { %vm359_vm5 = vcmp.lt.s32.totalorder (!%p138_p2), %v937_v48, 108  ;;  %vm394_vm6 = vcmp.lt.s32.totalorder (!%p138_p2), %v937_v48, 92  ;;  %vm429_vm7 = vcmp.lt.s32.totalorder (!%p138_p2), %v937_v48, 91  ;;  %vm464_vm8 = vcmp.lt.s32.totalorder (!%p138_p2), %v937_v48, 90 }
   0xd   : > { %s1066_s13 = smov (!%p161_p3, %s676_s13), 1 }
   0xe   : > { %s692_s14 = smul.u32 24, %s1066_s13 }
  0x10   : > { %s894_s17 = scalar_lea.vmem %s1061_s0, %s692_s14  ;;  %s170_s9 = scalar_lea.vmem %s1064_s3, %s692_s14 }
  0x11   : > { %v195_v1 = vld [vmem:[%s894_s17] sm:$0xff]  ;;  %v197_v2 = vld [vmem:[%s894_s17 + $0xc] sm:$0xff]  ;;  %v196_v3 = vld [vmem:[%s894_s17 + $0x8] ss:$12 sps:$4 sm:$0xff]  }
  0x12   : > { %v200_v4 = vunpack.c.h.bf16 %v195_v1  ;;  %v203_v5 = vunpack.c.h.bf16 %v197_v2  ;;  %v199_v6 = vunpack.c.l.bf16 %v195_v1  ;;  %v202_v7 = vunpack.c.l.bf16 %v197_v2  ;;  %v233_v10 = vld [vmem:[%s894_s17 + $0x8] ss:$12 sps:$4 sm:$0xff]  }
  0x13   : > { %v201_v8 = vunpack.c.l.bf16 %v196_v3  ;;  %v204_v9 = vunpack.c.h.bf16 %v196_v3  ;;  %v833_v13 = vld [vmem:[%s894_s17 + $0x8] ss:$12 sps:$4 sm:$0xff]   ;;  %v238_v15 = vunpack.c.l.bf16 %v233_v10  ;;  %v241_v16 = vunpack.c.h.bf16 %v233_v10 }
  0x14   : > { %v900_v11 = vpack.i.bf16 %v203_v5, %v200_v4  ;;  %v902_v12 = vpack.i.bf16 %v202_v7, %v199_v6  ;;  %v268_v17 = vld [vmem:[%s894_s17 + $0x8] ss:$12 sps:$4 sm:$0xff]   ;;  %575 = vmatpush1.bf16.msra.mxu1 %v833_v13  ;;  %v684_v18 = vcombine.high %v195_v1, %v197_v2  ;;  %v683_v19 = vcombine.low %v195_v1, %v197_v2 }
  0x15   : > { %v715_v14 = vpack.i.bf16 %v204_v9, %v201_v8  ;;  %576 = vmatprep.subr.bf16.mxu1 %v846_v0  ;;  %v730_v20 = vpack.i.bf16 %v241_v16, %v238_v15  ;;  %v273_v21 = vunpack.c.l.bf16 %v268_v17  ;;  %v276_v22 = vunpack.c.h.bf16 %v268_v17  ;;  %v303_v24 = vld [vmem:[%s894_s17 + $0x8] ss:$12 sps:$4 sm:$0xff]  }
  0x16   : > { %711 = vrot.lane.b32.xlu0 %v900_v11, %s847_s18  ;;  %721 = vrot.lane.b32.xlu1 %v902_v12, %s847_s18  ;;  %v308_v25 = vunpack.c.l.bf16 %v303_v24  ;;  %v311_v26 = vunpack.c.h.bf16 %v303_v24  ;;  %v338_v27 = vld [vmem:[%s894_s17 + $0x8] ss:$12 sps:$4 sm:$0xff]  }
  0x17   : > { %531 = vmatprep.subr.bf16.mxu0 %v684_v18  ;;  %v745_v23 = vpack.i.bf16 %v276_v22, %v273_v21  ;;  %v343_v29 = vunpack.c.l.bf16 %v338_v27  ;;  %v346_v30 = vunpack.c.h.bf16 %v338_v27  ;;  %v373_v32 = vld [vmem:[%s894_s17 + $0x8] ss:$12 sps:$4 sm:$0xff]  }
  0x18   : > { %532 = vmatpush1.bf16.msra.mxu0 %v683_v19  ;;  %v760_v28 = vpack.i.bf16 %v311_v26, %v308_v25  ;;  %v378_v33 = vunpack.c.l.bf16 %v373_v32  ;;  %v381_v34 = vunpack.c.h.bf16 %v373_v32  ;;  %v408_v35 = vld [vmem:[%s894_s17 + $0x8] ss:$12 sps:$4 sm:$0xff]  }
  0x19   : > { %v775_v31 = vpack.i.bf16 %v346_v30, %v343_v29  ;;  %v413_v37 = vunpack.c.l.bf16 %v408_v35  ;;  %v416_v38 = vunpack.c.h.bf16 %v408_v35  ;;  %v443_v40 = vld [vmem:[%s894_s17 + $0x8] ss:$12 sps:$4 sm:$0xff]  }
  0x1a   : > { %716 = vrot.lane.b32.xlu0 %v715_v14, %s847_s18  ;;  %726 = vrot.lane.b32.xlu1 %v900_v11, %s848_s19  ;;  %v790_v36 = vpack.i.bf16 %v381_v34, %v378_v33  ;;  %v448_v41 = vunpack.c.l.bf16 %v443_v40  ;;  %v451_v42 = vunpack.c.h.bf16 %v443_v40 }
  0x1b   : > { %v805_v39 = vpack.i.bf16 %v416_v38, %v413_v37 }
  0x1c   : > { %v820_v44 = vpack.i.bf16 %v451_v42, %v448_v41 }
  0x1e   : > { %731 = vrot.lane.b32.xlu0 %v730_v20, %s848_s19  ;;  %736 = vrot.lane.b32.xlu1 %v902_v12, %s848_s19 }
  0x22   : > { %741 = vrot.lane.b32.xlu0 %v900_v11, %s849_s20  ;;  %746 = vrot.lane.b32.xlu1 %v745_v23, %s849_s20 }
  0x26   : > { %751 = vrot.lane.b32.xlu0 %v902_v12, %s849_s20  ;;  %756 = vrot.lane.b32.xlu1 %v900_v11, %s850_s21 }
  0x2a   : > { %761 = vrot.lane.b32.xlu0 %v760_v28, %s850_s21  ;;  %766 = vrot.lane.b32.xlu1 %v902_v12, %s850_s21 }
  0x2e   : > { %771 = vrot.lane.b32.xlu0 %v900_v11, %s851_s22  ;;  %776 = vrot.lane.b32.xlu1 %v775_v31, %s851_s22 }
  0x32   : > { %781 = vrot.lane.b32.xlu0 %v902_v12, %s851_s22  ;;  %786 = vrot.lane.b32.xlu1 %v900_v11, %s852_s23 }
  0x36   : > { %791 = vrot.lane.b32.xlu0 %v790_v36, %s852_s23  ;;  %796 = vrot.lane.b32.xlu1 %v902_v12, %s852_s23 }
  0x3a   : > { %801 = vrot.lane.b32.xlu0 %v900_v11, %s853_s24  ;;  %806 = vrot.lane.b32.xlu1 %v805_v39, %s853_s24 }
  0x3e   : > { %811 = vrot.lane.b32.xlu0 %v902_v12, %s853_s24  ;;  %816 = vrot.lane.b32.xlu1 %v900_v11, %s854_s27 }
  0x42   : > { %821 = vrot.lane.b32.xlu0 %v820_v44, %s854_s27  ;;  %826 = vrot.lane.b32.xlu1 %v902_v12, %s854_s27 }
  0x46   : > { %510 = vperm.xlu0 %830, %v506_v45   ;;  %515 = vperm.xlu1 %831, %v507_v46  }
  0x88   : > { %v712_v49 = vpop.permute.xlu0 %711  ;;  %v722_v50 = vpop.permute.xlu1 %721 }
  0x89   : > { %v714_v51 = vunpack.i.h.bf16 %v712_v49  ;;  %v713_v52 = vunpack.i.l.bf16 %v712_v49  ;;  %v724_v53 = vunpack.i.h.bf16 %v722_v50  ;;  %v723_v54 = vunpack.i.l.bf16 %v722_v50 }
  0x8b   : > { %v222_v55 = vsel %vm219_vm1, %v723_v54, %v713_v52  ;;  %v223_v56 = vsel %vm219_vm1, %v724_v53, %v714_v51 }
  0x8c   : > { %v717_v57 = vpop.permute.xlu0 %716  ;;  %v727_v58 = vpop.permute.xlu1 %726  ;;  %v226_v61 = vpack.c.bf16 %v223_v56, %v222_v55 }
  0x8d   : > { %v719_v59 = vunpack.i.h.bf16 %v717_v57  ;;  %v718_v60 = vunpack.i.l.bf16 %v717_v57  ;;  %v729_v3 = vunpack.i.h.bf16 %v727_v58  ;;  %v728_v4 = vunpack.i.l.bf16 %v727_v58 }
  0x8f   : > { %v220_v62 = vsel %vm219_vm1, %v713_v52, %v718_v60  ;;  %v221_v63 = vsel %vm219_vm1, %v714_v51, %v719_v59  ;;  %v224_v1 = vsel %vm219_vm1, %v718_v60, %v723_v54  ;;  %v225_v2 = vsel %vm219_vm1, %v719_v59, %v724_v53 }
  0x90   : > { %v732_v5 = vpop.permute.xlu0 %731  ;;  %v737_v6 = vpop.permute.xlu1 %736  ;;  %v227_v7 = vpack.c.bf16 %v221_v63, %v220_v62  ;;  %v228_v8 = vpack.c.bf16 %v225_v2, %v224_v1 }
  0x91   : > { %v734_v9 = vunpack.i.h.bf16 %v732_v5  ;;  %v733_v10 = vunpack.i.l.bf16 %v732_v5  ;;  %v739_v11 = vunpack.i.h.bf16 %v737_v6  ;;  %v738_v12 = vunpack.i.l.bf16 %v737_v6 }
  0x92   : > { %533 = vmatprep.subr.bf16.mxu0 %v227_v7  ;;  %577 = vmatpush1.bf16.msra.mxu1 %v228_v8 }
  0x93   : > { %534 = vmatpush1.bf16.msra.mxu0 %v226_v61  ;;  %578 = vmatprep.subr.bf16.mxu1 %v846_v0  ;;  %v255_v13 = vsel %vm254_vm2, %v728_v4, %v733_v10  ;;  %v256_v14 = vsel %vm254_vm2, %v729_v3, %v734_v9  ;;  %v259_v15 = vsel %vm254_vm2, %v733_v10, %v738_v12 }
  0x94   : > { %v742_v16 = vpop.permute.xlu0 %741  ;;  %v747_v17 = vpop.permute.xlu1 %746  ;;  %v262_v18 = vpack.c.bf16 %v256_v14, %v255_v13  ;;  %v260_v19 = vsel %vm254_vm2, %v734_v9, %v739_v11  ;;  %v257_v20 = vsel %vm254_vm2, %v738_v12, %v728_v4  ;;  %v258_v21 = vsel %vm254_vm2, %v739_v11, %v729_v3 }
  0x95   : > { %v744_v22 = vunpack.i.h.bf16 %v742_v16  ;;  %v743_v23 = vunpack.i.l.bf16 %v742_v16  ;;  %v749_v24 = vunpack.i.h.bf16 %v747_v17  ;;  %v748_v25 = vunpack.i.l.bf16 %v747_v17 }
  0x96   : > { %535 = vmatprep.subr.bf16.mxu0 %v262_v18  ;;  %v263_v26 = vpack.c.bf16 %v260_v19, %v259_v15  ;;  %v261_v27 = vpack.c.bf16 %v258_v21, %v257_v20 }
  0x97   : > { %v290_v28 = vsel %vm289_vm3, %v743_v23, %v748_v25  ;;  %v291_v29 = vsel %vm289_vm3, %v744_v22, %v749_v24 }
  0x98   : > { %579 = vmatpush1.bf16.msra.mxu1 %v263_v26  ;;  %536 = vmatpush1.bf16.msra.mxu0 %v261_v27  ;;  %v752_v30 = vpop.permute.xlu0 %751  ;;  %v757_v31 = vpop.permute.xlu1 %756  ;;  %v297_v32 = vpack.c.bf16 %v291_v29, %v290_v28 }
  0x99   : > { %v754_v33 = vunpack.i.h.bf16 %v752_v30  ;;  %v753_v34 = vunpack.i.l.bf16 %v752_v30  ;;  %580 = vmatprep.subr.bf16.mxu1 %v846_v0  ;;  %v759_v39 = vunpack.i.h.bf16 %v757_v31  ;;  %v758_v40 = vunpack.i.l.bf16 %v757_v31 }
  0x9a   : > { %537 = vmatprep.subr.bf16.mxu0 %v297_v32 }
  0x9b   : > { %v292_v35 = vsel %vm289_vm3, %v753_v34, %v743_v23  ;;  %v293_v36 = vsel %vm289_vm3, %v754_v33, %v744_v22  ;;  %v294_v37 = vsel %vm289_vm3, %v748_v25, %v753_v34  ;;  %v295_v38 = vsel %vm289_vm3, %v749_v24, %v754_v33 }
  0x9c   : > { %v762_v41 = vpop.permute.xlu0 %761  ;;  %v767_v42 = vpop.permute.xlu1 %766  ;;  %v296_v43 = vpack.c.bf16 %v293_v36, %v292_v35  ;;  %v298_v44 = vpack.c.bf16 %v295_v38, %v294_v37 }
  0x9d   : > { %v764_v45 = vunpack.i.h.bf16 %v762_v41  ;;  %v763_v46 = vunpack.i.l.bf16 %v762_v41  ;;  %v769_v47 = vunpack.i.h.bf16 %v767_v42  ;;  %v768_v49 = vunpack.i.l.bf16 %v767_v42 }
  0x9e   : > { %538 = vmatpush1.bf16.msra.mxu0 %v296_v43  ;;  %581 = vmatpush1.bf16.msra.mxu1 %v298_v44 }
  0x9f   : > { %582 = vmatprep.subr.bf16.mxu1 %v846_v0  ;;  %v325_v50 = vsel %vm324_vm4, %v758_v40, %v763_v46  ;;  %v326_v51 = vsel %vm324_vm4, %v759_v39, %v764_v45  ;;  %v329_v52 = vsel %vm324_vm4, %v763_v46, %v768_v49  ;;  %v330_v53 = vsel %vm324_vm4, %v764_v45, %v769_v47 }
  0xa0   : > { %v772_v54 = vpop.permute.xlu0 %771  ;;  %v777_v55 = vpop.permute.xlu1 %776  ;;  %v332_v56 = vpack.c.bf16 %v326_v51, %v325_v50  ;;  %v333_v57 = vpack.c.bf16 %v330_v53, %v329_v52  ;;  %v327_v58 = vsel %vm324_vm4, %v768_v49, %v758_v40  ;;  %v328_v59 = vsel %vm324_vm4, %v769_v47, %v759_v39 }
  0xa1   : > { %v774_v60 = vunpack.i.h.bf16 %v772_v54  ;;  %v773_v61 = vunpack.i.l.bf16 %v772_v54  ;;  %v779_v62 = vunpack.i.h.bf16 %v777_v55  ;;  %v778_v63 = vunpack.i.l.bf16 %v777_v55 }
  0xa2   : > { %539 = vmatprep.subr.bf16.mxu0 %v332_v56  ;;  %583 = vmatpush1.bf16.msra.mxu1 %v333_v57  ;;  %v331_v1 = vpack.c.bf16 %v328_v59, %v327_v58 }
  0xa3   : > { %v360_v2 = vsel %vm359_vm5, %v773_v61, %v778_v63  ;;  %v361_v3 = vsel %vm359_vm5, %v774_v60, %v779_v62  ;;  %584 = vmatprep.subr.bf16.mxu1 %v846_v0 }
  0xa4   : > { %540 = vmatpush1.bf16.msra.mxu0 %v331_v1  ;;  %v782_v4 = vpop.permute.xlu0 %781  ;;  %v787_v5 = vpop.permute.xlu1 %786  ;;  %v367_v6 = vpack.c.bf16 %v361_v3, %v360_v2 }
  0xa5   : > { %v784_v7 = vunpack.i.h.bf16 %v782_v4  ;;  %v783_v8 = vunpack.i.l.bf16 %v782_v4  ;;  %v789_v13 = vunpack.i.h.bf16 %v787_v5  ;;  %v788_v14 = vunpack.i.l.bf16 %v787_v5  ;;  %v835_v5 = vld [vmem:[%s1062_s1] ss:$8 sps:$4 sm:$0xff]  }
  0xa6   : > { %541 = vmatprep.subr.bf16.mxu0 %v367_v6 }
  0xa7   : > { %v362_v9 = vsel %vm359_vm5, %v783_v8, %v773_v61  ;;  %v363_v10 = vsel %vm359_vm5, %v784_v7, %v774_v60  ;;  %v364_v11 = vsel %vm359_vm5, %v778_v63, %v783_v8  ;;  %v365_v12 = vsel %vm359_vm5, %v779_v62, %v784_v7 }
  0xa8   : > { %v792_v15 = vpop.permute.xlu0 %791  ;;  %v797_v16 = vpop.permute.xlu1 %796  ;;  %v366_v17 = vpack.c.bf16 %v363_v10, %v362_v9  ;;  %v368_v18 = vpack.c.bf16 %v365_v12, %v364_v11 }
  0xa9   : > { %v794_v19 = vunpack.i.h.bf16 %v792_v15  ;;  %v793_v20 = vunpack.i.l.bf16 %v792_v15  ;;  %v799_v21 = vunpack.i.h.bf16 %v797_v16  ;;  %v798_v22 = vunpack.i.l.bf16 %v797_v16 }
  0xaa   : > { %542 = vmatpush1.bf16.msra.mxu0 %v366_v17  ;;  %585 = vmatpush1.bf16.msra.mxu1 %v368_v18 }
  0xab   : > { %586 = vmatprep.subr.bf16.mxu1 %v846_v0  ;;  %v395_v23 = vsel %vm394_vm6, %v788_v14, %v793_v20  ;;  %v396_v24 = vsel %vm394_vm6, %v789_v13, %v794_v19  ;;  %v399_v25 = vsel %vm394_vm6, %v793_v20, %v798_v22  ;;  %v400_v26 = vsel %vm394_vm6, %v794_v19, %v799_v21 }
  0xac   : > { %v802_v27 = vpop.permute.xlu0 %801  ;;  %v807_v28 = vpop.permute.xlu1 %806  ;;  %v402_v29 = vpack.c.bf16 %v396_v24, %v395_v23  ;;  %v403_v30 = vpack.c.bf16 %v400_v26, %v399_v25  ;;  %v397_v31 = vsel %vm394_vm6, %v798_v22, %v788_v14  ;;  %v398_v32 = vsel %vm394_vm6, %v799_v21, %v789_v13 }
  0xad   : > { %v804_v33 = vunpack.i.h.bf16 %v802_v27  ;;  %v803_v34 = vunpack.i.l.bf16 %v802_v27  ;;  %v809_v35 = vunpack.i.h.bf16 %v807_v28  ;;  %v808_v36 = vunpack.i.l.bf16 %v807_v28 }
  0xae   : > { %543 = vmatprep.subr.bf16.mxu0 %v402_v29  ;;  %587 = vmatpush1.bf16.msra.mxu1 %v403_v30  ;;  %v401_v37 = vpack.c.bf16 %v398_v32, %v397_v31 }
  0xaf   : > { %v430_v38 = vsel %vm429_vm7, %v803_v34, %v808_v36  ;;  %v431_v39 = vsel %vm429_vm7, %v804_v33, %v809_v35  ;;  %588 = vmatprep.subr.bf16.mxu1 %v846_v0 }
  0xb0   : > { %544 = vmatpush1.bf16.msra.mxu0 %v401_v37  ;;  %v812_v40 = vpop.permute.xlu0 %811  ;;  %v817_v41 = vpop.permute.xlu1 %816  ;;  %v437_v42 = vpack.c.bf16 %v431_v39, %v430_v38 }
  0xb1   : > { %v814_v43 = vunpack.i.h.bf16 %v812_v40  ;;  %v813_v44 = vunpack.i.l.bf16 %v812_v40  ;;  %v819_v50 = vunpack.i.h.bf16 %v817_v41  ;;  %v818_v51 = vunpack.i.l.bf16 %v817_v41 }
  0xb2   : > { %545 = vmatprep.subr.bf16.mxu0 %v437_v42 }
  0xb3   : > { %v432_v45 = vsel %vm429_vm7, %v813_v44, %v803_v34  ;;  %v433_v46 = vsel %vm429_vm7, %v814_v43, %v804_v33  ;;  %v434_v47 = vsel %vm429_vm7, %v808_v36, %v813_v44  ;;  %v435_v49 = vsel %vm429_vm7, %v809_v35, %v814_v43 }
  0xb4   : > { %v822_v52 = vpop.permute.xlu0 %821  ;;  %v827_v53 = vpop.permute.xlu1 %826  ;;  %v436_v54 = vpack.c.bf16 %v433_v46, %v432_v45  ;;  %v438_v55 = vpack.c.bf16 %v435_v49, %v434_v47 }
  0xb5   : > { %v824_v56 = vunpack.i.h.bf16 %v822_v52  ;;  %v823_v57 = vunpack.i.l.bf16 %v822_v52  ;;  %v829_v58 = vunpack.i.h.bf16 %v827_v53  ;;  %v828_v59 = vunpack.i.l.bf16 %v827_v53 }
  0xb6   : > { %546 = vmatpush1.bf16.msra.mxu0 %v436_v54  ;;  %589 = vmatpush1.bf16.msra.mxu1 %v438_v55 }
  0xb7   : > { %590 = vmatprep.subr.bf16.mxu1 %v846_v0  ;;  %v465_v60 = vsel %vm464_vm8, %v818_v51, %v823_v57  ;;  %v466_v61 = vsel %vm464_vm8, %v819_v50, %v824_v56  ;;  %v469_v62 = vsel %vm464_vm8, %v823_v57, %v828_v59  ;;  %v470_v63 = vsel %vm464_vm8, %v824_v56, %v829_v58 }
  0xb8   : > { %v472_v1 = vpack.c.bf16 %v466_v61, %v465_v60  ;;  %v473_v2 = vpack.c.bf16 %v470_v63, %v469_v62  ;;  %v467_v3 = vsel %vm464_vm8, %v828_v59, %v818_v51  ;;  %v468_v0 = vsel %vm464_vm8, %v829_v58, %v819_v50 }
  0xb9   : > { %v471_v4 = vpack.c.bf16 %v468_v0, %v467_v3 }
  0xba   : > { %547 = vmatprep.subr.bf16.mxu0 %v472_v1  ;;  %591 = vmatpush1.bf16.msra.mxu1 %v473_v2 }
  0xbb   : > { %548 = vmatpush1.bf16.msra.mxu0 %v471_v4 }
  0xbd   : > { %607 = vmatmul.mubr.bf16.vlgmr.msra.gmra.mrb[0].mxu1 %v835_v5 }
  0xbe   : > { %564 = vmatmul.mubr.bf16.vlgmr.msra.gmra.mrb[0].mxu0 %v835_v5 }
  0xc5   : > { %v511_v6 = vpop.permute.xlu0 %510  ;;  %v516_v8 = vpop.permute.xlu1 %515 }
 0x190   : > { %v608_v7 = vpop.f32.mrb[0].mxu1 }
 0x191   : > { %v609_v9 = vadd.f32 %v608_v7, %v511_v6  ;;  %v565_v10 = vpop.f32.mrb[0].mxu0  ;;  %v610_v11 = vpop.f32.mrb[1].mxu1 }
 0x192   : > { %v567_v12 = vpop.f32.mrb[1].mxu0  ;;  %v611_v48 = vpop.f32.mrb[2].mxu1  ;;  %v566_v16 = vadd.f32 %v565_v10, %v511_v6 }
 0x193   : > { %v612_v13 = vadd.f32 %v611_v48, %v516_v8  ;;  %v569_v14 = vpop.f32.mrb[2].mxu0  ;;  %v613_v15 = vpop.f32.mrb[3].mxu1  ;;  %v568_v19 = vadd.f32 %v567_v12, %v511_v6 }
 0x194   : > { %v570_v17 = vadd.f32 %v569_v14, %v516_v8  ;;  %v571_v18 = vpop.f32.mrb[3].mxu0 }
 0x195   : > { %v617_v20 = vpack.c.bf16 %v612_v13, %v609_v9  ;;  %v572_v21 = vadd.f32 %v571_v18, %v516_v8 }
 0x196   : > { %v615_v22 = vpack.c.bf16 %v570_v17, %v566_v16 }
 0x197   : > { %620 = vst [vmem:[%s170_s9 + $0x10] sm:$0xff] %v617_v20  ;;  %v616_v23 = vpack.c.bf16 %v572_v21, %v568_v19 }
 0x198   : > { %618 = vst [vmem:[%s170_s9] sm:$0xff] %v615_v22 }
 0x199   : > { %619 = vst [vmem:[%s170_s9 + $0x8] sm:$0xff] %v616_v23 }
 0x19a PF: > { %s13_s12 = sadd.s32 1, %s844_s12  }
 0x19b   : > { %p10_p4 = scmp.ge.s32.totalorder %s13_s12, 4  }
 0x19d   :  { %12 = sbr.rel (!%p10_p4) target bundleno = 1 (0x1), region = 62 }

// kernel: _lambda_.15
= control target key start
LH: loop header
LB: loop body
LE: loop exit
PB: predicated region body
PF: predicated region fallthrough
CT: control target
= control target key end

     0   :  { %s2109_s12 = smov 0   ;;  %s2946_s0 = inlined_call_operand.vmem [shape: bf16[2,1,16,1280], index: 0, kind: input, shape index: {}]   ;;  %s2947_s1 = inlined_call_operand.vmem [shape: bf16[16,144], index: 1, kind: input, shape index: {}]   ;;  %s2948_s2 = inlined_call_operand.vmem [shape: f32[16,1], index: 2, kind: input, shape index: {}]   ;;  %s2949_s3 = inlined_call_operand.vmem [shape: bf16[2,16,1280], index: 3, kind: output, shape index: {}]  }
   0x1 LB: > { %s1589_s13 = sadd.s32 4294967295, %s2078_s12   ;;  %p1593_p0 = scmp.ge.s32.totalorder %s2078_s12, 1  ;;  %s2078_s12 = sphi %s2109_s12, %s13_s12  }
   0x2   : > { %p137_p1 = scmp.lt.s32.totalorder %s2078_s12, 3 }
   0x4   : > { %p138_p2 = pnand %p1593_p0, %p137_p1 }
   0x5   : > { %p161_p3 = scmp.lt.s32.totalorder (!%p138_p2), %s1589_s13, 1  ;;  %s2080_s18 = smov (!%p138_p2), 127   ;;  %v2166_v21 = vld [vmem:[%s2947_s1 + $0x4] ss:$8 sps:$4 sm:$0xff] (!%p138_p2)   ;;  %vm1245_vm0 = vcmask (!%p138_p2), 130048   ;;  %v312_v46 = vlaneseq (!%p138_p2) }
   0x6   : > { %141 = sbr.rel (%p138_p2) target bundleno = 523 (0x20b), region = 32  ;;  %s2081_s19 = smov (!%p138_p2), 126   ;;  %1608 = vmatprep.mubr.msk.bf16.mxu0 (!%p138_p2), %vm1245_vm0, %v2166_v21  ;;  %1609 = vmatprep.mubr.msk.bf16.mxu1 (!%p138_p2), %vm1245_vm0, %v2166_v21 }
   0x7   : > { %s2082_s20 = smov (!%p138_p2), 94   ;;  %s2083_s21 = smov (!%p138_p2), 93   ;;  %v2232_v50 = vand.u32 (!%p138_p2), 127, %v312_v46 }
   0x8   : > { %s2084_s22 = smov (!%p138_p2), 92   ;;  %s2085_s23 = smov (!%p138_p2), 60  }
   0x9   : > { %s2086_s24 = smov (!%p138_p2), 59   ;;  %s2087_s27 = smov (!%p138_p2), 58   ;;  %vm314_vm1 = vcmp.lt.s32.totalorder (!%p138_p2), %v2232_v50, 127  ;;  %vm425_vm2 = vcmp.lt.s32.totalorder (!%p138_p2), %v2232_v50, 126  ;;  %vm536_vm3 = vcmp.lt.s32.totalorder (!%p138_p2), %v2232_v50, 94  ;;  %vm647_vm4 = vcmp.lt.s32.totalorder (!%p138_p2), %v2232_v50, 93 }
   0xa   : > { %vm758_vm5 = vcmp.lt.s32.totalorder (!%p138_p2), %v2232_v50, 92  ;;  %vm869_vm6 = vcmp.lt.s32.totalorder (!%p138_p2), %v2232_v50, 60  ;;  %vm980_vm7 = vcmp.lt.s32.totalorder (!%p138_p2), %v2232_v50, 59  ;;  %vm1091_vm8 = vcmp.lt.s32.totalorder (!%p138_p2), %v2232_v50, 58 }
   0xd   : > { %s2963_s13 = smov (!%p161_p3, %s1589_s13), 1 }
   0xe   : > { %s1635_s14 = smul.u32 80, %s2963_s13 }
  0x10   : > { %s2125_s17 = scalar_lea.vmem %s2946_s0, %s1635_s14  ;;  %s2931_s11 = scalar_lea.vmem %s2949_s3, %s1635_s14 }
  0x11   : > { %v242_v0 = vld [vmem:[%s2125_s17] sm:$0xff]  ;;  %v247_v1 = vld [vmem:[%s2125_s17 + $0x28] sm:$0xff]  ;;  %v248_v7 = vld [vmem:[%s2125_s17 + $0x30] sm:$0xff] }
  0x12   : > { %v2130_v2 = vld [vmem:[%s2125_s17 + $0x8] sm:$0xff]  ;;  %v253_v3 = vunpack.c.h.bf16 %v242_v0  ;;  %v263_v4 = vunpack.c.h.bf16 %v247_v1  ;;  %v252_v5 = vunpack.c.l.bf16 %v242_v0  ;;  %v262_v6 = vunpack.c.l.bf16 %v247_v1  ;;  %v2157_v17 = vld [vmem:[%s2125_s17 + $0x10] sm:$0xff]  ;;  %v2160_v18 = vld [vmem:[%s2125_s17 + $0x38] sm:$0xff] }
  0x13   : > { %v254_v8 = vunpack.c.l.bf16 %v2130_v2  ;;  %v264_v9 = vunpack.c.l.bf16 %v248_v7  ;;  %v1597_v13 = vcombine.high %v242_v0, %v247_v1  ;;  %v1596_v14 = vcombine.low %v242_v0, %v247_v1  ;;  %v2057_v15 = vld [vmem:[%s2125_s17 + $0xc] ss:$40 sps:$4 sm:$0xff]   ;;  %v2059_v16 = vld [vmem:[%s2125_s17 + $0x8] ss:$40 sps:$4 sm:$0xff]   ;;  %v245_v26 = vld [vmem:[%s2125_s17 + $0x18] sm:$0xff] }
  0x14   : > { %v1653_v10 = vpack.i.bf16 %v263_v4, %v253_v3  ;;  %v1663_v11 = vpack.i.bf16 %v262_v6, %v252_v5  ;;  %1292 = vmatprep.subr.bf16.mxu1 %v2057_v15  ;;  %v255_v19 = vunpack.c.h.bf16 %v2130_v2  ;;  %v265_v20 = vunpack.c.h.bf16 %v248_v7  ;;  %v250_v27 = vld [vmem:[%s2125_s17 + $0x40] sm:$0xff]  ;;  %v251_v37 = vld [vmem:[%s2125_s17 + $0x48] sm:$0xff] }
  0x15   : > { %v1658_v12 = vpack.i.bf16 %v264_v9, %v254_v8  ;;  %1249 = vmatprep.subr.bf16.mxu0 %v1597_v13  ;;  %1293 = vmatpush1.bf16.msra.mxu1 %v2059_v16  ;;  %v1601_v22 = vcombine.high %v2157_v17, %v2160_v18  ;;  %v256_v23 = vunpack.c.l.bf16 %v2157_v17  ;;  %v266_v24 = vunpack.c.l.bf16 %v2160_v18  ;;  %v246_v36 = vld [vmem:[%s2125_s17 + $0x20] sm:$0xff] }
  0x16   : > { %1654 = vrot.lane.b32.xlu0 %v1653_v10, %s2080_s18  ;;  %1664 = vrot.lane.b32.xlu1 %v1663_v11, %s2080_s18  ;;  %v1600_v25 = vcombine.low %v2157_v17, %v2160_v18  ;;  %v1773_v28 = vpack.i.bf16 %v265_v20, %v255_v19  ;;  %v257_v29 = vunpack.c.h.bf16 %v2157_v17  ;;  %v267_v31 = vunpack.c.h.bf16 %v2160_v18 }
  0x17   : > { %1250 = vmatpush1.bf16.msra.mxu0 %v1596_v14  ;;  %v1778_v30 = vpack.i.bf16 %v266_v24, %v256_v23  ;;  %v258_v32 = vunpack.c.l.bf16 %v245_v26  ;;  %v268_v33 = vunpack.c.l.bf16 %v250_v27  ;;  %v259_v38 = vunpack.c.h.bf16 %v245_v26 }
  0x18   : > { %v1783_v34 = vpack.i.bf16 %v267_v31, %v257_v29  ;;  %v269_v39 = vunpack.c.h.bf16 %v250_v27  ;;  %v260_v40 = vunpack.c.l.bf16 %v246_v36  ;;  %v270_v41 = vunpack.c.l.bf16 %v251_v37 }
  0x19   : > { %v1788_v35 = vpack.i.bf16 %v268_v33, %v258_v32  ;;  %v261_v44 = vunpack.c.h.bf16 %v246_v36  ;;  %v271_v45 = vunpack.c.h.bf16 %v251_v37 }
  0x1a   : > { %1659 = vrot.lane.b32.xlu0 %v1658_v12, %s2080_s18  ;;  %1669 = vrot.lane.b32.xlu1 %v1653_v10, %s2081_s19  ;;  %v2220_v42 = vpack.i.bf16 %v269_v39, %v259_v38  ;;  %v2222_v43 = vpack.i.bf16 %v270_v41, %v260_v40 }
  0x1b   : > { %v2228_v47 = vpack.i.bf16 %v271_v45, %v261_v44 }
  0x1e   : > { %1674 = vrot.lane.b32.xlu0 %v1658_v12, %s2081_s19  ;;  %1679 = vrot.lane.b32.xlu1 %v1663_v11, %s2081_s19 }
  0x22   : > { %1684 = vrot.lane.b32.xlu0 %v1653_v10, %s2082_s20  ;;  %1689 = vrot.lane.b32.xlu1 %v1658_v12, %s2082_s20 }
  0x26   : > { %1694 = vrot.lane.b32.xlu0 %v1663_v11, %s2082_s20  ;;  %1699 = vrot.lane.b32.xlu1 %v1653_v10, %s2083_s21 }
  0x2a   : > { %1704 = vrot.lane.b32.xlu0 %v1658_v12, %s2083_s21  ;;  %1709 = vrot.lane.b32.xlu1 %v1663_v11, %s2083_s21 }
  0x2e   : > { %1714 = vrot.lane.b32.xlu0 %v1653_v10, %s2084_s22  ;;  %1719 = vrot.lane.b32.xlu1 %v1658_v12, %s2084_s22 }
  0x32   : > { %1724 = vrot.lane.b32.xlu0 %v1663_v11, %s2084_s22  ;;  %1729 = vrot.lane.b32.xlu1 %v1653_v10, %s2085_s23 }
  0x36   : > { %1734 = vrot.lane.b32.xlu0 %v1658_v12, %s2085_s23  ;;  %1739 = vrot.lane.b32.xlu1 %v1663_v11, %s2085_s23 }
  0x3a   : > { %1744 = vrot.lane.b32.xlu0 %v1653_v10, %s2086_s24  ;;  %1749 = vrot.lane.b32.xlu1 %v1658_v12, %s2086_s24 }
  0x3e   : > { %1754 = vrot.lane.b32.xlu0 %v1663_v11, %s2086_s24  ;;  %1759 = vrot.lane.b32.xlu1 %v1653_v10, %s2087_s27 }
  0x42   : > { %1764 = vrot.lane.b32.xlu0 %v1658_v12, %s2087_s27  ;;  %1769 = vrot.lane.b32.xlu1 %v1663_v11, %s2087_s27 }
  0x46   : > { %1774 = vrot.lane.b32.xlu0 %v1773_v28, %s2080_s18  ;;  %1779 = vrot.lane.b32.xlu1 %v1778_v30, %s2080_s18 }
  0x4a   : > { %1784 = vrot.lane.b32.xlu0 %v1783_v34, %s2080_s18  ;;  %1789 = vrot.lane.b32.xlu1 %v1788_v35, %s2080_s18 }
  0x4e   : > { %1794 = vrot.lane.b32.xlu0 %v1773_v28, %s2081_s19  ;;  %1799 = vrot.lane.b32.xlu1 %v1778_v30, %s2081_s19 }
  0x52   : > { %1804 = vrot.lane.b32.xlu0 %v1783_v34, %s2081_s19  ;;  %1809 = vrot.lane.b32.xlu1 %v1788_v35, %s2081_s19 }
  0x56   : > { %1814 = vrot.lane.b32.xlu0 %v1773_v28, %s2082_s20  ;;  %1819 = vrot.lane.b32.xlu1 %v1778_v30, %s2082_s20 }
  0x5a   : > { %1824 = vrot.lane.b32.xlu0 %v1783_v34, %s2082_s20  ;;  %1829 = vrot.lane.b32.xlu1 %v1788_v35, %s2082_s20 }
  0x5e   : > { %1834 = vrot.lane.b32.xlu0 %v1773_v28, %s2083_s21  ;;  %1839 = vrot.lane.b32.xlu1 %v1778_v30, %s2083_s21 }
  0x62   : > { %1844 = vrot.lane.b32.xlu0 %v1783_v34, %s2083_s21  ;;  %1849 = vrot.lane.b32.xlu1 %v1788_v35, %s2083_s21 }
  0x66   : > { %1854 = vrot.lane.b32.xlu0 %v1773_v28, %s2084_s22  ;;  %1859 = vrot.lane.b32.xlu1 %v1778_v30, %s2084_s22 }
  0x6a   : > { %1864 = vrot.lane.b32.xlu0 %v1783_v34, %s2084_s22  ;;  %1869 = vrot.lane.b32.xlu1 %v1788_v35, %s2084_s22 }
  0x6e   : > { %1874 = vrot.lane.b32.xlu0 %v1773_v28, %s2085_s23  ;;  %1879 = vrot.lane.b32.xlu1 %v1778_v30, %s2085_s23 }
  0x72   : > { %1884 = vrot.lane.b32.xlu0 %v1783_v34, %s2085_s23  ;;  %1889 = vrot.lane.b32.xlu1 %v1788_v35, %s2085_s23 }
  0x76   : > { %1894 = vrot.lane.b32.xlu0 %v1773_v28, %s2086_s24  ;;  %1899 = vrot.lane.b32.xlu1 %v1778_v30, %s2086_s24 }
  0x7a   : > { %1904 = vrot.lane.b32.xlu0 %v1783_v34, %s2086_s24  ;;  %1909 = vrot.lane.b32.xlu1 %v1788_v35, %s2086_s24 }
  0x7e   : > { %1914 = vrot.lane.b32.xlu0 %v1773_v28, %s2087_s27  ;;  %1919 = vrot.lane.b32.xlu1 %v1778_v30, %s2087_s27 }
  0x82   : > { %1924 = vrot.lane.b32.xlu0 %v1783_v34, %s2087_s27  ;;  %1929 = vrot.lane.b32.xlu1 %v1788_v35, %s2087_s27 }
  0x86   : > { %1934 = vrot.lane.b32.xlu0 %v2220_v42, %s2080_s18  ;;  %1939 = vrot.lane.b32.xlu1 %v2222_v43, %s2080_s18 }
  0x88   : > { %v1655_v48 = vpop.permute.xlu0 %1654  ;;  %v2230_v49 = vpop.permute.xlu1 %1664 }
  0x89   : > { %v1657_v51 = vunpack.i.h.bf16 %v1655_v48  ;;  %v1656_v52 = vunpack.i.l.bf16 %v1655_v48  ;;  %v1667_v53 = vunpack.i.h.bf16 %v2230_v49  ;;  %v1666_v54 = vunpack.i.l.bf16 %v2230_v49 }
  0x8a   : > { %1944 = vrot.lane.b32.xlu0 %v2228_v47, %s2080_s18  ;;  %1949 = vrot.lane.b32.xlu1 %v2220_v42, %s2081_s19 }
  0x8b   : > { %v331_v61 = vsel %vm314_vm1, %v1666_v54, %v1656_v52  ;;  %v332_v62 = vsel %vm314_vm1, %v1667_v53, %v1657_v51 }
  0x8c   : > { %v2240_v55 = vpop.permute.xlu0 %1659  ;;  %v1670_v56 = vpop.permute.xlu1 %1669  ;;  %v335_v8 = vpack.c.bf16 %v332_v62, %v331_v61 }
  0x8d   : > { %v1662_v57 = vunpack.i.h.bf16 %v2240_v55  ;;  %v1661_v58 = vunpack.i.l.bf16 %v2240_v55  ;;  %v1672_v63 = vunpack.i.h.bf16 %v1670_v56  ;;  %v1671_v0 = vunpack.i.l.bf16 %v1670_v56 }
  0x8e   : > { %1954 = vrot.lane.b32.xlu0 %v2222_v43, %s2081_s19  ;;  %1959 = vrot.lane.b32.xlu1 %v2228_v47, %s2081_s19 }
  0x8f   : > { %v329_v59 = vsel %vm314_vm1, %v1656_v52, %v1661_v58  ;;  %v330_v60 = vsel %vm314_vm1, %v1657_v51, %v1662_v57 }
  0x90   : > { %v2265_v1 = vpop.permute.xlu0 %1674  ;;  %v2267_v2 = vpop.permute.xlu1 %1679  ;;  %v336_v3 = vpack.c.bf16 %v330_v60, %v329_v59 }
  0x91   : > { %v1677_v4 = vunpack.i.h.bf16 %v2265_v1  ;;  %v1676_v5 = vunpack.i.l.bf16 %v2265_v1  ;;  %v1682_v6 = vunpack.i.h.bf16 %v2267_v2  ;;  %v1681_v7 = vunpack.i.l.bf16 %v2267_v2 }
  0x92   : > { %1964 = vrot.lane.b32.xlu0 %v2220_v42, %s2082_s20  ;;  %1969 = vrot.lane.b32.xlu1 %v2222_v43, %s2082_s20 }
  0x93   : > { %1251 = vmatprep.subr.bf16.mxu0 %v336_v3  ;;  %v440_v9 = vsel %vm425_vm2, %v1671_v0, %v1676_v5  ;;  %v441_v10 = vsel %vm425_vm2, %v1672_v63, %v1677_v4  ;;  %v442_v11 = vsel %vm425_vm2, %v1681_v7, %v1671_v0  ;;  %v443_v12 = vsel %vm425_vm2, %v1682_v6, %v1672_v63 }
  0x94   : > { %1252 = vmatpush1.bf16.msra.mxu0 %v335_v8  ;;  %v1685_v13 = vpop.permute.xlu0 %1684  ;;  %v2294_v14 = vpop.permute.xlu1 %1689  ;;  %v447_v15 = vpack.c.bf16 %v441_v10, %v440_v9  ;;  %v446_v16 = vpack.c.bf16 %v443_v12, %v442_v11 }
  0x95   : > { %v1687_v19 = vunpack.i.h.bf16 %v1685_v13  ;;  %v1686_v20 = vunpack.i.l.bf16 %v1685_v13  ;;  %v1692_v23 = vunpack.i.h.bf16 %v2294_v14  ;;  %v1691_v24 = vunpack.i.l.bf16 %v2294_v14 }
  0x96   : > { %1974 = vrot.lane.b32.xlu0 %v2228_v47, %s2082_s20  ;;  %1979 = vrot.lane.b32.xlu1 %v2220_v42, %s2083_s21 }
  0x97   : > { %1253 = vmatprep.subr.bf16.mxu0 %v447_v15  ;;  %v551_v26 = vsel %vm536_vm3, %v1686_v20, %v1691_v24  ;;  %v552_v27 = vsel %vm536_vm3, %v1687_v19, %v1692_v23 }
  0x98   : > { %1254 = vmatpush1.bf16.msra.mxu0 %v446_v16  ;;  %v2311_v28 = vpop.permute.xlu0 %1694  ;;  %v1700_v29 = vpop.permute.xlu1 %1699  ;;  %v558_v30 = vpack.c.bf16 %v552_v27, %v551_v26 }
  0x99   : > { %v1697_v31 = vunpack.i.h.bf16 %v2311_v28  ;;  %v1696_v32 = vunpack.i.l.bf16 %v2311_v28  ;;  %v1702_v35 = vunpack.i.h.bf16 %v1700_v29  ;;  %v1701_v36 = vunpack.i.l.bf16 %v1700_v29 }
  0x9a   : > { %1984 = vrot.lane.b32.xlu0 %v2222_v43, %s2083_s21  ;;  %1989 = vrot.lane.b32.xlu1 %v2228_v47, %s2083_s21 }
  0x9b   : > { %1255 = vmatprep.subr.bf16.mxu0 %v558_v30  ;;  %v553_v33 = vsel %vm536_vm3, %v1696_v32, %v1686_v20  ;;  %v554_v34 = vsel %vm536_vm3, %v1697_v31, %v1687_v19 }
  0x9c   : > { %v2327_v37 = vpop.permute.xlu0 %1704  ;;  %v2329_v38 = vpop.permute.xlu1 %1709  ;;  %v557_v39 = vpack.c.bf16 %v554_v34, %v553_v33 }
  0x9d   : > { %v1707_v40 = vunpack.i.h.bf16 %v2327_v37  ;;  %v1706_v41 = vunpack.i.l.bf16 %v2327_v37  ;;  %v1712_v44 = vunpack.i.h.bf16 %v2329_v38  ;;  %v1711_v45 = vunpack.i.l.bf16 %v2329_v38 }
  0x9e   : > { %1994 = vrot.lane.b32.xlu0 %v2220_v42, %s2084_s22  ;;  %1999 = vrot.lane.b32.xlu1 %v2222_v43, %s2084_s22 }
  0x9f   : > { %1256 = vmatpush1.bf16.msra.mxu0 %v557_v39  ;;  %v662_v46 = vsel %vm647_vm4, %v1701_v36, %v1706_v41  ;;  %v663_v48 = vsel %vm647_vm4, %v1702_v35, %v1707_v40  ;;  %v664_v51 = vsel %vm647_vm4, %v1711_v45, %v1701_v36  ;;  %v665_v52 = vsel %vm647_vm4, %v1712_v44, %v1702_v35 }
  0xa0   : > { %v1715_v56 = vpop.permute.xlu0 %1714  ;;  %v2356_v59 = vpop.permute.xlu1 %1719  ;;  %v669_v60 = vpack.c.bf16 %v663_v48, %v662_v46  ;;  %v668_v61 = vpack.c.bf16 %v665_v52, %v664_v51 }
  0xa1   : > { %v1717_v62 = vunpack.i.h.bf16 %v1715_v56  ;;  %v1716_v63 = vunpack.i.l.bf16 %v1715_v56  ;;  %v1722_v0 = vunpack.i.h.bf16 %v2356_v59  ;;  %v1721_v3 = vunpack.i.l.bf16 %v2356_v59 }
  0xa2   : > { %2004 = vrot.lane.b32.xlu0 %v2228_v47, %s2084_s22  ;;  %2009 = vrot.lane.b32.xlu1 %v2220_v42, %s2085_s23 }
  0xa3   : > { %1257 = vmatprep.subr.bf16.mxu0 %v669_v60  ;;  %v773_v8 = vsel %vm758_vm5, %v1716_v63, %v1721_v3  ;;  %v774_v9 = vsel %vm758_vm5, %v1717_v62, %v1722_v0 }
  0xa4   : > { %1258 = vmatpush1.bf16.msra.mxu0 %v668_v61  ;;  %v2373_v10 = vpop.permute.xlu0 %1724  ;;  %v1730_v11 = vpop.permute.xlu1 %1729  ;;  %v780_v12 = vpack.c.bf16 %v774_v9, %v773_v8 }
  0xa5   : > { %v2954_v13 = vunpack.i.h.bf16 %v2373_v10  ;;  %v2955_v15 = vunpack.i.l.bf16 %v2373_v10  ;;  %v1732_v20 = vunpack.i.h.bf16 %v1730_v11  ;;  %v1731_v26 = vunpack.i.l.bf16 %v1730_v11 }
  0xa6   : > { %2014 = vrot.lane.b32.xlu0 %v2222_v43, %s2085_s23  ;;  %2019 = vrot.lane.b32.xlu1 %v2228_v47, %s2085_s23 }
  0xa7   : > { %1259 = vmatprep.subr.bf16.mxu0 %v780_v12  ;;  %v775_v16 = vsel %vm758_vm5, %v2955_v15, %v1716_v63  ;;  %v776_v19 = vsel %vm758_vm5, %v2954_v13, %v1717_v62  ;;  %v2485_v15 = vld [vmem:[%s2947_s1] ss:$8 sps:$4 sm:$0xff]  }
  0xa8   : > { %v2389_v27 = vpop.permute.xlu0 %1734  ;;  %v2391_v29 = vpop.permute.xlu1 %1739  ;;  %v779_v30 = vpack.c.bf16 %v776_v19, %v775_v16 }
  0xa9   : > { %v1737_v33 = vunpack.i.h.bf16 %v2389_v27  ;;  %v1736_v34 = vunpack.i.l.bf16 %v2389_v27  ;;  %v2952_v35 = vunpack.i.h.bf16 %v2391_v29  ;;  %v2953_v36 = vunpack.i.l.bf16 %v2391_v29 }
  0xaa   : > { %2024 = vrot.lane.b32.xlu0 %v2220_v42, %s2086_s24  ;;  %2029 = vrot.lane.b32.xlu1 %v2222_v43, %s2086_s24 }
  0xab   : > { %1260 = vmatpush1.bf16.msra.mxu0 %v779_v30  ;;  %v884_v39 = vsel %vm869_vm6, %v1731_v26, %v1736_v34  ;;  %v885_v46 = vsel %vm869_vm6, %v1732_v20, %v1737_v33  ;;  %v886_v48 = vsel %vm869_vm6, %v2953_v36, %v1731_v26  ;;  %v887_v51 = vsel %vm869_vm6, %v2952_v35, %v1732_v20 }
  0xac   : > { %v1745_v52 = vpop.permute.xlu0 %1744  ;;  %v2418_v56 = vpop.permute.xlu1 %1749  ;;  %v891_v60 = vpack.c.bf16 %v885_v46, %v884_v39  ;;  %v890_v61 = vpack.c.bf16 %v887_v51, %v886_v48  ;;  %v2088_v30 = vmov 0   ;;  %v1224_v48 = vld [vmem:[%s2948_s2] sm:$0xff] }
  0xad   : > { %v1747_v62 = vunpack.i.h.bf16 %v1745_v52  ;;  %v1746_v63 = vunpack.i.l.bf16 %v1745_v52  ;;  %v1752_v8 = vunpack.i.h.bf16 %v2418_v56  ;;  %v1751_v9 = vunpack.i.l.bf16 %v2418_v56  ;;  %2054 = vset.pattern.permute.xlu1 %v2088_v30  ;;  %2053 = vset.pattern.permute.xlu0 %v2088_v30 }
  0xae   : > { %2034 = vrot.lane.b32.xlu0 %v2228_v47, %s2086_s24  ;;  %2039 = vrot.lane.b32.xlu1 %v2220_v42, %s2087_s27 }
  0xaf   : > { %1261 = vmatprep.subr.bf16.mxu0 %v891_v60  ;;  %v995_v11 = vsel %vm980_vm7, %v1746_v63, %v1751_v9  ;;  %v996_v12 = vsel %vm980_vm7, %v1747_v62, %v1752_v8 }
  0xb0   : > { %1262 = vmatpush1.bf16.msra.mxu0 %v890_v61  ;;  %v2435_v16 = vpop.permute.xlu0 %1754  ;;  %v1760_v19 = vpop.permute.xlu1 %1759  ;;  %v1002_v20 = vpack.c.bf16 %v996_v12, %v995_v11  ;;  %v1225_v61 = vld [vmem:[%s2948_s2 + $0x8] sm:$0xff] }
  0xb1   : > { %v2950_v26 = vunpack.i.h.bf16 %v2435_v16  ;;  %v2951_v42 = vunpack.i.l.bf16 %v2435_v16  ;;  %v1762_v51 = vunpack.i.h.bf16 %v1760_v19 }
  0xb2   : > { %2044 = vrot.lane.b32.xlu0 %v2222_v43, %s2087_s27  ;;  %2049 = vrot.lane.b32.xlu1 %v2228_v47, %s2087_s27  ;;  %v1761_v43 = vunpack.i.l.bf16 %v1760_v19 }
  0xb3   : > { %1263 = vmatprep.subr.bf16.mxu0 %v1002_v20  ;;  %v997_v39 = vsel %vm980_vm7, %v2951_v42, %v1746_v63  ;;  %v998_v46 = vsel %vm980_vm7, %v2950_v26, %v1747_v62 }
  0xb4   : > { %v2454_v52 = vpop.permute.xlu0 %1764  ;;  %v2456_v47 = vpop.permute.xlu1 %1769  ;;  %v1001_v60 = vpack.c.bf16 %v998_v46, %v997_v39 }
  0xb5   : > { %v1767_v63 = vunpack.i.h.bf16 %v2454_v52  ;;  %v1766_v62 = vunpack.i.l.bf16 %v2454_v52  ;;  %v1772_v11 = vunpack.i.h.bf16 %v2456_v47  ;;  %v1771_v12 = vunpack.i.l.bf16 %v2456_v47 }
  0xb6   : > { %1264 = vmatpush1.bf16.msra.mxu0 %v1001_v60  ;;  %1228 = vperm.xlu0 %2053, %v1224_v48  }
  0xb7   : > { %v1106_v19 = vsel %vm1091_vm8, %v1761_v43, %v1766_v62  ;;  %v1107_v20 = vsel %vm1091_vm8, %v1762_v51, %v1767_v63  ;;  %v1108_v30 = vsel %vm1091_vm8, %v1771_v12, %v1761_v43  ;;  %v1109_v39 = vsel %vm1091_vm8, %v1772_v11, %v1762_v51  ;;  %1233 = vperm.xlu1 %2054, %v1225_v61  }
  0xb8   : > { %v1775_v46 = vpop.permute.xlu0 %1774  ;;  %v1780_v48 = vpop.permute.xlu1 %1779  ;;  %v1113_v60 = vpack.c.bf16 %v1107_v20, %v1106_v19  ;;  %v1112_v26 = vpack.c.bf16 %v1109_v39, %v1108_v30 }
  0xb9   : > { %v1777_v42 = vunpack.i.h.bf16 %v1775_v46  ;;  %v1776_v35 = vunpack.i.l.bf16 %v1775_v46  ;;  %v1782_v36 = vunpack.i.h.bf16 %v1780_v48  ;;  %v1781_v13 = vunpack.i.l.bf16 %v1780_v48 }
  0xba   : > { %1265 = vmatprep.subr.bf16.mxu0 %v1113_v60 }
  0xbb   : > { %1266 = vmatpush1.bf16.msra.mxu0 %v1112_v26  ;;  %v325_v43 = vsel %vm314_vm1, %v1776_v35, %v1781_v13  ;;  %v326_v51 = vsel %vm314_vm1, %v1777_v42, %v1782_v36  ;;  %v327_v61 = vsel %vm314_vm1, %v1661_v58, %v1776_v35  ;;  %v328_v19 = vsel %vm314_vm1, %v1662_v57, %v1777_v42 }
  0xbc   : > { %v1785_v20 = vpop.permute.xlu0 %1784  ;;  %v2499_v30 = vpop.permute.xlu1 %1789  ;;  %v338_v26 = vpack.c.bf16 %v326_v51, %v325_v43  ;;  %1335 = vmatprep.subr.bf16.mxu0 %v1601_v22  ;;  %v337_v39 = vpack.c.bf16 %v328_v19, %v327_v61 }
  0xbd   : > { %v1787_v46 = vunpack.i.h.bf16 %v1785_v20  ;;  %v1786_v48 = vunpack.i.l.bf16 %v1785_v20  ;;  %v1792_v60 = vunpack.i.h.bf16 %v2499_v30  ;;  %v1791_v58 = vunpack.i.l.bf16 %v2499_v30 }
  0xbe   : > { %1294 = vmatprep.subr.bf16.mxu1 %v338_v26  ;;  %1282 = vmatmul.mubr.bf16.vlgmr.msra.gmra.mrb[0].mxu0 %v2485_v15 }
  0xbf   : > { %v323_v55 = vsel %vm314_vm1, %v1781_v13, %v1786_v48  ;;  %v324_v57 = vsel %vm314_vm1, %v1782_v36, %v1787_v46  ;;  %1295 = vmatpush1.bf16.msra.mxu1 %v337_v39  ;;  %1336 = vmatpush1.bf16.msra.mxu0 %v1600_v25  ;;  %v321_v22 = vsel %vm314_vm1, %v1786_v48, %v1791_v58 }
  0xc0   : > { %v339_v35 = vpack.c.bf16 %v324_v57, %v323_v55  ;;  %v1795_v42 = vpop.permute.xlu0 %1794  ;;  %v1800_v43 = vpop.permute.xlu1 %1799  ;;  %v322_v13 = vsel %vm314_vm1, %v1787_v46, %v1792_v60  ;;  %1610 = vmatprep.mubr.msk.bf16.mxu0 %vm1245_vm0, %v2166_v21 }
  0xc1   : > { %v1797_v36 = vunpack.i.h.bf16 %v1795_v42  ;;  %v1796_v51 = vunpack.i.l.bf16 %v1795_v42  ;;  %v1802_v17 = vunpack.i.h.bf16 %v1800_v43  ;;  %v1801_v18 = vunpack.i.l.bf16 %v1800_v43 }
  0xc2   : > { %v340_v25 = vpack.c.bf16 %v322_v13, %v321_v22 }
  0xc3   : > { %v436_v61 = vsel %vm425_vm2, %v1796_v51, %v1801_v18  ;;  %v437_v19 = vsel %vm425_vm2, %v1797_v36, %v1802_v17  ;;  %v438_v20 = vsel %vm425_vm2, %v1676_v5, %v1796_v51  ;;  %v439_v26 = vsel %vm425_vm2, %v1677_v4, %v1797_v36 }
  0xc4   : > { %1337 = vmatprep.subr.bf16.mxu0 %v340_v25  ;;  %v1805_v39 = vpop.permute.xlu0 %1804  ;;  %v2536_v46 = vpop.permute.xlu1 %1809  ;;  %v449_v48 = vpack.c.bf16 %v437_v19, %v436_v61  ;;  %v448_v55 = vpack.c.bf16 %v439_v26, %v438_v20 }
  0xc5   : > { %1338 = vmatpush1.bf16.msra.mxu0 %v339_v35  ;;  %v1807_v57 = vunpack.i.h.bf16 %v1805_v39  ;;  %v1806_v22 = vunpack.i.l.bf16 %v1805_v39  ;;  %v1812_v42 = vunpack.i.h.bf16 %v2536_v46  ;;  %v1811_v43 = vunpack.i.l.bf16 %v2536_v46 }
  0xc6   : > { %1296 = vmatprep.subr.bf16.mxu1 %v449_v48 }
  0xc7   : > { %v434_v1 = vsel %vm425_vm2, %v1801_v18, %v1806_v22  ;;  %v435_v4 = vsel %vm425_vm2, %v1802_v17, %v1807_v57  ;;  %1297 = vmatpush1.bf16.msra.mxu1 %v448_v55  ;;  %v432_v5 = vsel %vm425_vm2, %v1806_v22, %v1811_v43  ;;  %v433_v35 = vsel %vm425_vm2, %v1807_v57, %v1812_v42 }
  0xc8   : > { %v450_v13 = vpack.c.bf16 %v435_v4, %v434_v1  ;;  %v1815_v36 = vpop.permute.xlu0 %1814  ;;  %v1820_v51 = vpop.permute.xlu1 %1819  ;;  %v451_v25 = vpack.c.bf16 %v433_v35, %v432_v5 }
  0xc9   : > { %v1817_v61 = vunpack.i.h.bf16 %v1815_v36  ;;  %v1816_v18 = vunpack.i.l.bf16 %v1815_v36  ;;  %v1822_v19 = vunpack.i.h.bf16 %v1820_v51  ;;  %v1821_v20 = vunpack.i.l.bf16 %v1820_v51 }
  0xca   : > { %1339 = vmatprep.subr.bf16.mxu0 %v451_v25 }
  0xcb   : > { %1340 = vmatpush1.bf16.msra.mxu0 %v450_v13  ;;  %v547_v17 = vsel %vm536_vm3, %v1816_v18, %v1821_v20  ;;  %v548_v26 = vsel %vm536_vm3, %v1817_v61, %v1822_v19  ;;  %v549_v39 = vsel %vm536_vm3, %v1691_v24, %v1816_v18  ;;  %v550_v48 = vsel %vm536_vm3, %v1692_v23, %v1817_v61 }
  0xcc   : > { %v1825_v55 = vpop.permute.xlu0 %1824  ;;  %v2564_v57 = vpop.permute.xlu1 %1829  ;;  %v560_v22 = vpack.c.bf16 %v548_v26, %v547_v17  ;;  %v559_v1 = vpack.c.bf16 %v550_v48, %v549_v39 }
  0xcd   : > { %v1827_v4 = vunpack.i.h.bf16 %v1825_v55  ;;  %v1826_v5 = vunpack.i.l.bf16 %v1825_v55  ;;  %v1832_v35 = vunpack.i.h.bf16 %v2564_v57  ;;  %v1831_v13 = vunpack.i.l.bf16 %v2564_v57 }
  0xce   : > { %1298 = vmatprep.subr.bf16.mxu1 %v560_v22 }
  0xcf   : > { %v545_v24 = vsel %vm536_vm3, %v1821_v20, %v1826_v5  ;;  %v546_v14 = vsel %vm536_vm3, %v1822_v19, %v1827_v4  ;;  %1299 = vmatpush1.bf16.msra.mxu1 %v559_v1  ;;  %v543_v23 = vsel %vm536_vm3, %v1826_v5, %v1831_v13  ;;  %v544_v36 = vsel %vm536_vm3, %v1827_v4, %v1832_v35 }
  0xd0   : > { %v561_v51 = vpack.c.bf16 %v546_v14, %v545_v24  ;;  %v1835_v25 = vpop.permute.xlu0 %1834  ;;  %v1840_v61 = vpop.permute.xlu1 %1839  ;;  %v562_v18 = vpack.c.bf16 %v544_v36, %v543_v23 }
  0xd1   : > { %v1837_v17 = vunpack.i.h.bf16 %v1835_v25  ;;  %v1836_v20 = vunpack.i.l.bf16 %v1835_v25  ;;  %v1842_v26 = vunpack.i.h.bf16 %v1840_v61  ;;  %v1841_v39 = vunpack.i.l.bf16 %v1840_v61 }
  0xd2   : > { %1341 = vmatprep.subr.bf16.mxu0 %v562_v18 }
  0xd3   : > { %1342 = vmatpush1.bf16.msra.mxu0 %v561_v51  ;;  %v658_v19 = vsel %vm647_vm4, %v1836_v20, %v1841_v39  ;;  %v659_v48 = vsel %vm647_vm4, %v1837_v17, %v1842_v26  ;;  %v660_v55 = vsel %vm647_vm4, %v1706_v41, %v1836_v20  ;;  %v661_v22 = vsel %vm647_vm4, %v1707_v40, %v1837_v17 }
  0xd4   : > { %v1845_v1 = vpop.permute.xlu0 %1844  ;;  %v2592_v4 = vpop.permute.xlu1 %1849  ;;  %v671_v5 = vpack.c.bf16 %v659_v48, %v658_v19  ;;  %v670_v24 = vpack.c.bf16 %v661_v22, %v660_v55 }
  0xd5   : > { %v1847_v14 = vunpack.i.h.bf16 %v1845_v1  ;;  %v1846_v23 = vunpack.i.l.bf16 %v1845_v1  ;;  %v1852_v36 = vunpack.i.h.bf16 %v2592_v4  ;;  %v1851_v51 = vunpack.i.l.bf16 %v2592_v4 }
  0xd6   : > { %1300 = vmatprep.subr.bf16.mxu1 %v671_v5 }
  0xd7   : > { %v656_v41 = vsel %vm647_vm4, %v1841_v39, %v1846_v23  ;;  %v657_v37 = vsel %vm647_vm4, %v1842_v26, %v1847_v14  ;;  %1301 = vmatpush1.bf16.msra.mxu1 %v670_v24  ;;  %v654_v40 = vsel %vm647_vm4, %v1846_v23, %v1851_v51  ;;  %v655_v25 = vsel %vm647_vm4, %v1847_v14, %v1852_v36 }
  0xd8   : > { %v672_v61 = vpack.c.bf16 %v657_v37, %v656_v41  ;;  %v1855_v18 = vpop.permute.xlu0 %1854  ;;  %v1860_v17 = vpop.permute.xlu1 %1859  ;;  %v673_v20 = vpack.c.bf16 %v655_v25, %v654_v40 }
  0xd9   : > { %v1857_v19 = vunpack.i.h.bf16 %v1855_v18  ;;  %v1856_v39 = vunpack.i.l.bf16 %v1855_v18  ;;  %v1862_v48 = vunpack.i.h.bf16 %v1860_v17  ;;  %v1861_v55 = vunpack.i.l.bf16 %v1860_v17 }
  0xda   : > { %1343 = vmatprep.subr.bf16.mxu0 %v673_v20 }
  0xdb   : > { %1344 = vmatpush1.bf16.msra.mxu0 %v672_v61  ;;  %v769_v26 = vsel %vm758_vm5, %v1856_v39, %v1861_v55  ;;  %v770_v22 = vsel %vm758_vm5, %v1857_v19, %v1862_v48  ;;  %v771_v1 = vsel %vm758_vm5, %v1721_v3, %v1856_v39  ;;  %v772_v5 = vsel %vm758_vm5, %v1722_v0, %v1857_v19 }
  0xdc   : > { %v1865_v24 = vpop.permute.xlu0 %1864  ;;  %v2620_v14 = vpop.permute.xlu1 %1869  ;;  %v782_v23 = vpack.c.bf16 %v770_v22, %v769_v26  ;;  %v781_v41 = vpack.c.bf16 %v772_v5, %v771_v1 }
  0xdd   : > { %v1867_v37 = vunpack.i.h.bf16 %v1865_v24  ;;  %v1866_v40 = vunpack.i.l.bf16 %v1865_v24  ;;  %v1872_v25 = vunpack.i.h.bf16 %v2620_v14  ;;  %v1871_v61 = vunpack.i.l.bf16 %v2620_v14 }
  0xde   : > { %1302 = vmatprep.subr.bf16.mxu1 %v782_v23 }
  0xdf   : > { %v767_v3 = vsel %vm758_vm5, %v1861_v55, %v1866_v40  ;;  %v768_v59 = vsel %vm758_vm5, %v1862_v48, %v1867_v37  ;;  %1303 = vmatpush1.bf16.msra.mxu1 %v781_v41  ;;  %v765_v0 = vsel %vm758_vm5, %v1866_v40, %v1871_v61  ;;  %v766_v18 = vsel %vm758_vm5, %v1867_v37, %v1872_v25 }
  0xe0   : > { %v783_v17 = vpack.c.bf16 %v768_v59, %v767_v3  ;;  %v1875_v20 = vpop.permute.xlu0 %1874  ;;  %v1880_v19 = vpop.permute.xlu1 %1879  ;;  %v784_v39 = vpack.c.bf16 %v766_v18, %v765_v0 }
  0xe1   : > { %v1877_v26 = vunpack.i.h.bf16 %v1875_v20  ;;  %v1876_v55 = vunpack.i.l.bf16 %v1875_v20  ;;  %v1882_v22 = vunpack.i.h.bf16 %v1880_v19  ;;  %v1881_v1 = vunpack.i.l.bf16 %v1880_v19 }
  0xe2   : > { %1345 = vmatprep.subr.bf16.mxu0 %v784_v39 }
  0xe3   : > { %1346 = vmatpush1.bf16.msra.mxu0 %v783_v17  ;;  %v880_v48 = vsel %vm869_vm6, %v1876_v55, %v1881_v1  ;;  %v881_v5 = vsel %vm869_vm6, %v1877_v26, %v1882_v22  ;;  %v882_v24 = vsel %vm869_vm6, %v1736_v34, %v1876_v55  ;;  %v883_v23 = vsel %vm869_vm6, %v1737_v33, %v1877_v26 }
  0xe4   : > { %v1885_v41 = vpop.permute.xlu0 %1884  ;;  %v2648_v37 = vpop.permute.xlu1 %1889  ;;  %v893_v40 = vpack.c.bf16 %v881_v5, %v880_v48  ;;  %v892_v3 = vpack.c.bf16 %v883_v23, %v882_v24 }
  0xe5   : > { %v1887_v59 = vunpack.i.h.bf16 %v1885_v41  ;;  %v1886_v0 = vunpack.i.l.bf16 %v1885_v41  ;;  %v1892_v18 = vunpack.i.h.bf16 %v2648_v37  ;;  %v1891_v17 = vunpack.i.l.bf16 %v2648_v37 }
  0xe6   : > { %1304 = vmatprep.subr.bf16.mxu1 %v893_v40 }
  0xe7   : > { %v878_v34 = vsel %vm869_vm6, %v1881_v1, %v1886_v0  ;;  %v879_v27 = vsel %vm869_vm6, %v1882_v22, %v1887_v59  ;;  %1305 = vmatpush1.bf16.msra.mxu1 %v892_v3  ;;  %v876_v33 = vsel %vm869_vm6, %v1886_v0, %v1891_v17  ;;  %v877_v20 = vsel %vm869_vm6, %v1887_v59, %v1892_v18 }
  0xe8   : > { %v894_v19 = vpack.c.bf16 %v879_v27, %v878_v34  ;;  %v1895_v39 = vpop.permute.xlu0 %1894  ;;  %v1900_v26 = vpop.permute.xlu1 %1899  ;;  %v895_v55 = vpack.c.bf16 %v877_v20, %v876_v33 }
  0xe9   : > { %v1897_v48 = vunpack.i.h.bf16 %v1895_v39  ;;  %v1896_v1 = vunpack.i.l.bf16 %v1895_v39  ;;  %v1902_v5 = vunpack.i.h.bf16 %v1900_v26  ;;  %v1901_v24 = vunpack.i.l.bf16 %v1900_v26 }
  0xea   : > { %1347 = vmatprep.subr.bf16.mxu0 %v895_v55 }
  0xeb   : > { %1348 = vmatpush1.bf16.msra.mxu0 %v894_v19  ;;  %v991_v22 = vsel %vm980_vm7, %v1896_v1, %v1901_v24  ;;  %v992_v23 = vsel %vm980_vm7, %v1897_v48, %v1902_v5  ;;  %v993_v41 = vsel %vm980_vm7, %v1751_v9, %v1896_v1  ;;  %v994_v40 = vsel %vm980_vm7, %v1752_v8, %v1897_v48 }
  0xec   : > { %v1905_v3 = vpop.permute.xlu0 %1904  ;;  %v2676_v59 = vpop.permute.xlu1 %1909  ;;  %v1004_v0 = vpack.c.bf16 %v992_v23, %v991_v22  ;;  %v1003_v34 = vpack.c.bf16 %v994_v40, %v993_v41 }
  0xed   : > { %v1907_v27 = vunpack.i.h.bf16 %v1905_v3  ;;  %v1906_v33 = vunpack.i.l.bf16 %v1905_v3  ;;  %v1912_v20 = vunpack.i.h.bf16 %v2676_v59  ;;  %v1911_v19 = vunpack.i.l.bf16 %v2676_v59 }
  0xee   : > { %1306 = vmatprep.subr.bf16.mxu1 %v1004_v0 }
  0xef   : > { %v989_v9 = vsel %vm980_vm7, %v1901_v24, %v1906_v33  ;;  %v990_v56 = vsel %vm980_vm7, %v1902_v5, %v1907_v27  ;;  %1307 = vmatpush1.bf16.msra.mxu1 %v1003_v34  ;;  %v987_v8 = vsel %vm980_vm7, %v1906_v33, %v1911_v19  ;;  %v988_v39 = vsel %vm980_vm7, %v1907_v27, %v1912_v20 }
  0xf0   : > { %v1005_v26 = vpack.c.bf16 %v990_v56, %v989_v9  ;;  %v1915_v55 = vpop.permute.xlu0 %1914  ;;  %v1920_v48 = vpop.permute.xlu1 %1919  ;;  %v1006_v1 = vpack.c.bf16 %v988_v39, %v987_v8  ;;  %v2067_v56 = vld [vmem:[%s2125_s17 + $0x1c] ss:$40 sps:$4 sm:$0xff]  }
  0xf1   : > { %v1917_v24 = vunpack.i.h.bf16 %v1915_v55  ;;  %v1916_v22 = vunpack.i.l.bf16 %v1915_v55  ;;  %v1922_v23 = vunpack.i.h.bf16 %v1920_v48  ;;  %v1921_v5 = vunpack.i.l.bf16 %v1920_v48 }
  0xf2   : > { %1349 = vmatprep.subr.bf16.mxu0 %v1006_v1  ;;  %v2065_v1 = vld [vmem:[%s2125_s17 + $0x18] ss:$40 sps:$4 sm:$0xff]  }
  0xf3   : > { %1350 = vmatpush1.bf16.msra.mxu0 %v1005_v26  ;;  %v1102_v41 = vsel %vm1091_vm8, %v1916_v22, %v1921_v5  ;;  %v1103_v40 = vsel %vm1091_vm8, %v1917_v24, %v1922_v23  ;;  %v1104_v3 = vsel %vm1091_vm8, %v1766_v62, %v1916_v22  ;;  %v1105_v0 = vsel %vm1091_vm8, %v1767_v63, %v1917_v24 }
  0xf4   : > { %v1925_v34 = vpop.permute.xlu0 %1924  ;;  %v2704_v27 = vpop.permute.xlu1 %1929  ;;  %v1115_v33 = vpack.c.bf16 %v1103_v40, %v1102_v41  ;;  %v1114_v9 = vpack.c.bf16 %v1105_v0, %v1104_v3  ;;  %v2070_v40 = vld [vmem:[%s2125_s17 + $0x24] ss:$40 sps:$4 sm:$0xff]  }
  0xf5   : > { %v1927_v8 = vunpack.i.h.bf16 %v1925_v34  ;;  %v1926_v39 = vunpack.i.l.bf16 %v1925_v34  ;;  %v1932_v26 = vunpack.i.h.bf16 %v2704_v27  ;;  %v1931_v55 = vunpack.i.l.bf16 %v2704_v27 }
  0xf6   : > { %1308 = vmatprep.subr.bf16.mxu1 %v1115_v33 }
  0xf7   : > { %v1100_v52 = vsel %vm1091_vm8, %v1921_v5, %v1926_v39  ;;  %v1101_v63 = vsel %vm1091_vm8, %v1922_v23, %v1927_v8  ;;  %1309 = vmatpush1.bf16.msra.mxu1 %v1114_v9  ;;  %v1098_v62 = vsel %vm1091_vm8, %v1926_v39, %v1931_v55  ;;  %v1099_v48 = vsel %vm1091_vm8, %v1927_v8, %v1932_v26  ;;  %v2068_v8 = vld [vmem:[%s2125_s17 + $0x20] ss:$40 sps:$4 sm:$0xff]  }
  0xf8   : > { %v1116_v24 = vpack.c.bf16 %v1101_v63, %v1100_v52  ;;  %v1935_v22 = vpop.permute.xlu0 %1934  ;;  %v1940_v41 = vpop.permute.xlu1 %1939  ;;  %v1117_v5 = vpack.c.bf16 %v1099_v48, %v1098_v62  ;;  %1378 = vmatprep.subr.bf16.mxu1 %v2067_v56 }
  0xf9   : > { %v1937_v23 = vunpack.i.h.bf16 %v1935_v22  ;;  %v1936_v3 = vunpack.i.l.bf16 %v1935_v22  ;;  %v1942_v0 = vunpack.i.h.bf16 %v1940_v41  ;;  %v1941_v34 = vunpack.i.l.bf16 %v1940_v41 }
  0xfa   : > { %1351 = vmatprep.subr.bf16.mxu0 %v1117_v5  ;;  %1325 = vmatmul.mubr.bf16.vlgmr.msra.gmra.mrb[0].mxu1 %v2485_v15 }
  0xfb   : > { %v319_v33 = vsel %vm314_vm1, %v1791_v58, %v1936_v3  ;;  %v320_v9 = vsel %vm314_vm1, %v1792_v60, %v1937_v23  ;;  %1352 = vmatpush1.bf16.msra.mxu0 %v1116_v24  ;;  %1379 = vmatpush1.bf16.msra.mxu1 %v2065_v1  ;;  %v317_v56 = vsel %vm314_vm1, %v1936_v3, %v1941_v34 }
  0xfc   : > { %v341_v39 = vpack.c.bf16 %v320_v9, %v319_v33  ;;  %v1945_v52 = vpop.permute.xlu0 %1944  ;;  %v1950_v63 = vpop.permute.xlu1 %1949  ;;  %v318_v62 = vsel %vm314_vm1, %v1937_v23, %v1942_v0  ;;  %1421 = vmatprep.subr.bf16.mxu0 %v2070_v40  ;;  %1611 = vmatprep.mubr.msk.bf16.mxu1 %vm1245_vm0, %v2166_v21  ;;  %v2071_v33 = vld [vmem:[%s2947_s1 + $0x4] ss:$8 sps:$4 sm:$0xff]  }
  0xfd   : > { %v1947_v30 = vunpack.i.h.bf16 %v1945_v52  ;;  %v1946_v58 = vunpack.i.l.bf16 %v1945_v52  ;;  %v1952_v48 = vunpack.i.h.bf16 %v1950_v63  ;;  %v1951_v60 = vunpack.i.l.bf16 %v1950_v63 }
  0xfe   : > { %v342_v24 = vpack.c.bf16 %v318_v62, %v317_v56  ;;  %1368 = vmatmul.mubr.bf16.vlgmr.msra.gmra.mrb[4].mxu0 %v2485_v15 }
  0xff   : > { %v315_v1 = vsel %vm314_vm1, %v1941_v34, %v1946_v58  ;;  %v316_v22 = vsel %vm314_vm1, %v1942_v0, %v1947_v30  ;;  %v430_v41 = vsel %vm425_vm2, %v1811_v43, %v1951_v60  ;;  %v431_v21 = vsel %vm425_vm2, %v1812_v42, %v1952_v48  ;;  %1422 = vmatpush1.bf16.msra.mxu0 %v2068_v8 }
 0x100   : > { %v343_v5 = vpack.c.bf16 %v316_v22, %v315_v1  ;;  %1380 = vmatprep.subr.bf16.mxu1 %v342_v24  ;;  %v1955_v40 = vpop.permute.xlu0 %1954  ;;  %v1960_v23 = vpop.permute.xlu1 %1959  ;;  %v333_v3 = vsel %vm314_vm1, %v1946_v58, %v1666_v54  ;;  %v334_v43 = vsel %vm314_vm1, %v1947_v30, %v1667_v53  ;;  %1612 = vmatprep.mubr.msk.bf16.mxu0 %vm1245_vm0, %v2071_v33 }
 0x101   : > { %1381 = vmatpush1.bf16.msra.mxu1 %v341_v39  ;;  %v1957_v46 = vunpack.i.h.bf16 %v1955_v40  ;;  %v1956_v0 = vunpack.i.l.bf16 %v1955_v40  ;;  %v1962_v34 = vunpack.i.h.bf16 %v1960_v23  ;;  %v1961_v42 = vunpack.i.l.bf16 %v1960_v23 }
 0x102   : > { %v452_v9 = vpack.c.bf16 %v431_v21, %v430_v41  ;;  %v344_v56 = vpack.c.bf16 %v334_v43, %v333_v3 }
 0x103   : > { %v427_v54 = vsel %vm425_vm2, %v1957_v46, %v1962_v34  ;;  %v426_v49 = vsel %vm425_vm2, %v1956_v0, %v1961_v42  ;;  %v428_v53 = vsel %vm425_vm2, %v1951_v60, %v1956_v0  ;;  %v429_v8 = vsel %vm425_vm2, %v1952_v48, %v1957_v46 }
 0x104   : > { %v454_v39 = vpack.c.bf16 %v427_v54, %v426_v49  ;;  %1423 = vmatprep.subr.bf16.mxu0 %v344_v56  ;;  %v1965_v52 = vpop.permute.xlu0 %1964  ;;  %v1970_v63 = vpop.permute.xlu1 %1969  ;;  %v453_v62 = vpack.c.bf16 %v429_v8, %v428_v53  ;;  %v444_v30 = vsel %vm425_vm2, %v1961_v42, %v1681_v7  ;;  %v445_v58 = vsel %vm425_vm2, %v1962_v34, %v1682_v6 }
 0x105   : > { %1424 = vmatpush1.bf16.msra.mxu0 %v343_v5  ;;  %v1967_v60 = vunpack.i.h.bf16 %v1965_v52  ;;  %v1966_v24 = vunpack.i.l.bf16 %v1965_v52  ;;  %v1972_v1 = vunpack.i.h.bf16 %v1970_v63  ;;  %v1971_v48 = vunpack.i.l.bf16 %v1970_v63 }
 0x106   : > { %1382 = vmatprep.subr.bf16.mxu1 %v453_v62  ;;  %v455_v22 = vpack.c.bf16 %v445_v58, %v444_v30 }
 0x107   : > { %v541_v41 = vsel %vm536_vm3, %v1831_v13, %v1966_v24  ;;  %v542_v2 = vsel %vm536_vm3, %v1832_v35, %v1967_v60  ;;  %1383 = vmatpush1.bf16.msra.mxu1 %v452_v9  ;;  %v539_v6 = vsel %vm536_vm3, %v1966_v24, %v1971_v48  ;;  %v540_v7 = vsel %vm536_vm3, %v1967_v60, %v1972_v1 }
 0x108   : > { %v563_v21 = vpack.c.bf16 %v542_v2, %v541_v41  ;;  %1425 = vmatprep.subr.bf16.mxu0 %v455_v22  ;;  %v1975_v5 = vpop.permute.xlu0 %1974  ;;  %v1980_v40 = vpop.permute.xlu1 %1979  ;;  %v564_v23 = vpack.c.bf16 %v540_v7, %v539_v6 }
 0x109   : > { %1426 = vmatpush1.bf16.msra.mxu0 %v454_v39  ;;  %v1977_v3 = vunpack.i.h.bf16 %v1975_v5  ;;  %v1976_v13 = vunpack.i.l.bf16 %v1975_v5  ;;  %v1982_v43 = vunpack.i.h.bf16 %v1980_v40  ;;  %v1981_v57 = vunpack.i.l.bf16 %v1980_v40 }
 0x10a   : > { %1384 = vmatprep.subr.bf16.mxu1 %v564_v23 }
 0x10b   : > { %v537_v35 = vsel %vm536_vm3, %v1971_v48, %v1976_v13  ;;  %v538_v46 = vsel %vm536_vm3, %v1972_v1, %v1977_v3  ;;  %v652_v0 = vsel %vm647_vm4, %v1851_v51, %v1981_v57  ;;  %v653_v34 = vsel %vm647_vm4, %v1852_v36, %v1982_v43  ;;  %1385 = vmatpush1.bf16.msra.mxu1 %v563_v21 }
 0x10c   : > { %v565_v42 = vpack.c.bf16 %v538_v46, %v537_v35  ;;  %v1985_v33 = vpop.permute.xlu0 %1984  ;;  %v1990_v9 = vpop.permute.xlu1 %1989  ;;  %v555_v56 = vsel %vm536_vm3, %v1976_v13, %v1696_v32  ;;  %v556_v54 = vsel %vm536_vm3, %v1977_v3, %v1697_v31  ;;  %v674_v8 = vpack.c.bf16 %v653_v34, %v652_v0 }
 0x10d   : > { %v1987_v51 = vunpack.i.h.bf16 %v1985_v33  ;;  %v1986_v49 = vunpack.i.l.bf16 %v1985_v33  ;;  %v1992_v4 = vunpack.i.h.bf16 %v1990_v9  ;;  %v1991_v53 = vunpack.i.l.bf16 %v1990_v9 }
 0x10e   : > { %v566_v36 = vpack.c.bf16 %v556_v54, %v555_v56  ;;  %v2956_v0 = vunpack.i.l.bf16 %v2373_v10 }
 0x10f   : > { %v649_v39 = vsel %vm647_vm4, %v1987_v51, %v1992_v4  ;;  %v648_v52 = vsel %vm647_vm4, %v1986_v49, %v1991_v53  ;;  %v650_v32 = vsel %vm647_vm4, %v1981_v57, %v1986_v49  ;;  %v651_v28 = vsel %vm647_vm4, %v1982_v43, %v1987_v51 }
 0x110   : > { %v676_v63 = vpack.c.bf16 %v649_v39, %v648_v52  ;;  %1427 = vmatprep.subr.bf16.mxu0 %v566_v36  ;;  %v1995_v31 = vpop.permute.xlu0 %1994  ;;  %v2000_v62 = vpop.permute.xlu1 %1999  ;;  %v675_v30 = vpack.c.bf16 %v651_v28, %v650_v32  ;;  %v666_v58 = vsel %vm647_vm4, %v1991_v53, %v1711_v45  ;;  %v667_v60 = vsel %vm647_vm4, %v1992_v4, %v1712_v44 }
 0x111   : > { %1428 = vmatpush1.bf16.msra.mxu0 %v565_v42  ;;  %v1997_v24 = vunpack.i.h.bf16 %v1995_v31  ;;  %v1996_v1 = vunpack.i.l.bf16 %v1995_v31  ;;  %v2002_v48 = vunpack.i.h.bf16 %v2000_v62  ;;  %v2001_v22 = vunpack.i.l.bf16 %v2000_v62 }
 0x112   : > { %1386 = vmatprep.subr.bf16.mxu1 %v675_v30  ;;  %v677_v41 = vpack.c.bf16 %v667_v60, %v666_v58  ;;  %v2957_v42 = vunpack.i.h.bf16 %v2373_v10  ;;  %v2958_v52 = vunpack.i.l.bf16 %v2391_v29  ;;  %v2959_v28 = vunpack.i.h.bf16 %v2391_v29 }
 0x113   : > { %v763_v2 = vsel %vm758_vm5, %v1871_v61, %v1996_v1  ;;  %v764_v38 = vsel %vm758_vm5, %v1872_v25, %v1997_v24  ;;  %1387 = vmatpush1.bf16.msra.mxu1 %v674_v8  ;;  %v761_v44 = vsel %vm758_vm5, %v1996_v1, %v2001_v22  ;;  %v762_v45 = vsel %vm758_vm5, %v1997_v24, %v2002_v48 }
 0x114   : > { %v785_v6 = vpack.c.bf16 %v764_v38, %v763_v2  ;;  %1429 = vmatprep.subr.bf16.mxu0 %v677_v41  ;;  %v2005_v7 = vpop.permute.xlu0 %2004  ;;  %v2010_v21 = vpop.permute.xlu1 %2009  ;;  %v786_v5 = vpack.c.bf16 %v762_v45, %v761_v44 }
 0x115   : > { %1430 = vmatpush1.bf16.msra.mxu0 %v676_v63  ;;  %v2007_v40 = vunpack.i.h.bf16 %v2005_v7  ;;  %v2006_v61 = vunpack.i.l.bf16 %v2005_v7  ;;  %v2012_v23 = vunpack.i.h.bf16 %v2010_v21  ;;  %v2011_v14 = vunpack.i.l.bf16 %v2010_v21 }
 0x116   : > { %1388 = vmatprep.subr.bf16.mxu1 %v786_v5 }
 0x117   : > { %v759_v25 = vsel %vm758_vm5, %v2001_v22, %v2006_v61  ;;  %v760_v3 = vsel %vm758_vm5, %v2002_v48, %v2007_v40  ;;  %v874_v13 = vsel %vm869_vm6, %v1891_v17, %v2011_v14  ;;  %v875_v43 = vsel %vm869_vm6, %v1892_v18, %v2012_v23  ;;  %1389 = vmatpush1.bf16.msra.mxu1 %v785_v6 }
 0x118   : > { %v787_v57 = vpack.c.bf16 %v760_v3, %v759_v25  ;;  %v2015_v35 = vpop.permute.xlu0 %2014  ;;  %v2020_v46 = vpop.permute.xlu1 %2019  ;;  %v777_v34 = vsel %vm758_vm5, %v2006_v61, %v2956_v0  ;;  %v778_v33 = vsel %vm758_vm5, %v2007_v40, %v2957_v42  ;;  %v896_v54 = vpack.c.bf16 %v875_v43, %v874_v13 }
 0x119   : > { %v2017_v17 = vunpack.i.h.bf16 %v2015_v35  ;;  %v2016_v9 = vunpack.i.l.bf16 %v2015_v35  ;;  %v2022_v37 = vunpack.i.h.bf16 %v2020_v46  ;;  %v2021_v56 = vunpack.i.l.bf16 %v2020_v46 }
 0x11a   : > { %v788_v18 = vpack.c.bf16 %v778_v33, %v777_v34  ;;  %v2960_v40 = vunpack.i.l.bf16 %v2435_v16 }
 0x11b   : > { %v871_v51 = vsel %vm869_vm6, %v2017_v17, %v2022_v37  ;;  %v870_v49 = vsel %vm869_vm6, %v2016_v9, %v2021_v56  ;;  %v872_v4 = vsel %vm869_vm6, %v2011_v14, %v2016_v9  ;;  %v873_v10 = vsel %vm869_vm6, %v2012_v23, %v2017_v17 }
 0x11c   : > { %v898_v53 = vpack.c.bf16 %v871_v51, %v870_v49  ;;  %1431 = vmatprep.subr.bf16.mxu0 %v788_v18  ;;  %v2025_v8 = vpop.permute.xlu0 %2024  ;;  %v2030_v36 = vpop.permute.xlu1 %2029  ;;  %v897_v39 = vpack.c.bf16 %v873_v10, %v872_v4  ;;  %v888_v32 = vsel %vm869_vm6, %v2021_v56, %v2958_v52  ;;  %v889_v63 = vsel %vm869_vm6, %v2022_v37, %v2959_v28 }
 0x11d   : > { %1432 = vmatpush1.bf16.msra.mxu0 %v787_v57  ;;  %v2027_v31 = vunpack.i.h.bf16 %v2025_v8  ;;  %v2026_v62 = vunpack.i.l.bf16 %v2025_v8  ;;  %v2032_v30 = vunpack.i.h.bf16 %v2030_v36  ;;  %v2031_v58 = vunpack.i.l.bf16 %v2030_v36 }
 0x11e   : > { %1390 = vmatprep.subr.bf16.mxu1 %v897_v39  ;;  %v899_v60 = vpack.c.bf16 %v889_v63, %v888_v32  ;;  %v2961_v23 = vunpack.i.h.bf16 %v2435_v16 }
 0x11f   : > { %v985_v24 = vsel %vm980_vm7, %v1911_v19, %v2026_v62  ;;  %v986_v29 = vsel %vm980_vm7, %v1912_v20, %v2027_v31  ;;  %1391 = vmatpush1.bf16.msra.mxu1 %v896_v54  ;;  %v983_v1 = vsel %vm980_vm7, %v2026_v62, %v2031_v58  ;;  %v984_v48 = vsel %vm980_vm7, %v2027_v31, %v2032_v30 }
 0x120   : > { %v1007_v22 = vpack.c.bf16 %v986_v29, %v985_v24  ;;  %1433 = vmatprep.subr.bf16.mxu0 %v899_v60  ;;  %v2035_v41 = vpop.permute.xlu0 %2034  ;;  %v2040_v2 = vpop.permute.xlu1 %2039  ;;  %v1008_v38 = vpack.c.bf16 %v984_v48, %v983_v1 }
 0x121   : > { %1434 = vmatpush1.bf16.msra.mxu0 %v898_v53  ;;  %v2037_v44 = vunpack.i.h.bf16 %v2035_v41  ;;  %v2036_v19 = vunpack.i.l.bf16 %v2035_v41  ;;  %v2042_v45 = vunpack.i.h.bf16 %v2040_v2  ;;  %v2041_v59 = vunpack.i.l.bf16 %v2040_v2 }
 0x122   : > { %1392 = vmatprep.subr.bf16.mxu1 %v1008_v38 }
 0x123   : > { %v981_v20 = vsel %vm980_vm7, %v2031_v58, %v2036_v19  ;;  %v982_v6 = vsel %vm980_vm7, %v2032_v30, %v2037_v44  ;;  %1393 = vmatpush1.bf16.msra.mxu1 %v1007_v22  ;;  %v999_v61 = vsel %vm980_vm7, %v2036_v19, %v2960_v40  ;;  %v1000_v14 = vsel %vm980_vm7, %v2037_v44, %v2961_v23 }
 0x124   : > { %v1009_v7 = vpack.c.bf16 %v982_v6, %v981_v20  ;;  %v2045_v21 = vpop.permute.xlu0 %2044  ;;  %v2050_v5 = vpop.permute.xlu1 %2049  ;;  %v1096_v57 = vsel %vm1091_vm8, %v1931_v55, %v2041_v59  ;;  %v1097_v35 = vsel %vm1091_vm8, %v1932_v26, %v2042_v45  ;;  %v1010_v46 = vpack.c.bf16 %v1000_v14, %v999_v61 }
 0x125   : > { %v2047_v25 = vunpack.i.h.bf16 %v2045_v21  ;;  %v2046_v3 = vunpack.i.l.bf16 %v2045_v21  ;;  %v2052_v13 = vunpack.i.h.bf16 %v2050_v5  ;;  %v2051_v43 = vunpack.i.l.bf16 %v2050_v5 }
 0x126   : > { %1435 = vmatprep.subr.bf16.mxu0 %v1010_v46  ;;  %v1118_v33 = vpack.c.bf16 %v1097_v35, %v1096_v57 }
 0x127   : > { %v1093_v16 = vsel %vm1091_vm8, %v2047_v25, %v2052_v13  ;;  %v1092_v0 = vsel %vm1091_vm8, %v2046_v3, %v2051_v43  ;;  %v1094_v34 = vsel %vm1091_vm8, %v2041_v59, %v2046_v3  ;;  %v1095_v42 = vsel %vm1091_vm8, %v2042_v45, %v2047_v25  ;;  %1436 = vmatpush1.bf16.msra.mxu0 %v1009_v7 }
 0x128   : > { %v1119_v55 = vpack.c.bf16 %v1095_v42, %v1094_v34  ;;  %v1110_v27 = vsel %vm1091_vm8, %v2051_v43, %v1771_v12  ;;  %v1111_v26 = vsel %vm1091_vm8, %v2052_v13, %v1772_v11  ;;  %v1120_v17 = vpack.c.bf16 %v1093_v16, %v1092_v0 }
 0x129   : > { %v1121_v9 = vpack.c.bf16 %v1111_v26, %v1110_v27 }
 0x12a   : > { %1394 = vmatprep.subr.bf16.mxu1 %v1119_v55 }
 0x12b   : > { %1437 = vmatprep.subr.bf16.mxu0 %v1121_v9  ;;  %1395 = vmatpush1.bf16.msra.mxu1 %v1118_v33 }
 0x12c   : > { %1438 = vmatpush1.bf16.msra.mxu0 %v1120_v17 }
 0x12e   : > { %1411 = vmatmul.mubr.bf16.vlgmr.msra.gmra.mrb[4].mxu1 %v2485_v15 }
 0x12f   : > { %1454 = vmatmul.mubr.bf16.vlgmr.msra.gmra.mrb[8].mxu0 %v2485_v15 }
 0x135   : > { %v1229_v37 = vpop.permute.xlu0 %1228 }
 0x136   : > { %v1234_v56 = vpop.permute.xlu1 %1233 }
 0x191   : > { %v1283_v12 = vpop.f32.mrb[0].mxu0 }
 0x192   : > { %v1285_v47 = vpop.f32.mrb[1].mxu0  ;;  %v1284_v54 = vadd.f32 %v1283_v12, %v1229_v37 }
 0x193   : > { %v1287_v50 = vpop.f32.mrb[2].mxu0  ;;  %v1286_v11 = vadd.f32 %v1285_v47, %v1229_v37 }
 0x194   : > { %v1288_v18 = vadd.f32 %v1287_v50, %v1234_v56  ;;  %v1289_v51 = vpop.f32.mrb[3].mxu0 }
 0x195   : > { %v1625_v49 = vpack.c.bf16 %v1286_v11, %v1284_v54  ;;  %v1290_v4 = vadd.f32 %v1289_v51, %v1234_v56 }
 0x197   : > { %1524 = vst [vmem:[%s2931_s11] sm:$0xff] %v1625_v49  ;;  %v1630_v15 = vpack.c.bf16 %v1290_v4, %v1288_v18 }
 0x199   : > { %1529 = vst [vmem:[%s2931_s11 + $0x28] sm:$0xff] %v1630_v15 }
 0x1cd   : > { %v1326_v10 = vpop.f32.mrb[0].mxu1 }
 0x1ce   : > { %v1327_v53 = vadd.f32 %v1326_v10, %v1229_v37  ;;  %v1328_v8 = vpop.f32.mrb[1].mxu1 }
 0x1cf   : > { %v1329_v36 = vadd.f32 %v1328_v8, %v1229_v37  ;;  %v1330_v39 = vpop.f32.mrb[2].mxu1 }
 0x1d0   : > { %v1331_v52 = vadd.f32 %v1330_v39, %v1234_v56  ;;  %v1332_v32 = vpop.f32.mrb[3].mxu1 }
 0x1d1   : > { %v1369_v28 = vpop.f32.mrb[4].mxu0  ;;  %v1626_v63 = vpack.c.bf16 %v1329_v36, %v1327_v53  ;;  %v1333_v31 = vadd.f32 %v1332_v32, %v1234_v56 }
 0x1d2   : > { %v1370_v62 = vadd.f32 %v1369_v28, %v1229_v37  ;;  %v1371_v30 = vpop.f32.mrb[5].mxu0 }
 0x1d3   : > { %1525 = vst [vmem:[%s2931_s11 + $0x8] sm:$0xff] %v1626_v63  ;;  %v1372_v58 = vadd.f32 %v1371_v30, %v1229_v37  ;;  %v1373_v60 = vpop.f32.mrb[6].mxu0  ;;  %v1631_v24 = vpack.c.bf16 %v1333_v31, %v1331_v52 }
 0x1d4   : > { %v1374_v29 = vadd.f32 %v1373_v60, %v1234_v56  ;;  %v1375_v1 = vpop.f32.mrb[7].mxu0 }
 0x1d5   : > { %v1627_v48 = vpack.c.bf16 %v1372_v58, %v1370_v62  ;;  %1530 = vst [vmem:[%s2931_s11 + $0x30] sm:$0xff] %v1631_v24  ;;  %v1376_v22 = vadd.f32 %v1375_v1, %v1234_v56 }
 0x1d7   : > { %1526 = vst [vmem:[%s2931_s11 + $0x10] sm:$0xff] %v1627_v48  ;;  %v1632_v41 = vpack.c.bf16 %v1376_v22, %v1374_v29 }
 0x1d9   : > { %1531 = vst [vmem:[%s2931_s11 + $0x38] sm:$0xff] %v1632_v41 }
 0x201   : > { %v1412_v2 = vpop.f32.mrb[4].mxu1 }
 0x202   : > { %v1413_v38 = vadd.f32 %v1412_v2, %v1229_v37  ;;  %v1414_v44 = vpop.f32.mrb[5].mxu1  ;;  %v1455_v19 = vpop.f32.mrb[8].mxu0 }
 0x203   : > { %v1415_v45 = vadd.f32 %v1414_v44, %v1229_v37  ;;  %v1416_v59 = vpop.f32.mrb[6].mxu1  ;;  %v1456_v20 = vadd.f32 %v1455_v19, %v1229_v37  ;;  %v1457_v6 = vpop.f32.mrb[9].mxu0 }
 0x204   : > { %v1417_v7 = vadd.f32 %v1416_v59, %v1234_v56  ;;  %v1418_v21 = vpop.f32.mrb[7].mxu1  ;;  %v1458_v40 = vadd.f32 %v1457_v6, %v1229_v37  ;;  %v1459_v61 = vpop.f32.mrb[10].mxu0 }
 0x205   : > { %v1628_v5 = vpack.c.bf16 %v1415_v45, %v1413_v38  ;;  %v1419_v23 = vadd.f32 %v1418_v21, %v1234_v56  ;;  %v1460_v14 = vadd.f32 %v1459_v61, %v1234_v56  ;;  %v1461_v25 = vpop.f32.mrb[11].mxu0 }
 0x206   : > { %v1629_v3 = vpack.c.bf16 %v1458_v40, %v1456_v20  ;;  %v1462_v43 = vadd.f32 %v1461_v25, %v1234_v56 }
 0x207   : > { %1527 = vst [vmem:[%s2931_s11 + $0x18] sm:$0xff] %v1628_v5  ;;  %v1633_v13 = vpack.c.bf16 %v1419_v23, %v1417_v7 }
 0x208   : > { %1528 = vst [vmem:[%s2931_s11 + $0x20] sm:$0xff] %v1629_v3  ;;  %v1634_v57 = vpack.c.bf16 %v1462_v43, %v1460_v14 }
 0x209   : > { %1532 = vst [vmem:[%s2931_s11 + $0x40] sm:$0xff] %v1633_v13 }
 0x20a   : > { %1533 = vst [vmem:[%s2931_s11 + $0x48] sm:$0xff] %v1634_v57 }
 0x20b PF: > { %s13_s12 = sadd.s32 1, %s2078_s12  }
 0x20c   : > { %p10_p4 = scmp.ge.s32.totalorder %s13_s12, 4  }
 0x20e   :  { %12 = sbr.rel (!%p10_p4) target bundleno = 1 (0x1), region = 62 }

</bundles_post_ra>
